<compile_context>
chip_gen: v7x
topology: tpu7x:2x2x1
jax: 0.10.0
libtpu: 0.0.40
codegen_flags: <defaults>
</compile_context>

<pallas_src>
import functools

import jax
import jax.numpy as jnp
from jax.experimental import pallas as pl
from jax.experimental.pallas import tpu as pltpu


def _residual_block_kernel(x_ref, w1_ref, b1_ref, w2_ref, b2_ref, o_ref,
                           xpad_ref, hpad_ref, *, H, W, RB):
    """Fused reflect-pad conv3x3 -> ReLU -> reflect-pad conv3x3 -> +x -> ReLU
    for ONE image (NHWC).  All intermediates stay in VMEM."""
    C = x_ref.shape[3]
    Wp = W + 2                       # padded row width
    NPAD = (H + 2) * Wp + 2          # flat padded rows (+2 spare so every tap view is in bounds)
    cdt = xpad_ref.dtype             # MXU operand dtype (bf16 on v6e/v7x)

    b1 = b1_ref[...]                 # (1, Cout) f32, hoisted once per image
    b2 = b2_ref[...]

    def pad_row(row):
        # ReflectionPad2d(1) along W for one (W, C) row -> (W+2, C).
        return jnp.concatenate([row[1:2, :], row, row[W - 2:W - 1, :]], axis=0)

    def finish_pad_rows(pad_ref):
        # Spare tail rows only ever feed junk accumulator rows, but keep them
        # deterministic (scratch persists across grid steps).
        pad_ref[NPAD - 2:NPAD, :] = jnp.zeros((2, C), cdt)
        # Row reflection: padded row 0 := padded row 2, row H+1 := row H-1.
        pad_ref[0:Wp, :] = pad_ref[2 * Wp:3 * Wp, :]
        pad_ref[(H + 1) * Wp:(H + 2) * Wp, :] = pad_ref[(H - 1) * Wp:H * Wp, :]

    def conv3x3_chunk(pad_ref, w_ref, r0):
        # 9 accumulating MXU contractions (K = C) straight from sublane-offset
        # ref views of the flat padded buffer -- no im2col copy, no col scratch.
        base = r0 * Wp
        acc = None
        for k in range(9):
            off = (k // 3) * Wp + (k % 3)
            lhs = pad_ref[base + off: base + off + RB * Wp, :]
            d = jnp.dot(lhs, w_ref[k], preferred_element_type=jnp.float32)
            acc = d if acc is None else acc + d
        return acc                   # (RB*Wp, Cout) f32; columns W, W+1 are junk

    # ---- stage 0: reflect-pad x into the flat xpad buffer -------------------
    for r0 in range(0, H, RB):
        rows = [pad_row(x_ref[0, r0 + rr, :, :]) for rr in range(RB)]
        xpad_ref[(r0 + 1) * Wp:(r0 + 1 + RB) * Wp, :] = jnp.concatenate(rows, axis=0)
    finish_pad_rows(xpad_ref)

    # ---- stage 1: h = relu(conv1(x) + b1), written reflect-padded to hpad ---
    for r0 in range(0, H, RB):
        acc = conv3x3_chunk(xpad_ref, w1_ref, r0)
        rows = []
        for rr in range(RB):
            hrow = jnp.maximum(acc[rr * Wp:rr * Wp + W, :] + b1, 0.0)
            rows.append(pad_row(hrow.astype(cdt)))   # h quantised to compute dtype
        hpad_ref[(r0 + 1) * Wp:(r0 + 1 + RB) * Wp, :] = jnp.concatenate(rows, axis=0)
    finish_pad_rows(hpad_ref)

    # ---- stage 2: out = relu(conv2(h) + b2 + x)  (elementwise kept in f32) --
    for r0 in range(0, H, RB):
        acc = conv3x3_chunk(hpad_ref, w2_ref, r0)
        for rr in range(RB):
            r = r0 + rr
            y = acc[rr * Wp:rr * Wp + W, :] + b2 + x_ref[0, r, :, :].astype(jnp.float32)
            o_ref[0, r, :, :] = jnp.maximum(y, 0.0).astype(o_ref.dtype)


def residual_block(x_nchw, w1, b1, w2, b2, *, compute_dtype=None):
    """ResidualBlock.forward. x: (N,C,H,W); w*: (Cout,Cin,3,3) OIHW; b*: (Cout,).

    compute_dtype: dtype of the MXU operands (activations / packed weights).
      Pass jnp.bfloat16 on v6e/v7x to halve HBM/VMEM and double MXU rate;
      accumulation and elementwise math stay f32; output keeps x's dtype.
    """
    N, C, H, W = x_nchw.shape
    Cout, Cin = w1.shape[0], w1.shape[1]
    assert Cin == C and Cout == C and w2.shape == (C, C, 3, 3), (
        "residual add requires in_channels == out_channels")
    assert H >= 2 and W >= 2, "ReflectionPad2d(1) requires H >= 2 and W >= 2"

    out_dtype = x_nchw.dtype
    cdt = jnp.dtype(compute_dtype) if compute_dtype is not None else jnp.dtype(out_dtype)

    def pack(w):
        # OIHW (Cout, Cin, 3, 3) -> (9, Cin, Cout), tap index k = ky*3 + kx.
        return jnp.transpose(w, (2, 3, 1, 0)).reshape(9, w.shape[1], w.shape[0]).astype(cdt)

    w1m, w2m = pack(w1), pack(w2)
    b1r = b1.reshape(1, Cout).astype(jnp.float32)
    b2r = b2.reshape(1, Cout).astype(jnp.float32)

    # One layout change for the whole fused block (kernel works in NHWC).
    x = jnp.transpose(x_nchw, (0, 2, 3, 1)).astype(cdt)

    # Row-chunk size: largest of {8,4,2,1} dividing H keeps the per-chunk f32
    # accumulator register-sized while covering H exactly.
    RB = next(rb for rb in (8, 4, 2, 1) if H % rb == 0)
    Wp, NPAD = W + 2, (H + 2) * (W + 2) + 2
    csize = cdt.itemsize
    osize = jnp.dtype(out_dtype).itemsize

    # Explicit VMEM budget from the actual buffers (+2x headroom for chunk
    # accumulators / operand staging), clamped to v7x's 64 MiB physical VMEM.
    vmem_bytes = (2 * H * W * C * csize            # double-buffered input block
                  + 2 * H * W * Cout * osize       # double-buffered output block
                  + 2 * NPAD * C * csize           # xpad + hpad scratch
                  + 2 * 9 * C * Cout * csize       # resident packed weights
                  + 2 * 4 * Cout                   # biases (f32)
                  + 4 * RB * Wp * (4 * Cout + csize * C))   # chunk acc + lhs staging
    vmem_limit = int(min(64 * 1024 * 1024, max(2 * vmem_bytes, 16 * 1024 * 1024)))

    flops = N * 2 * (2 * H * W * 9 * C * Cout)      # two 3x3 convs
    bytes_accessed = (N * H * W * C * csize + N * H * W * Cout * osize
                      + 2 * 9 * C * Cout * csize + 2 * 4 * Cout)

    y = pl.pallas_call(
        functools.partial(_residual_block_kernel, H=H, W=W, RB=RB),
        grid=(N,),
        in_specs=[
            pl.BlockSpec((1, H, W, C), lambda n: (n, 0, 0, 0)),     # x: one image/step
            pl.BlockSpec((9, C, Cout), lambda n: (0, 0, 0)),        # w1 taps (resident)
            pl.BlockSpec((1, Cout), lambda n: (0, 0)),              # b1 (f32)
            pl.BlockSpec((9, C, Cout), lambda n: (0, 0, 0)),        # w2 taps (resident)
            pl.BlockSpec((1, Cout), lambda n: (0, 0)),              # b2 (f32)
        ],
        out_specs=pl.BlockSpec((1, H, W, Cout), lambda n: (n, 0, 0, 0)),
        out_shape=jax.ShapeDtypeStruct((N, H, W, Cout), out_dtype),
        scratch_shapes=[
            pltpu.VMEM((NPAD, C), cdt),    # flat reflect-padded x
            pltpu.VMEM((NPAD, C), cdt),    # flat reflect-padded h
        ],
        compiler_params=pltpu.CompilerParams(
            dimension_semantics=("parallel",),
            vmem_limit_bytes=vmem_limit),
        cost_estimate=pl.CostEstimate(
            flops=flops, transcendentals=0, bytes_accessed=bytes_accessed),
    )(x, w1m, b1r, w2m, b2r)

    return jnp.transpose(y, (0, 3, 1, 2))           # back to NCHW


def _reference_block(x, w1, b1, w2, b2):
    """Pure-JAX/XLA reference (NCHW, OIHW) for correctness checking."""
    def conv(a, w, b):
        ap = jnp.pad(a, ((0, 0), (0, 0), (1, 1), (1, 1)), mode="reflect")
        y = jax.lax.conv_general_dilated(
            ap, w, (1, 1), "VALID",
            dimension_numbers=("NCHW", "OIHW", "NCHW"))
        return y + b[None, :, None, None]
    h = jnp.maximum(conv(x, w1, b1), 0.0)
    return jnp.maximum(conv(h, w2, b2) + x, 0.0)


if __name__ == "__main__":
    # ResidualBlock(C, C) — the residual add requires in_channels == out_channels.
    N, C, H, W = 2, 4, 16, 16

    key = jax.random.PRNGKey(0)
    kx, kw1, kb1, kw2, kb2 = jax.random.split(key, 5)

    x = jax.random.normal(kx, (N, C, H, W), dtype=jnp.float32)
    # Shapes follow nn.Conv2d(C, C, 3): weight (Cout, Cin, 3, 3), bias (Cout,)
    w1 = jax.random.normal(kw1, (C, C, 3, 3), dtype=jnp.float32) * 0.1
    b1 = jax.random.normal(kb1, (C,), dtype=jnp.float32) * 0.1
    w2 = jax.random.normal(kw2, (C, C, 3, 3), dtype=jnp.float32) * 0.1
    b2 = jax.random.normal(kb2, (C,), dtype=jnp.float32) * 0.1

    ref = jax.block_until_ready(_reference_block(x, w1, b1, w2, b2))

    # f32 path.
    out = jax.block_until_ready(jax.jit(residual_block)(x, w1, b1, w2, b2))
    assert out.shape == (N, C, H, W)
    assert jnp.allclose(out, ref, atol=1e-4, rtol=1e-4), "f32 mismatch vs reference"

    # bf16 MXU-operand path (recommended setting on v6e/v7x); intermediate h is
    # quantised to bf16, so compare with a loose tolerance.
    out_bf16 = jax.block_until_ready(
        jax.jit(functools.partial(residual_block, compute_dtype=jnp.bfloat16))(
            x, w1, b1, w2, b2))
    assert out_bf16.dtype == x.dtype
    assert jnp.allclose(out_bf16, ref, atol=1e-1, rtol=1e-1), "bf16 mismatch vs reference"

    print("KERNEL_OK")
</pallas_src>

<mosaic_0001>
module attributes {stable_mosaic.version = 11 : i64} {
  func.func @_residual_block_kernel(%arg0: i32, %arg1: memref<1x16x16x4xf32, #tpu.memory_space<vmem>>, %arg2: memref<9x4x4xf32, #tpu.memory_space<vmem>>, %arg3: memref<1x4xf32, #tpu.memory_space<vmem>>, %arg4: memref<9x4x4xf32, #tpu.memory_space<vmem>>, %arg5: memref<1x4xf32, #tpu.memory_space<vmem>>, %arg6: memref<1x16x16x4xf32, #tpu.memory_space<vmem>>, %arg7: memref<326x4xf32, #tpu.memory_space<vmem>>, %arg8: memref<326x4xf32, #tpu.memory_space<vmem>>) attributes {dimension_semantics = [#tpu.dimension_semantics<parallel>], iteration_bounds = array<i64: 2>, scalar_prefetch = 0 : i64, scratch_operands = 2 : i64, tpu.core_type = #tpu.core_type<tc>, window_params = [{transform_indices = @transform_0, window_bounds = array<i64: 1, 16, 16, 4>}, {pipeline_mode = #tpu.pipeline_mode<synchronous>, transform_indices = @transform_1, window_bounds = array<i64: 9, 4, 4>}, {pipeline_mode = #tpu.pipeline_mode<synchronous>, transform_indices = @transform_2, window_bounds = array<i64: 1, 4>}, {pipeline_mode = #tpu.pipeline_mode<synchronous>, transform_indices = @transform_3, window_bounds = array<i64: 9, 4, 4>}, {pipeline_mode = #tpu.pipeline_mode<synchronous>, transform_indices = @transform_4, window_bounds = array<i64: 1, 4>}, {transform_indices = @transform_5, window_bounds = array<i64: 1, 16, 16, 4>}]} {
    %c0 = arith.constant 0 : index
    %c0_0 = arith.constant 0 : index
    %0 = vector.load %arg3[%c0, %c0_0] : memref<1x4xf32, #tpu.memory_space<vmem>>, vector<1x4xf32>
    %c0_1 = arith.constant 0 : index
    %c0_2 = arith.constant 0 : index
    %1 = vector.load %arg5[%c0_1, %c0_2] : memref<1x4xf32, #tpu.memory_space<vmem>>, vector<1x4xf32>
    %c0_3 = arith.constant 0 : index
    %c0_4 = arith.constant 0 : index
    %c0_5 = arith.constant 0 : index
    %c0_6 = arith.constant 0 : index
    %2 = vector.load %arg1[%c0_3, %c0_4, %c0_5, %c0_6] : memref<1x16x16x4xf32, #tpu.memory_space<vmem>>, vector<1x1x16x4xf32>
    %3 = vector.shape_cast %2 : vector<1x1x16x4xf32> to vector<16x4xf32>
    %4 = vector.extract_strided_slice %3 {offsets = [1, 0], sizes = [1, 4], strides = [1, 1]} : vector<16x4xf32> to vector<1x4xf32>
    %5 = vector.extract_strided_slice %3 {offsets = [14, 0], sizes = [1, 4], strides = [1, 1]} : vector<16x4xf32> to vector<1x4xf32>
    %6 = tpu.concatenate %4, %3, %5 in 0 : vector<1x4xf32>, vector<16x4xf32>, vector<1x4xf32> -> vector<18x4xf32>
    %c0_7 = arith.constant 0 : index
    %c1 = arith.constant 1 : index
    %c0_8 = arith.constant 0 : index
    %c0_9 = arith.constant 0 : index
    %7 = vector.load %arg1[%c0_7, %c1, %c0_8, %c0_9] : memref<1x16x16x4xf32, #tpu.memory_space<vmem>>, vector<1x1x16x4xf32>
    %8 = vector.shape_cast %7 : vector<1x1x16x4xf32> to vector<16x4xf32>
    %9 = vector.extract_strided_slice %8 {offsets = [1, 0], sizes = [1, 4], strides = [1, 1]} : vector<16x4xf32> to vector<1x4xf32>
    %10 = vector.extract_strided_slice %8 {offsets = [14, 0], sizes = [1, 4], strides = [1, 1]} : vector<16x4xf32> to vector<1x4xf32>
    %11 = tpu.concatenate %9, %8, %10 in 0 : vector<1x4xf32>, vector<16x4xf32>, vector<1x4xf32> -> vector<18x4xf32>
    %c0_10 = arith.constant 0 : index
    %c2 = arith.constant 2 : index
    %c0_11 = arith.constant 0 : index
    %c0_12 = arith.constant 0 : index
    %12 = vector.load %arg1[%c0_10, %c2, %c0_11, %c0_12] : memref<1x16x16x4xf32, #tpu.memory_space<vmem>>, vector<1x1x16x4xf32>
    %13 = vector.shape_cast %12 : vector<1x1x16x4xf32> to vector<16x4xf32>
    %14 = vector.extract_strided_slice %13 {offsets = [1, 0], sizes = [1, 4], strides = [1, 1]} : vector<16x4xf32> to vector<1x4xf32>
    %15 = vector.extract_strided_slice %13 {offsets = [14, 0], sizes = [1, 4], strides = [1, 1]} : vector<16x4xf32> to vector<1x4xf32>
    %16 = tpu.concatenate %14, %13, %15 in 0 : vector<1x4xf32>, vector<16x4xf32>, vector<1x4xf32> -> vector<18x4xf32>
    %c0_13 = arith.constant 0 : index
    %c3 = arith.constant 3 : index
    %c0_14 = arith.constant 0 : index
    %c0_15 = arith.constant 0 : index
    %17 = vector.load %arg1[%c0_13, %c3, %c0_14, %c0_15] : memref<1x16x16x4xf32, #tpu.memory_space<vmem>>, vector<1x1x16x4xf32>
    %18 = vector.shape_cast %17 : vector<1x1x16x4xf32> to vector<16x4xf32>
    %19 = vector.extract_strided_slice %18 {offsets = [1, 0], sizes = [1, 4], strides = [1, 1]} : vector<16x4xf32> to vector<1x4xf32>
    %20 = vector.extract_strided_slice %18 {offsets = [14, 0], sizes = [1, 4], strides = [1, 1]} : vector<16x4xf32> to vector<1x4xf32>
    %21 = tpu.concatenate %19, %18, %20 in 0 : vector<1x4xf32>, vector<16x4xf32>, vector<1x4xf32> -> vector<18x4xf32>
    %c0_16 = arith.constant 0 : index
    %c4 = arith.constant 4 : index
    %c0_17 = arith.constant 0 : index
    %c0_18 = arith.constant 0 : index
    %22 = vector.load %arg1[%c0_16, %c4, %c0_17, %c0_18] : memref<1x16x16x4xf32, #tpu.memory_space<vmem>>, vector<1x1x16x4xf32>
    %23 = vector.shape_cast %22 : vector<1x1x16x4xf32> to vector<16x4xf32>
    %24 = vector.extract_strided_slice %23 {offsets = [1, 0], sizes = [1, 4], strides = [1, 1]} : vector<16x4xf32> to vector<1x4xf32>
    %25 = vector.extract_strided_slice %23 {offsets = [14, 0], sizes = [1, 4], strides = [1, 1]} : vector<16x4xf32> to vector<1x4xf32>
    %26 = tpu.concatenate %24, %23, %25 in 0 : vector<1x4xf32>, vector<16x4xf32>, vector<1x4xf32> -> vector<18x4xf32>
    %c0_19 = arith.constant 0 : index
    %c5 = arith.constant 5 : index
    %c0_20 = arith.constant 0 : index
    %c0_21 = arith.constant 0 : index
    %27 = vector.load %arg1[%c0_19, %c5, %c0_20, %c0_21] : memref<1x16x16x4xf32, #tpu.memory_space<vmem>>, vector<1x1x16x4xf32>
    %28 = vector.shape_cast %27 : vector<1x1x16x4xf32> to vector<16x4xf32>
    %29 = vector.extract_strided_slice %28 {offsets = [1, 0], sizes = [1, 4], strides = [1, 1]} : vector<16x4xf32> to vector<1x4xf32>
    %30 = vector.extract_strided_slice %28 {offsets = [14, 0], sizes = [1, 4], strides = [1, 1]} : vector<16x4xf32> to vector<1x4xf32>
    %31 = tpu.concatenate %29, %28, %30 in 0 : vector<1x4xf32>, vector<16x4xf32>, vector<1x4xf32> -> vector<18x4xf32>
    %c0_22 = arith.constant 0 : index
    %c6 = arith.constant 6 : index
    %c0_23 = arith.constant 0 : index
    %c0_24 = arith.constant 0 : index
    %32 = vector.load %arg1[%c0_22, %c6, %c0_23, %c0_24] : memref<1x16x16x4xf32, #tpu.memory_space<vmem>>, vector<1x1x16x4xf32>
    %33 = vector.shape_cast %32 : vector<1x1x16x4xf32> to vector<16x4xf32>
    %34 = vector.extract_strided_slice %33 {offsets = [1, 0], sizes = [1, 4], strides = [1, 1]} : vector<16x4xf32> to vector<1x4xf32>
    %35 = vector.extract_strided_slice %33 {offsets = [14, 0], sizes = [1, 4], strides = [1, 1]} : vector<16x4xf32> to vector<1x4xf32>
    %36 = tpu.concatenate %34, %33, %35 in 0 : vector<1x4xf32>, vector<16x4xf32>, vector<1x4xf32> -> vector<18x4xf32>
    %c0_25 = arith.constant 0 : index
    %c7 = arith.constant 7 : index
    %c0_26 = arith.constant 0 : index
    %c0_27 = arith.constant 0 : index
    %37 = vector.load %arg1[%c0_25, %c7, %c0_26, %c0_27] : memref<1x16x16x4xf32, #tpu.memory_space<vmem>>, vector<1x1x16x4xf32>
    %38 = vector.shape_cast %37 : vector<1x1x16x4xf32> to vector<16x4xf32>
    %39 = vector.extract_strided_slice %38 {offsets = [1, 0], sizes = [1, 4], strides = [1, 1]} : vector<16x4xf32> to vector<1x4xf32>
    %40 = vector.extract_strided_slice %38 {offsets = [14, 0], sizes = [1, 4], strides = [1, 1]} : vector<16x4xf32> to vector<1x4xf32>
    %41 = tpu.concatenate %39, %38, %40 in 0 : vector<1x4xf32>, vector<16x4xf32>, vector<1x4xf32> -> vector<18x4xf32>
    %42 = tpu.concatenate %6, %11, %16, %21, %26, %31, %36, %41 in 0 : vector<18x4xf32>, vector<18x4xf32>, vector<18x4xf32>, vector<18x4xf32>, vector<18x4xf32>, vector<18x4xf32>, vector<18x4xf32>, vector<18x4xf32> -> vector<144x4xf32>
    %c18 = arith.constant 18 : index
    %c0_28 = arith.constant 0 : index
    %43 = vector.load %arg7[%c18, %c0_28] : memref<326x4xf32, #tpu.memory_space<vmem>>, vector<144x4xf32>
    tpu.vector_store %arg7[%c18, %c0_28], %42 {strides = array<i32>} : memref<326x4xf32, #tpu.memory_space<vmem>>, vector<144x4xf32>,
    %c0_29 = arith.constant 0 : index
    %c8 = arith.constant 8 : index
    %c0_30 = arith.constant 0 : index
    %c0_31 = arith.constant 0 : index
    %44 = vector.load %arg1[%c0_29, %c8, %c0_30, %c0_31] : memref<1x16x16x4xf32, #tpu.memory_space<vmem>>, vector<1x1x16x4xf32>
    %45 = vector.shape_cast %44 : vector<1x1x16x4xf32> to vector<16x4xf32>
    %46 = vector.extract_strided_slice %45 {offsets = [1, 0], sizes = [1, 4], strides = [1, 1]} : vector<16x4xf32> to vector<1x4xf32>
    %47 = vector.extract_strided_slice %45 {offsets = [14, 0], sizes = [1, 4], strides = [1, 1]} : vector<16x4xf32> to vector<1x4xf32>
    %48 = tpu.concatenate %46, %45, %47 in 0 : vector<1x4xf32>, vector<16x4xf32>, vector<1x4xf32> -> vector<18x4xf32>
    %c0_32 = arith.constant 0 : index
    %c9 = arith.constant 9 : index
    %c0_33 = arith.constant 0 : index
    %c0_34 = arith.constant 0 : index
    %49 = vector.load %arg1[%c0_32, %c9, %c0_33, %c0_34] : memref<1x16x16x4xf32, #tpu.memory_space<vmem>>, vector<1x1x16x4xf32>
    %50 = vector.shape_cast %49 : vector<1x1x16x4xf32> to vector<16x4xf32>
    %51 = vector.extract_strided_slice %50 {offsets = [1, 0], sizes = [1, 4], strides = [1, 1]} : vector<16x4xf32> to vector<1x4xf32>
    %52 = vector.extract_strided_slice %50 {offsets = [14, 0], sizes = [1, 4], strides = [1, 1]} : vector<16x4xf32> to vector<1x4xf32>
    %53 = tpu.concatenate %51, %50, %52 in 0 : vector<1x4xf32>, vector<16x4xf32>, vector<1x4xf32> -> vector<18x4xf32>
    %c0_35 = arith.constant 0 : index
    %c10 = arith.constant 10 : index
    %c0_36 = arith.constant 0 : index
    %c0_37 = arith.constant 0 : index
    %54 = vector.load %arg1[%c0_35, %c10, %c0_36, %c0_37] : memref<1x16x16x4xf32, #tpu.memory_space<vmem>>, vector<1x1x16x4xf32>
    %55 = vector.shape_cast %54 : vector<1x1x16x4xf32> to vector<16x4xf32>
    %56 = vector.extract_strided_slice %55 {offsets = [1, 0], sizes = [1, 4], strides = [1, 1]} : vector<16x4xf32> to vector<1x4xf32>
    %57 = vector.extract_strided_slice %55 {offsets = [14, 0], sizes = [1, 4], strides = [1, 1]} : vector<16x4xf32> to vector<1x4xf32>
    %58 = tpu.concatenate %56, %55, %57 in 0 : vector<1x4xf32>, vector<16x4xf32>, vector<1x4xf32> -> vector<18x4xf32>
    %c0_38 = arith.constant 0 : index
    %c11 = arith.constant 11 : index
    %c0_39 = arith.constant 0 : index
    %c0_40 = arith.constant 0 : index
    %59 = vector.load %arg1[%c0_38, %c11, %c0_39, %c0_40] : memref<1x16x16x4xf32, #tpu.memory_space<vmem>>, vector<1x1x16x4xf32>
    %60 = vector.shape_cast %59 : vector<1x1x16x4xf32> to vector<16x4xf32>
    %61 = vector.extract_strided_slice %60 {offsets = [1, 0], sizes = [1, 4], strides = [1, 1]} : vector<16x4xf32> to vector<1x4xf32>
    %62 = vector.extract_strided_slice %60 {offsets = [14, 0], sizes = [1, 4], strides = [1, 1]} : vector<16x4xf32> to vector<1x4xf32>
    %63 = tpu.concatenate %61, %60, %62 in 0 : vector<1x4xf32>, vector<16x4xf32>, vector<1x4xf32> -> vector<18x4xf32>
    %c0_41 = arith.constant 0 : index
    %c12 = arith.constant 12 : index
    %c0_42 = arith.constant 0 : index
    %c0_43 = arith.constant 0 : index
    %64 = vector.load %arg1[%c0_41, %c12, %c0_42, %c0_43] : memref<1x16x16x4xf32, #tpu.memory_space<vmem>>, vector<1x1x16x4xf32>
    %65 = vector.shape_cast %64 : vector<1x1x16x4xf32> to vector<16x4xf32>
    %66 = vector.extract_strided_slice %65 {offsets = [1, 0], sizes = [1, 4], strides = [1, 1]} : vector<16x4xf32> to vector<1x4xf32>
    %67 = vector.extract_strided_slice %65 {offsets = [14, 0], sizes = [1, 4], strides = [1, 1]} : vector<16x4xf32> to vector<1x4xf32>
    %68 = tpu.concatenate %66, %65, %67 in 0 : vector<1x4xf32>, vector<16x4xf32>, vector<1x4xf32> -> vector<18x4xf32>
    %c0_44 = arith.constant 0 : index
    %c13 = arith.constant 13 : index
    %c0_45 = arith.constant 0 : index
    %c0_46 = arith.constant 0 : index
    %69 = vector.load %arg1[%c0_44, %c13, %c0_45, %c0_46] : memref<1x16x16x4xf32, #tpu.memory_space<vmem>>, vector<1x1x16x4xf32>
    %70 = vector.shape_cast %69 : vector<1x1x16x4xf32> to vector<16x4xf32>
    %71 = vector.extract_strided_slice %70 {offsets = [1, 0], sizes = [1, 4], strides = [1, 1]} : vector<16x4xf32> to vector<1x4xf32>
    %72 = vector.extract_strided_slice %70 {offsets = [14, 0], sizes = [1, 4], strides = [1, 1]} : vector<16x4xf32> to vector<1x4xf32>
    %73 = tpu.concatenate %71, %70, %72 in 0 : vector<1x4xf32>, vector<16x4xf32>, vector<1x4xf32> -> vector<18x4xf32>
    %c0_47 = arith.constant 0 : index
    %c14 = arith.constant 14 : index
    %c0_48 = arith.constant 0 : index
    %c0_49 = arith.constant 0 : index
    %74 = vector.load %arg1[%c0_47, %c14, %c0_48, %c0_49] : memref<1x16x16x4xf32, #tpu.memory_space<vmem>>, vector<1x1x16x4xf32>
    %75 = vector.shape_cast %74 : vector<1x1x16x4xf32> to vector<16x4xf32>
    %76 = vector.extract_strided_slice %75 {offsets = [1, 0], sizes = [1, 4], strides = [1, 1]} : vector<16x4xf32> to vector<1x4xf32>
    %77 = vector.extract_strided_slice %75 {offsets = [14, 0], sizes = [1, 4], strides = [1, 1]} : vector<16x4xf32> to vector<1x4xf32>
    %78 = tpu.concatenate %76, %75, %77 in 0 : vector<1x4xf32>, vector<16x4xf32>, vector<1x4xf32> -> vector<18x4xf32>
    %c0_50 = arith.constant 0 : index
    %c15 = arith.constant 15 : index
    %c0_51 = arith.constant 0 : index
    %c0_52 = arith.constant 0 : index
    %79 = vector.load %arg1[%c0_50, %c15, %c0_51, %c0_52] : memref<1x16x16x4xf32, #tpu.memory_space<vmem>>, vector<1x1x16x4xf32>
    %80 = vector.shape_cast %79 : vector<1x1x16x4xf32> to vector<16x4xf32>
    %81 = vector.extract_strided_slice %80 {offsets = [1, 0], sizes = [1, 4], strides = [1, 1]} : vector<16x4xf32> to vector<1x4xf32>
    %82 = vector.extract_strided_slice %80 {offsets = [14, 0], sizes = [1, 4], strides = [1, 1]} : vector<16x4xf32> to vector<1x4xf32>
    %83 = tpu.concatenate %81, %80, %82 in 0 : vector<1x4xf32>, vector<16x4xf32>, vector<1x4xf32> -> vector<18x4xf32>
    %84 = tpu.concatenate %48, %53, %58, %63, %68, %73, %78, %83 in 0 : vector<18x4xf32>, vector<18x4xf32>, vector<18x4xf32>, vector<18x4xf32>, vector<18x4xf32>, vector<18x4xf32>, vector<18x4xf32>, vector<18x4xf32> -> vector<144x4xf32>
    %c162 = arith.constant 162 : index
    %c0_53 = arith.constant 0 : index
    %85 = vector.load %arg7[%c162, %c0_53] : memref<326x4xf32, #tpu.memory_space<vmem>>, vector<144x4xf32>
    tpu.vector_store %arg7[%c162, %c0_53], %84 {strides = array<i32>} : memref<326x4xf32, #tpu.memory_space<vmem>>, vector<144x4xf32>,
    %cst = arith.constant 0.000000e+00 : f32
    %86 = vector.broadcast %cst : f32 to vector<2x4xf32>
    %c324 = arith.constant 324 : index
    %c0_54 = arith.constant 0 : index
    %87 = vector.load %arg7[%c324, %c0_54] : memref<326x4xf32, #tpu.memory_space<vmem>>, vector<2x4xf32>
    tpu.vector_store %arg7[%c324, %c0_54], %86 {strides = array<i32>} : memref<326x4xf32, #tpu.memory_space<vmem>>, vector<2x4xf32>,
    %c36 = arith.constant 36 : index
    %c0_55 = arith.constant 0 : index
    %88 = vector.load %arg7[%c36, %c0_55] : memref<326x4xf32, #tpu.memory_space<vmem>>, vector<18x4xf32>
    %c0_56 = arith.constant 0 : index
    %c0_57 = arith.constant 0 : index
    %89 = vector.load %arg7[%c0_56, %c0_57] : memref<326x4xf32, #tpu.memory_space<vmem>>, vector<18x4xf32>
    tpu.vector_store %arg7[%c0_56, %c0_57], %88 {strides = array<i32>} : memref<326x4xf32, #tpu.memory_space<vmem>>, vector<18x4xf32>,
    %c270 = arith.constant 270 : index
    %c0_58 = arith.constant 0 : index
    %90 = vector.load %arg7[%c270, %c0_58] : memref<326x4xf32, #tpu.memory_space<vmem>>, vector<18x4xf32>
    %c306 = arith.constant 306 : index
    %c0_59 = arith.constant 0 : index
    %91 = vector.load %arg7[%c306, %c0_59] : memref<326x4xf32, #tpu.memory_space<vmem>>, vector<18x4xf32>
    tpu.vector_store %arg7[%c306, %c0_59], %90 {strides = array<i32>} : memref<326x4xf32, #tpu.memory_space<vmem>>, vector<18x4xf32>,
    %c0_60 = arith.constant 0 : index
    %c0_61 = arith.constant 0 : index
    %92 = vector.load %arg7[%c0_60, %c0_61] : memref<326x4xf32, #tpu.memory_space<vmem>>, vector<144x4xf32>
    %c0_62 = arith.constant 0 : index
    %c0_63 = arith.constant 0 : index
    %c0_64 = arith.constant 0 : index
    %93 = vector.load %arg2[%c0_62, %c0_63, %c0_64] : memref<9x4x4xf32, #tpu.memory_space<vmem>>, vector<1x4x4xf32>
    %94 = vector.shape_cast %93 : vector<1x4x4xf32> to vector<4x4xf32>
    %cst_65 = arith.constant dense<0.000000e+00> : vector<144x4xf32>
    %95 = tpu.matmul %92, %94, %cst_65 {dimension_numbers = #tpu.dot_dimension_numbers<[1], [0], [0], [1], [0, 0, 1, 1], [], []>} : vector<144x4xf32>, vector<4x4xf32>, vector<144x4xf32> -> vector<144x4xf32>
    %c1_66 = arith.constant 1 : index
    %c0_67 = arith.constant 0 : index
    %96 = vector.load %arg7[%c1_66, %c0_67] : memref<326x4xf32, #tpu.memory_space<vmem>>, vector<144x4xf32>
    %c1_68 = arith.constant 1 : index
    %c0_69 = arith.constant 0 : index
    %c0_70 = arith.constant 0 : index
    %97 = vector.load %arg2[%c1_68, %c0_69, %c0_70] : memref<9x4x4xf32, #tpu.memory_space<vmem>>, vector<1x4x4xf32>
    %98 = vector.shape_cast %97 : vector<1x4x4xf32> to vector<4x4xf32>
    %cst_71 = arith.constant dense<0.000000e+00> : vector<144x4xf32>
    %99 = tpu.matmul %96, %98, %cst_71 {dimension_numbers = #tpu.dot_dimension_numbers<[1], [0], [0], [1], [0, 0, 1, 1], [], []>} : vector<144x4xf32>, vector<4x4xf32>, vector<144x4xf32> -> vector<144x4xf32>
    %100 = arith.addf %95, %99 : vector<144x4xf32>
    %c2_72 = arith.constant 2 : index
    %c0_73 = arith.constant 0 : index
    %101 = vector.load %arg7[%c2_72, %c0_73] : memref<326x4xf32, #tpu.memory_space<vmem>>, vector<144x4xf32>
    %c2_74 = arith.constant 2 : index
    %c0_75 = arith.constant 0 : index
    %c0_76 = arith.constant 0 : index
    %102 = vector.load %arg2[%c2_74, %c0_75, %c0_76] : memref<9x4x4xf32, #tpu.memory_space<vmem>>, vector<1x4x4xf32>
    %103 = vector.shape_cast %102 : vector<1x4x4xf32> to vector<4x4xf32>
    %cst_77 = arith.constant dense<0.000000e+00> : vector<144x4xf32>
    %104 = tpu.matmul %101, %103, %cst_77 {dimension_numbers = #tpu.dot_dimension_numbers<[1], [0], [0], [1], [0, 0, 1, 1], [], []>} : vector<144x4xf32>, vector<4x4xf32>, vector<144x4xf32> -> vector<144x4xf32>
    %105 = arith.addf %100, %104 : vector<144x4xf32>
    %c18_78 = arith.constant 18 : index
    %c0_79 = arith.constant 0 : index
    %106 = vector.load %arg7[%c18_78, %c0_79] : memref<326x4xf32, #tpu.memory_space<vmem>>, vector<144x4xf32>
    %c3_80 = arith.constant 3 : index
    %c0_81 = arith.constant 0 : index
    %c0_82 = arith.constant 0 : index
    %107 = vector.load %arg2[%c3_80, %c0_81, %c0_82] : memref<9x4x4xf32, #tpu.memory_space<vmem>>, vector<1x4x4xf32>
    %108 = vector.shape_cast %107 : vector<1x4x4xf32> to vector<4x4xf32>
    %cst_83 = arith.constant dense<0.000000e+00> : vector<144x4xf32>
    %109 = tpu.matmul %106, %108, %cst_83 {dimension_numbers = #tpu.dot_dimension_numbers<[1], [0], [0], [1], [0, 0, 1, 1], [], []>} : vector<144x4xf32>, vector<4x4xf32>, vector<144x4xf32> -> vector<144x4xf32>
    %110 = arith.addf %105, %109 : vector<144x4xf32>
    %c19 = arith.constant 19 : index
    %c0_84 = arith.constant 0 : index
    %111 = vector.load %arg7[%c19, %c0_84] : memref<326x4xf32, #tpu.memory_space<vmem>>, vector<144x4xf32>
    %c4_85 = arith.constant 4 : index
    %c0_86 = arith.constant 0 : index
    %c0_87 = arith.constant 0 : index
    %112 = vector.load %arg2[%c4_85, %c0_86, %c0_87] : memref<9x4x4xf32, #tpu.memory_space<vmem>>, vector<1x4x4xf32>
    %113 = vector.shape_cast %112 : vector<1x4x4xf32> to vector<4x4xf32>
    %cst_88 = arith.constant dense<0.000000e+00> : vector<144x4xf32>
    %114 = tpu.matmul %111, %113, %cst_88 {dimension_numbers = #tpu.dot_dimension_numbers<[1], [0], [0], [1], [0, 0, 1, 1], [], []>} : vector<144x4xf32>, vector<4x4xf32>, vector<144x4xf32> -> vector<144x4xf32>
    %115 = arith.addf %110, %114 : vector<144x4xf32>
    %c20 = arith.constant 20 : index
    %c0_89 = arith.constant 0 : index
    %116 = vector.load %arg7[%c20, %c0_89] : memref<326x4xf32, #tpu.memory_space<vmem>>, vector<144x4xf32>
    %c5_90 = arith.constant 5 : index
    %c0_91 = arith.constant 0 : index
    %c0_92 = arith.constant 0 : index
    %117 = vector.load %arg2[%c5_90, %c0_91, %c0_92] : memref<9x4x4xf32, #tpu.memory_space<vmem>>, vector<1x4x4xf32>
    %118 = vector.shape_cast %117 : vector<1x4x4xf32> to vector<4x4xf32>
    %cst_93 = arith.constant dense<0.000000e+00> : vector<144x4xf32>
    %119 = tpu.matmul %116, %118, %cst_93 {dimension_numbers = #tpu.dot_dimension_numbers<[1], [0], [0], [1], [0, 0, 1, 1], [], []>} : vector<144x4xf32>, vector<4x4xf32>, vector<144x4xf32> -> vector<144x4xf32>
    %120 = arith.addf %115, %119 : vector<144x4xf32>
    %c36_94 = arith.constant 36 : index
    %c0_95 = arith.constant 0 : index
    %121 = vector.load %arg7[%c36_94, %c0_95] : memref<326x4xf32, #tpu.memory_space<vmem>>, vector<144x4xf32>
    %c6_96 = arith.constant 6 : index
    %c0_97 = arith.constant 0 : index
    %c0_98 = arith.constant 0 : index
    %122 = vector.load %arg2[%c6_96, %c0_97, %c0_98] : memref<9x4x4xf32, #tpu.memory_space<vmem>>, vector<1x4x4xf32>
    %123 = vector.shape_cast %122 : vector<1x4x4xf32> to vector<4x4xf32>
    %cst_99 = arith.constant dense<0.000000e+00> : vector<144x4xf32>
    %124 = tpu.matmul %121, %123, %cst_99 {dimension_numbers = #tpu.dot_dimension_numbers<[1], [0], [0], [1], [0, 0, 1, 1], [], []>} : vector<144x4xf32>, vector<4x4xf32>, vector<144x4xf32> -> vector<144x4xf32>
    %125 = arith.addf %120, %124 : vector<144x4xf32>
    %c37 = arith.constant 37 : index
    %c0_100 = arith.constant 0 : index
    %126 = vector.load %arg7[%c37, %c0_100] : memref<326x4xf32, #tpu.memory_space<vmem>>, vector<144x4xf32>
    %c7_101 = arith.constant 7 : index
    %c0_102 = arith.constant 0 : index
    %c0_103 = arith.constant 0 : index
    %127 = vector.load %arg2[%c7_101, %c0_102, %c0_103] : memref<9x4x4xf32, #tpu.memory_space<vmem>>, vector<1x4x4xf32>
    %128 = vector.shape_cast %127 : vector<1x4x4xf32> to vector<4x4xf32>
    %cst_104 = arith.constant dense<0.000000e+00> : vector<144x4xf32>
    %129 = tpu.matmul %126, %128, %cst_104 {dimension_numbers = #tpu.dot_dimension_numbers<[1], [0], [0], [1], [0, 0, 1, 1], [], []>} : vector<144x4xf32>, vector<4x4xf32>, vector<144x4xf32> -> vector<144x4xf32>
    %130 = arith.addf %125, %129 : vector<144x4xf32>
    %c38 = arith.constant 38 : index
    %c0_105 = arith.constant 0 : index
    %131 = vector.load %arg7[%c38, %c0_105] : memref<326x4xf32, #tpu.memory_space<vmem>>, vector<144x4xf32>
    %c8_106 = arith.constant 8 : index
    %c0_107 = arith.constant 0 : index
    %c0_108 = arith.constant 0 : index
    %132 = vector.load %arg2[%c8_106, %c0_107, %c0_108] : memref<9x4x4xf32, #tpu.memory_space<vmem>>, vector<1x4x4xf32>
    %133 = vector.shape_cast %132 : vector<1x4x4xf32> to vector<4x4xf32>
    %cst_109 = arith.constant dense<0.000000e+00> : vector<144x4xf32>
    %134 = tpu.matmul %131, %133, %cst_109 {dimension_numbers = #tpu.dot_dimension_numbers<[1], [0], [0], [1], [0, 0, 1, 1], [], []>} : vector<144x4xf32>, vector<4x4xf32>, vector<144x4xf32> -> vector<144x4xf32>
    %135 = arith.addf %130, %134 : vector<144x4xf32>
    %136 = vector.extract_strided_slice %135 {offsets = [0, 0], sizes = [16, 4], strides = [1, 1]} : vector<144x4xf32> to vector<16x4xf32>
    %137 = vector.broadcast %0 : vector<1x4xf32> to vector<16x4xf32>
    %138 = arith.addf %136, %137 : vector<16x4xf32>
    %cst_110 = arith.constant 0.000000e+00 : f32
    %139 = vector.broadcast %cst_110 : f32 to vector<16x4xf32>
    %140 = arith.maximumf %138, %139 : vector<16x4xf32>
    %141 = vector.extract_strided_slice %140 {offsets = [1, 0], sizes = [1, 4], strides = [1, 1]} : vector<16x4xf32> to vector<1x4xf32>
    %142 = vector.extract_strided_slice %140 {offsets = [14, 0], sizes = [1, 4], strides = [1, 1]} : vector<16x4xf32> to vector<1x4xf32>
    %143 = tpu.concatenate %141, %140, %142 in 0 : vector<1x4xf32>, vector<16x4xf32>, vector<1x4xf32> -> vector<18x4xf32>
    %144 = vector.extract_strided_slice %135 {offsets = [18, 0], sizes = [16, 4], strides = [1, 1]} : vector<144x4xf32> to vector<16x4xf32>
    %145 = vector.broadcast %0 : vector<1x4xf32> to vector<16x4xf32>
    %146 = arith.addf %144, %145 : vector<16x4xf32>
    %cst_111 = arith.constant 0.000000e+00 : f32
    %147 = vector.broadcast %cst_111 : f32 to vector<16x4xf32>
    %148 = arith.maximumf %146, %147 : vector<16x4xf32>
    %149 = vector.extract_strided_slice %148 {offsets = [1, 0], sizes = [1, 4], strides = [1, 1]} : vector<16x4xf32> to vector<1x4xf32>
    %150 = vector.extract_strided_slice %148 {offsets = [14, 0], sizes = [1, 4], strides = [1, 1]} : vector<16x4xf32> to vector<1x4xf32>
    %151 = tpu.concatenate %149, %148, %150 in 0 : vector<1x4xf32>, vector<16x4xf32>, vector<1x4xf32> -> vector<18x4xf32>
    %152 = vector.extract_strided_slice %135 {offsets = [36, 0], sizes = [16, 4], strides = [1, 1]} : vector<144x4xf32> to vector<16x4xf32>
    %153 = vector.broadcast %0 : vector<1x4xf32> to vector<16x4xf32>
    %154 = arith.addf %152, %153 : vector<16x4xf32>
    %cst_112 = arith.constant 0.000000e+00 : f32
    %155 = vector.broadcast %cst_112 : f32 to vector<16x4xf32>
    %156 = arith.maximumf %154, %155 : vector<16x4xf32>
    %157 = vector.extract_strided_slice %156 {offsets = [1, 0], sizes = [1, 4], strides = [1, 1]} : vector<16x4xf32> to vector<1x4xf32>
    %158 = vector.extract_strided_slice %156 {offsets = [14, 0], sizes = [1, 4], strides = [1, 1]} : vector<16x4xf32> to vector<1x4xf32>
    %159 = tpu.concatenate %157, %156, %158 in 0 : vector<1x4xf32>, vector<16x4xf32>, vector<1x4xf32> -> vector<18x4xf32>
    %160 = vector.extract_strided_slice %135 {offsets = [54, 0], sizes = [16, 4], strides = [1, 1]} : vector<144x4xf32> to vector<16x4xf32>
    %161 = vector.broadcast %0 : vector<1x4xf32> to vector<16x4xf32>
    %162 = arith.addf %160, %161 : vector<16x4xf32>
    %cst_113 = arith.constant 0.000000e+00 : f32
    %163 = vector.broadcast %cst_113 : f32 to vector<16x4xf32>
    %164 = arith.maximumf %162, %163 : vector<16x4xf32>
    %165 = vector.extract_strided_slice %164 {offsets = [1, 0], sizes = [1, 4], strides = [1, 1]} : vector<16x4xf32> to vector<1x4xf32>
    %166 = vector.extract_strided_slice %164 {offsets = [14, 0], sizes = [1, 4], strides = [1, 1]} : vector<16x4xf32> to vector<1x4xf32>
    %167 = tpu.concatenate %165, %164, %166 in 0 : vector<1x4xf32>, vector<16x4xf32>, vector<1x4xf32> -> vector<18x4xf32>
    %168 = vector.extract_strided_slice %135 {offsets = [72, 0], sizes = [16, 4], strides = [1, 1]} : vector<144x4xf32> to vector<16x4xf32>
    %169 = vector.broadcast %0 : vector<1x4xf32> to vector<16x4xf32>
    %170 = arith.addf %168, %169 : vector<16x4xf32>
    %cst_114 = arith.constant 0.000000e+00 : f32
    %171 = vector.broadcast %cst_114 : f32 to vector<16x4xf32>
    %172 = arith.maximumf %170, %171 : vector<16x4xf32>
    %173 = vector.extract_strided_slice %172 {offsets = [1, 0], sizes = [1, 4], strides = [1, 1]} : vector<16x4xf32> to vector<1x4xf32>
    %174 = vector.extract_strided_slice %172 {offsets = [14, 0], sizes = [1, 4], strides = [1, 1]} : vector<16x4xf32> to vector<1x4xf32>
    %175 = tpu.concatenate %173, %172, %174 in 0 : vector<1x4xf32>, vector<16x4xf32>, vector<1x4xf32> -> vector<18x4xf32>
    %176 = vector.extract_strided_slice %135 {offsets = [90, 0], sizes = [16, 4], strides = [1, 1]} : vector<144x4xf32> to vector<16x4xf32>
    %177 = vector.broadcast %0 : vector<1x4xf32> to vector<16x4xf32>
    %178 = arith.addf %176, %177 : vector<16x4xf32>
    %cst_115 = arith.constant 0.000000e+00 : f32
    %179 = vector.broadcast %cst_115 : f32 to vector<16x4xf32>
    %180 = arith.maximumf %178, %179 : vector<16x4xf32>
    %181 = vector.extract_strided_slice %180 {offsets = [1, 0], sizes = [1, 4], strides = [1, 1]} : vector<16x4xf32> to vector<1x4xf32>
    %182 = vector.extract_strided_slice %180 {offsets = [14, 0], sizes = [1, 4], strides = [1, 1]} : vector<16x4xf32> to vector<1x4xf32>
    %183 = tpu.concatenate %181, %180, %182 in 0 : vector<1x4xf32>, vector<16x4xf32>, vector<1x4xf32> -> vector<18x4xf32>
    %184 = vector.extract_strided_slice %135 {offsets = [108, 0], sizes = [16, 4], strides = [1, 1]} : vector<144x4xf32> to vector<16x4xf32>
    %185 = vector.broadcast %0 : vector<1x4xf32> to vector<16x4xf32>
    %186 = arith.addf %184, %185 : vector<16x4xf32>
    %cst_116 = arith.constant 0.000000e+00 : f32
    %187 = vector.broadcast %cst_116 : f32 to vector<16x4xf32>
    %188 = arith.maximumf %186, %187 : vector<16x4xf32>
    %189 = vector.extract_strided_slice %188 {offsets = [1, 0], sizes = [1, 4], strides = [1, 1]} : vector<16x4xf32> to vector<1x4xf32>
    %190 = vector.extract_strided_slice %188 {offsets = [14, 0], sizes = [1, 4], strides = [1, 1]} : vector<16x4xf32> to vector<1x4xf32>
    %191 = tpu.concatenate %189, %188, %190 in 0 : vector<1x4xf32>, vector<16x4xf32>, vector<1x4xf32> -> vector<18x4xf32>
    %192 = vector.extract_strided_slice %135 {offsets = [126, 0], sizes = [16, 4], strides = [1, 1]} : vector<144x4xf32> to vector<16x4xf32>
    %193 = vector.broadcast %0 : vector<1x4xf32> to vector<16x4xf32>
    %194 = arith.addf %192, %193 : vector<16x4xf32>
    %cst_117 = arith.constant 0.000000e+00 : f32
    %195 = vector.broadcast %cst_117 : f32 to vector<16x4xf32>
    %196 = arith.maximumf %194, %195 : vector<16x4xf32>
    %197 = vector.extract_strided_slice %196 {offsets = [1, 0], sizes = [1, 4], strides = [1, 1]} : vector<16x4xf32> to vector<1x4xf32>
    %198 = vector.extract_strided_slice %196 {offsets = [14, 0], sizes = [1, 4], strides = [1, 1]} : vector<16x4xf32> to vector<1x4xf32>
    %199 = tpu.concatenate %197, %196, %198 in 0 : vector<1x4xf32>, vector<16x4xf32>, vector<1x4xf32> -> vector<18x4xf32>
    %200 = tpu.concatenate %143, %151, %159, %167, %175, %183, %191, %199 in 0 : vector<18x4xf32>, vector<18x4xf32>, vector<18x4xf32>, vector<18x4xf32>, vector<18x4xf32>, vector<18x4xf32>, vector<18x4xf32>, vector<18x4xf32> -> vector<144x4xf32>
    %c18_118 = arith.constant 18 : index
    %c0_119 = arith.constant 0 : index
    %201 = vector.load %arg8[%c18_118, %c0_119] : memref<326x4xf32, #tpu.memory_space<vmem>>, vector<144x4xf32>
    tpu.vector_store %arg8[%c18_118, %c0_119], %200 {strides = array<i32>} : memref<326x4xf32, #tpu.memory_space<vmem>>, vector<144x4xf32>,
    %c144 = arith.constant 144 : index
    %c0_120 = arith.constant 0 : index
    %202 = vector.load %arg7[%c144, %c0_120] : memref<326x4xf32, #tpu.memory_space<vmem>>, vector<144x4xf32>
    %c0_121 = arith.constant 0 : index
    %c0_122 = arith.constant 0 : index
    %c0_123 = arith.constant 0 : index
    %203 = vector.load %arg2[%c0_121, %c0_122, %c0_123] : memref<9x4x4xf32, #tpu.memory_space<vmem>>, vector<1x4x4xf32>
    %204 = vector.shape_cast %203 : vector<1x4x4xf32> to vector<4x4xf32>
    %cst_124 = arith.constant dense<0.000000e+00> : vector<144x4xf32>
    %205 = tpu.matmul %202, %204, %cst_124 {dimension_numbers = #tpu.dot_dimension_numbers<[1], [0], [0], [1], [0, 0, 1, 1], [], []>} : vector<144x4xf32>, vector<4x4xf32>, vector<144x4xf32> -> vector<144x4xf32>
    %c145 = arith.constant 145 : index
    %c0_125 = arith.constant 0 : index
    %206 = vector.load %arg7[%c145, %c0_125] : memref<326x4xf32, #tpu.memory_space<vmem>>, vector<144x4xf32>
    %c1_126 = arith.constant 1 : index
    %c0_127 = arith.constant 0 : index
    %c0_128 = arith.constant 0 : index
    %207 = vector.load %arg2[%c1_126, %c0_127, %c0_128] : memref<9x4x4xf32, #tpu.memory_space<vmem>>, vector<1x4x4xf32>
    %208 = vector.shape_cast %207 : vector<1x4x4xf32> to vector<4x4xf32>
    %cst_129 = arith.constant dense<0.000000e+00> : vector<144x4xf32>
    %209 = tpu.matmul %206, %208, %cst_129 {dimension_numbers = #tpu.dot_dimension_numbers<[1], [0], [0], [1], [0, 0, 1, 1], [], []>} : vector<144x4xf32>, vector<4x4xf32>, vector<144x4xf32> -> vector<144x4xf32>
    %210 = arith.addf %205, %209 : vector<144x4xf32>
    %c146 = arith.constant 146 : index
    %c0_130 = arith.constant 0 : index
    %211 = vector.load %arg7[%c146, %c0_130] : memref<326x4xf32, #tpu.memory_space<vmem>>, vector<144x4xf32>
    %c2_131 = arith.constant 2 : index
    %c0_132 = arith.constant 0 : index
    %c0_133 = arith.constant 0 : index
    %212 = vector.load %arg2[%c2_131, %c0_132, %c0_133] : memref<9x4x4xf32, #tpu.memory_space<vmem>>, vector<1x4x4xf32>
    %213 = vector.shape_cast %212 : vector<1x4x4xf32> to vector<4x4xf32>
    %cst_134 = arith.constant dense<0.000000e+00> : vector<144x4xf32>
    %214 = tpu.matmul %211, %213, %cst_134 {dimension_numbers = #tpu.dot_dimension_numbers<[1], [0], [0], [1], [0, 0, 1, 1], [], []>} : vector<144x4xf32>, vector<4x4xf32>, vector<144x4xf32> -> vector<144x4xf32>
    %215 = arith.addf %210, %214 : vector<144x4xf32>
    %c162_135 = arith.constant 162 : index
    %c0_136 = arith.constant 0 : index
    %216 = vector.load %arg7[%c162_135, %c0_136] : memref<326x4xf32, #tpu.memory_space<vmem>>, vector<144x4xf32>
    %c3_137 = arith.constant 3 : index
    %c0_138 = arith.constant 0 : index
    %c0_139 = arith.constant 0 : index
    %217 = vector.load %arg2[%c3_137, %c0_138, %c0_139] : memref<9x4x4xf32, #tpu.memory_space<vmem>>, vector<1x4x4xf32>
    %218 = vector.shape_cast %217 : vector<1x4x4xf32> to vector<4x4xf32>
    %cst_140 = arith.constant dense<0.000000e+00> : vector<144x4xf32>
    %219 = tpu.matmul %216, %218, %cst_140 {dimension_numbers = #tpu.dot_dimension_numbers<[1], [0], [0], [1], [0, 0, 1, 1], [], []>} : vector<144x4xf32>, vector<4x4xf32>, vector<144x4xf32> -> vector<144x4xf32>
    %220 = arith.addf %215, %219 : vector<144x4xf32>
    %c163 = arith.constant 163 : index
    %c0_141 = arith.constant 0 : index
    %221 = vector.load %arg7[%c163, %c0_141] : memref<326x4xf32, #tpu.memory_space<vmem>>, vector<144x4xf32>
    %c4_142 = arith.constant 4 : index
    %c0_143 = arith.constant 0 : index
    %c0_144 = arith.constant 0 : index
    %222 = vector.load %arg2[%c4_142, %c0_143, %c0_144] : memref<9x4x4xf32, #tpu.memory_space<vmem>>, vector<1x4x4xf32>
    %223 = vector.shape_cast %222 : vector<1x4x4xf32> to vector<4x4xf32>
    %cst_145 = arith.constant dense<0.000000e+00> : vector<144x4xf32>
    %224 = tpu.matmul %221, %223, %cst_145 {dimension_numbers = #tpu.dot_dimension_numbers<[1], [0], [0], [1], [0, 0, 1, 1], [], []>} : vector<144x4xf32>, vector<4x4xf32>, vector<144x4xf32> -> vector<144x4xf32>
    %225 = arith.addf %220, %224 : vector<144x4xf32>
    %c164 = arith.constant 164 : index
    %c0_146 = arith.constant 0 : index
    %226 = vector.load %arg7[%c164, %c0_146] : memref<326x4xf32, #tpu.memory_space<vmem>>, vector<144x4xf32>
    %c5_147 = arith.constant 5 : index
    %c0_148 = arith.constant 0 : index
    %c0_149 = arith.constant 0 : index
    %227 = vector.load %arg2[%c5_147, %c0_148, %c0_149] : memref<9x4x4xf32, #tpu.memory_space<vmem>>, vector<1x4x4xf32>
    %228 = vector.shape_cast %227 : vector<1x4x4xf32> to vector<4x4xf32>
    %cst_150 = arith.constant dense<0.000000e+00> : vector<144x4xf32>
    %229 = tpu.matmul %226, %228, %cst_150 {dimension_numbers = #tpu.dot_dimension_numbers<[1], [0], [0], [1], [0, 0, 1, 1], [], []>} : vector<144x4xf32>, vector<4x4xf32>, vector<144x4xf32> -> vector<144x4xf32>
    %230 = arith.addf %225, %229 : vector<144x4xf32>
    %c180 = arith.constant 180 : index
    %c0_151 = arith.constant 0 : index
    %231 = vector.load %arg7[%c180, %c0_151] : memref<326x4xf32, #tpu.memory_space<vmem>>, vector<144x4xf32>
    %c6_152 = arith.constant 6 : index
    %c0_153 = arith.constant 0 : index
    %c0_154 = arith.constant 0 : index
    %232 = vector.load %arg2[%c6_152, %c0_153, %c0_154] : memref<9x4x4xf32, #tpu.memory_space<vmem>>, vector<1x4x4xf32>
    %233 = vector.shape_cast %232 : vector<1x4x4xf32> to vector<4x4xf32>
    %cst_155 = arith.constant dense<0.000000e+00> : vector<144x4xf32>
    %234 = tpu.matmul %231, %233, %cst_155 {dimension_numbers = #tpu.dot_dimension_numbers<[1], [0], [0], [1], [0, 0, 1, 1], [], []>} : vector<144x4xf32>, vector<4x4xf32>, vector<144x4xf32> -> vector<144x4xf32>
    %235 = arith.addf %230, %234 : vector<144x4xf32>
    %c181 = arith.constant 181 : index
    %c0_156 = arith.constant 0 : index
    %236 = vector.load %arg7[%c181, %c0_156] : memref<326x4xf32, #tpu.memory_space<vmem>>, vector<144x4xf32>
    %c7_157 = arith.constant 7 : index
    %c0_158 = arith.constant 0 : index
    %c0_159 = arith.constant 0 : index
    %237 = vector.load %arg2[%c7_157, %c0_158, %c0_159] : memref<9x4x4xf32, #tpu.memory_space<vmem>>, vector<1x4x4xf32>
    %238 = vector.shape_cast %237 : vector<1x4x4xf32> to vector<4x4xf32>
    %cst_160 = arith.constant dense<0.000000e+00> : vector<144x4xf32>
    %239 = tpu.matmul %236, %238, %cst_160 {dimension_numbers = #tpu.dot_dimension_numbers<[1], [0], [0], [1], [0, 0, 1, 1], [], []>} : vector<144x4xf32>, vector<4x4xf32>, vector<144x4xf32> -> vector<144x4xf32>
    %240 = arith.addf %235, %239 : vector<144x4xf32>
    %c182 = arith.constant 182 : index
    %c0_161 = arith.constant 0 : index
    %241 = vector.load %arg7[%c182, %c0_161] : memref<326x4xf32, #tpu.memory_space<vmem>>, vector<144x4xf32>
    %c8_162 = arith.constant 8 : index
    %c0_163 = arith.constant 0 : index
    %c0_164 = arith.constant 0 : index
    %242 = vector.load %arg2[%c8_162, %c0_163, %c0_164] : memref<9x4x4xf32, #tpu.memory_space<vmem>>, vector<1x4x4xf32>
    %243 = vector.shape_cast %242 : vector<1x4x4xf32> to vector<4x4xf32>
    %cst_165 = arith.constant dense<0.000000e+00> : vector<144x4xf32>
    %244 = tpu.matmul %241, %243, %cst_165 {dimension_numbers = #tpu.dot_dimension_numbers<[1], [0], [0], [1], [0, 0, 1, 1], [], []>} : vector<144x4xf32>, vector<4x4xf32>, vector<144x4xf32> -> vector<144x4xf32>
    %245 = arith.addf %240, %244 : vector<144x4xf32>
    %246 = vector.extract_strided_slice %245 {offsets = [0, 0], sizes = [16, 4], strides = [1, 1]} : vector<144x4xf32> to vector<16x4xf32>
    %247 = vector.broadcast %0 : vector<1x4xf32> to vector<16x4xf32>
    %248 = arith.addf %246, %247 : vector<16x4xf32>
    %cst_166 = arith.constant 0.000000e+00 : f32
    %249 = vector.broadcast %cst_166 : f32 to vector<16x4xf32>
    %250 = arith.maximumf %248, %249 : vector<16x4xf32>
    %251 = vector.extract_strided_slice %250 {offsets = [1, 0], sizes = [1, 4], strides = [1, 1]} : vector<16x4xf32> to vector<1x4xf32>
    %252 = vector.extract_strided_slice %250 {offsets = [14, 0], sizes = [1, 4], strides = [1, 1]} : vector<16x4xf32> to vector<1x4xf32>
    %253 = tpu.concatenate %251, %250, %252 in 0 : vector<1x4xf32>, vector<16x4xf32>, vector<1x4xf32> -> vector<18x4xf32>
    %254 = vector.extract_strided_slice %245 {offsets = [18, 0], sizes = [16, 4], strides = [1, 1]} : vector<144x4xf32> to vector<16x4xf32>
    %255 = vector.broadcast %0 : vector<1x4xf32> to vector<16x4xf32>
    %256 = arith.addf %254, %255 : vector<16x4xf32>
    %cst_167 = arith.constant 0.000000e+00 : f32
    %257 = vector.broadcast %cst_167 : f32 to vector<16x4xf32>
    %258 = arith.maximumf %256, %257 : vector<16x4xf32>
    %259 = vector.extract_strided_slice %258 {offsets = [1, 0], sizes = [1, 4], strides = [1, 1]} : vector<16x4xf32> to vector<1x4xf32>
    %260 = vector.extract_strided_slice %258 {offsets = [14, 0], sizes = [1, 4], strides = [1, 1]} : vector<16x4xf32> to vector<1x4xf32>
    %261 = tpu.concatenate %259, %258, %260 in 0 : vector<1x4xf32>, vector<16x4xf32>, vector<1x4xf32> -> vector<18x4xf32>
    %262 = vector.extract_strided_slice %245 {offsets = [36, 0], sizes = [16, 4], strides = [1, 1]} : vector<144x4xf32> to vector<16x4xf32>
    %263 = vector.broadcast %0 : vector<1x4xf32> to vector<16x4xf32>
    %264 = arith.addf %262, %263 : vector<16x4xf32>
    %cst_168 = arith.constant 0.000000e+00 : f32
    %265 = vector.broadcast %cst_168 : f32 to vector<16x4xf32>
    %266 = arith.maximumf %264, %265 : vector<16x4xf32>
    %267 = vector.extract_strided_slice %266 {offsets = [1, 0], sizes = [1, 4], strides = [1, 1]} : vector<16x4xf32> to vector<1x4xf32>
    %268 = vector.extract_strided_slice %266 {offsets = [14, 0], sizes = [1, 4], strides = [1, 1]} : vector<16x4xf32> to vector<1x4xf32>
    %269 = tpu.concatenate %267, %266, %268 in 0 : vector<1x4xf32>, vector<16x4xf32>, vector<1x4xf32> -> vector<18x4xf32>
    %270 = vector.extract_strided_slice %245 {offsets = [54, 0], sizes = [16, 4], strides = [1, 1]} : vector<144x4xf32> to vector<16x4xf32>
    %271 = vector.broadcast %0 : vector<1x4xf32> to vector<16x4xf32>
    %272 = arith.addf %270, %271 : vector<16x4xf32>
    %cst_169 = arith.constant 0.000000e+00 : f32
    %273 = vector.broadcast %cst_169 : f32 to vector<16x4xf32>
    %274 = arith.maximumf %272, %273 : vector<16x4xf32>
    %275 = vector.extract_strided_slice %274 {offsets = [1, 0], sizes = [1, 4], strides = [1, 1]} : vector<16x4xf32> to vector<1x4xf32>
    %276 = vector.extract_strided_slice %274 {offsets = [14, 0], sizes = [1, 4], strides = [1, 1]} : vector<16x4xf32> to vector<1x4xf32>
    %277 = tpu.concatenate %275, %274, %276 in 0 : vector<1x4xf32>, vector<16x4xf32>, vector<1x4xf32> -> vector<18x4xf32>
    %278 = vector.extract_strided_slice %245 {offsets = [72, 0], sizes = [16, 4], strides = [1, 1]} : vector<144x4xf32> to vector<16x4xf32>
    %279 = vector.broadcast %0 : vector<1x4xf32> to vector<16x4xf32>
    %280 = arith.addf %278, %279 : vector<16x4xf32>
    %cst_170 = arith.constant 0.000000e+00 : f32
    %281 = vector.broadcast %cst_170 : f32 to vector<16x4xf32>
    %282 = arith.maximumf %280, %281 : vector<16x4xf32>
    %283 = vector.extract_strided_slice %282 {offsets = [1, 0], sizes = [1, 4], strides = [1, 1]} : vector<16x4xf32> to vector<1x4xf32>
    %284 = vector.extract_strided_slice %282 {offsets = [14, 0], sizes = [1, 4], strides = [1, 1]} : vector<16x4xf32> to vector<1x4xf32>
    %285 = tpu.concatenate %283, %282, %284 in 0 : vector<1x4xf32>, vector<16x4xf32>, vector<1x4xf32> -> vector<18x4xf32>
    %286 = vector.extract_strided_slice %245 {offsets = [90, 0], sizes = [16, 4], strides = [1, 1]} : vector<144x4xf32> to vector<16x4xf32>
    %287 = vector.broadcast %0 : vector<1x4xf32> to vector<16x4xf32>
    %288 = arith.addf %286, %287 : vector<16x4xf32>
    %cst_171 = arith.constant 0.000000e+00 : f32
    %289 = vector.broadcast %cst_171 : f32 to vector<16x4xf32>
    %290 = arith.maximumf %288, %289 : vector<16x4xf32>
    %291 = vector.extract_strided_slice %290 {offsets = [1, 0], sizes = [1, 4], strides = [1, 1]} : vector<16x4xf32> to vector<1x4xf32>
    %292 = vector.extract_strided_slice %290 {offsets = [14, 0], sizes = [1, 4], strides = [1, 1]} : vector<16x4xf32> to vector<1x4xf32>
    %293 = tpu.concatenate %291, %290, %292 in 0 : vector<1x4xf32>, vector<16x4xf32>, vector<1x4xf32> -> vector<18x4xf32>
    %294 = vector.extract_strided_slice %245 {offsets = [108, 0], sizes = [16, 4], strides = [1, 1]} : vector<144x4xf32> to vector<16x4xf32>
    %295 = vector.broadcast %0 : vector<1x4xf32> to vector<16x4xf32>
    %296 = arith.addf %294, %295 : vector<16x4xf32>
    %cst_172 = arith.constant 0.000000e+00 : f32
    %297 = vector.broadcast %cst_172 : f32 to vector<16x4xf32>
    %298 = arith.maximumf %296, %297 : vector<16x4xf32>
    %299 = vector.extract_strided_slice %298 {offsets = [1, 0], sizes = [1, 4], strides = [1, 1]} : vector<16x4xf32> to vector<1x4xf32>
    %300 = vector.extract_strided_slice %298 {offsets = [14, 0], sizes = [1, 4], strides = [1, 1]} : vector<16x4xf32> to vector<1x4xf32>
    %301 = tpu.concatenate %299, %298, %300 in 0 : vector<1x4xf32>, vector<16x4xf32>, vector<1x4xf32> -> vector<18x4xf32>
    %302 = vector.extract_strided_slice %245 {offsets = [126, 0], sizes = [16, 4], strides = [1, 1]} : vector<144x4xf32> to vector<16x4xf32>
    %303 = vector.broadcast %0 : vector<1x4xf32> to vector<16x4xf32>
    %304 = arith.addf %302, %303 : vector<16x4xf32>
    %cst_173 = arith.constant 0.000000e+00 : f32
    %305 = vector.broadcast %cst_173 : f32 to vector<16x4xf32>
    %306 = arith.maximumf %304, %305 : vector<16x4xf32>
    %307 = vector.extract_strided_slice %306 {offsets = [1, 0], sizes = [1, 4], strides = [1, 1]} : vector<16x4xf32> to vector<1x4xf32>
    %308 = vector.extract_strided_slice %306 {offsets = [14, 0], sizes = [1, 4], strides = [1, 1]} : vector<16x4xf32> to vector<1x4xf32>
    %309 = tpu.concatenate %307, %306, %308 in 0 : vector<1x4xf32>, vector<16x4xf32>, vector<1x4xf32> -> vector<18x4xf32>
    %310 = tpu.concatenate %253, %261, %269, %277, %285, %293, %301, %309 in 0 : vector<18x4xf32>, vector<18x4xf32>, vector<18x4xf32>, vector<18x4xf32>, vector<18x4xf32>, vector<18x4xf32>, vector<18x4xf32>, vector<18x4xf32> -> vector<144x4xf32>
    %c162_174 = arith.constant 162 : index
    %c0_175 = arith.constant 0 : index
    %311 = vector.load %arg8[%c162_174, %c0_175] : memref<326x4xf32, #tpu.memory_space<vmem>>, vector<144x4xf32>
    tpu.vector_store %arg8[%c162_174, %c0_175], %310 {strides = array<i32>} : memref<326x4xf32, #tpu.memory_space<vmem>>, vector<144x4xf32>,
    %cst_176 = arith.constant 0.000000e+00 : f32
    %312 = vector.broadcast %cst_176 : f32 to vector<2x4xf32>
    %c324_177 = arith.constant 324 : index
    %c0_178 = arith.constant 0 : index
    %313 = vector.load %arg8[%c324_177, %c0_178] : memref<326x4xf32, #tpu.memory_space<vmem>>, vector<2x4xf32>
    tpu.vector_store %arg8[%c324_177, %c0_178], %312 {strides = array<i32>} : memref<326x4xf32, #tpu.memory_space<vmem>>, vector<2x4xf32>,
    %c36_179 = arith.constant 36 : index
    %c0_180 = arith.constant 0 : index
    %314 = vector.load %arg8[%c36_179, %c0_180] : memref<326x4xf32, #tpu.memory_space<vmem>>, vector<18x4xf32>
    %c0_181 = arith.constant 0 : index
    %c0_182 = arith.constant 0 : index
    %315 = vector.load %arg8[%c0_181, %c0_182] : memref<326x4xf32, #tpu.memory_space<vmem>>, vector<18x4xf32>
    tpu.vector_store %arg8[%c0_181, %c0_182], %314 {strides = array<i32>} : memref<326x4xf32, #tpu.memory_space<vmem>>, vector<18x4xf32>,
    %c270_183 = arith.constant 270 : index
    %c0_184 = arith.constant 0 : index
    %316 = vector.load %arg8[%c270_183, %c0_184] : memref<326x4xf32, #tpu.memory_space<vmem>>, vector<18x4xf32>
    %c306_185 = arith.constant 306 : index
    %c0_186 = arith.constant 0 : index
    %317 = vector.load %arg8[%c306_185, %c0_186] : memref<326x4xf32, #tpu.memory_space<vmem>>, vector<18x4xf32>
    tpu.vector_store %arg8[%c306_185, %c0_186], %316 {strides = array<i32>} : memref<326x4xf32, #tpu.memory_space<vmem>>, vector<18x4xf32>,
    %c0_187 = arith.constant 0 : index
    %c0_188 = arith.constant 0 : index
    %318 = vector.load %arg8[%c0_187, %c0_188] : memref<326x4xf32, #tpu.memory_space<vmem>>, vector<144x4xf32>
    %c0_189 = arith.constant 0 : index
    %c0_190 = arith.constant 0 : index
    %c0_191 = arith.constant 0 : index
    %319 = vector.load %arg4[%c0_189, %c0_190, %c0_191] : memref<9x4x4xf32, #tpu.memory_space<vmem>>, vector<1x4x4xf32>
    %320 = vector.shape_cast %319 : vector<1x4x4xf32> to vector<4x4xf32>
    %cst_192 = arith.constant dense<0.000000e+00> : vector<144x4xf32>
    %321 = tpu.matmul %318, %320, %cst_192 {dimension_numbers = #tpu.dot_dimension_numbers<[1], [0], [0], [1], [0, 0, 1, 1], [], []>} : vector<144x4xf32>, vector<4x4xf32>, vector<144x4xf32> -> vector<144x4xf32>
    %c1_193 = arith.constant 1 : index
    %c0_194 = arith.constant 0 : index
    %322 = vector.load %arg8[%c1_193, %c0_194] : memref<326x4xf32, #tpu.memory_space<vmem>>, vector<144x4xf32>
    %c1_195 = arith.constant 1 : index
    %c0_196 = arith.constant 0 : index
    %c0_197 = arith.constant 0 : index
    %323 = vector.load %arg4[%c1_195, %c0_196, %c0_197] : memref<9x4x4xf32, #tpu.memory_space<vmem>>, vector<1x4x4xf32>
    %324 = vector.shape_cast %323 : vector<1x4x4xf32> to vector<4x4xf32>
    %cst_198 = arith.constant dense<0.000000e+00> : vector<144x4xf32>
    %325 = tpu.matmul %322, %324, %cst_198 {dimension_numbers = #tpu.dot_dimension_numbers<[1], [0], [0], [1], [0, 0, 1, 1], [], []>} : vector<144x4xf32>, vector<4x4xf32>, vector<144x4xf32> -> vector<144x4xf32>
    %326 = arith.addf %321, %325 : vector<144x4xf32>
    %c2_199 = arith.constant 2 : index
    %c0_200 = arith.constant 0 : index
    %327 = vector.load %arg8[%c2_199, %c0_200] : memref<326x4xf32, #tpu.memory_space<vmem>>, vector<144x4xf32>
    %c2_201 = arith.constant 2 : index
    %c0_202 = arith.constant 0 : index
    %c0_203 = arith.constant 0 : index
    %328 = vector.load %arg4[%c2_201, %c0_202, %c0_203] : memref<9x4x4xf32, #tpu.memory_space<vmem>>, vector<1x4x4xf32>
    %329 = vector.shape_cast %328 : vector<1x4x4xf32> to vector<4x4xf32>
    %cst_204 = arith.constant dense<0.000000e+00> : vector<144x4xf32>
    %330 = tpu.matmul %327, %329, %cst_204 {dimension_numbers = #tpu.dot_dimension_numbers<[1], [0], [0], [1], [0, 0, 1, 1], [], []>} : vector<144x4xf32>, vector<4x4xf32>, vector<144x4xf32> -> vector<144x4xf32>
    %331 = arith.addf %326, %330 : vector<144x4xf32>
    %c18_205 = arith.constant 18 : index
    %c0_206 = arith.constant 0 : index
    %332 = vector.load %arg8[%c18_205, %c0_206] : memref<326x4xf32, #tpu.memory_space<vmem>>, vector<144x4xf32>
    %c3_207 = arith.constant 3 : index
    %c0_208 = arith.constant 0 : index
    %c0_209 = arith.constant 0 : index
    %333 = vector.load %arg4[%c3_207, %c0_208, %c0_209] : memref<9x4x4xf32, #tpu.memory_space<vmem>>, vector<1x4x4xf32>
    %334 = vector.shape_cast %333 : vector<1x4x4xf32> to vector<4x4xf32>
    %cst_210 = arith.constant dense<0.000000e+00> : vector<144x4xf32>
    %335 = tpu.matmul %332, %334, %cst_210 {dimension_numbers = #tpu.dot_dimension_numbers<[1], [0], [0], [1], [0, 0, 1, 1], [], []>} : vector<144x4xf32>, vector<4x4xf32>, vector<144x4xf32> -> vector<144x4xf32>
    %336 = arith.addf %331, %335 : vector<144x4xf32>
    %c19_211 = arith.constant 19 : index
    %c0_212 = arith.constant 0 : index
    %337 = vector.load %arg8[%c19_211, %c0_212] : memref<326x4xf32, #tpu.memory_space<vmem>>, vector<144x4xf32>
    %c4_213 = arith.constant 4 : index
    %c0_214 = arith.constant 0 : index
    %c0_215 = arith.constant 0 : index
    %338 = vector.load %arg4[%c4_213, %c0_214, %c0_215] : memref<9x4x4xf32, #tpu.memory_space<vmem>>, vector<1x4x4xf32>
    %339 = vector.shape_cast %338 : vector<1x4x4xf32> to vector<4x4xf32>
    %cst_216 = arith.constant dense<0.000000e+00> : vector<144x4xf32>
    %340 = tpu.matmul %337, %339, %cst_216 {dimension_numbers = #tpu.dot_dimension_numbers<[1], [0], [0], [1], [0, 0, 1, 1], [], []>} : vector<144x4xf32>, vector<4x4xf32>, vector<144x4xf32> -> vector<144x4xf32>
    %341 = arith.addf %336, %340 : vector<144x4xf32>
    %c20_217 = arith.constant 20 : index
    %c0_218 = arith.constant 0 : index
    %342 = vector.load %arg8[%c20_217, %c0_218] : memref<326x4xf32, #tpu.memory_space<vmem>>, vector<144x4xf32>
    %c5_219 = arith.constant 5 : index
    %c0_220 = arith.constant 0 : index
    %c0_221 = arith.constant 0 : index
    %343 = vector.load %arg4[%c5_219, %c0_220, %c0_221] : memref<9x4x4xf32, #tpu.memory_space<vmem>>, vector<1x4x4xf32>
    %344 = vector.shape_cast %343 : vector<1x4x4xf32> to vector<4x4xf32>
    %cst_222 = arith.constant dense<0.000000e+00> : vector<144x4xf32>
    %345 = tpu.matmul %342, %344, %cst_222 {dimension_numbers = #tpu.dot_dimension_numbers<[1], [0], [0], [1], [0, 0, 1, 1], [], []>} : vector<144x4xf32>, vector<4x4xf32>, vector<144x4xf32> -> vector<144x4xf32>
    %346 = arith.addf %341, %345 : vector<144x4xf32>
    %c36_223 = arith.constant 36 : index
    %c0_224 = arith.constant 0 : index
    %347 = vector.load %arg8[%c36_223, %c0_224] : memref<326x4xf32, #tpu.memory_space<vmem>>, vector<144x4xf32>
    %c6_225 = arith.constant 6 : index
    %c0_226 = arith.constant 0 : index
    %c0_227 = arith.constant 0 : index
    %348 = vector.load %arg4[%c6_225, %c0_226, %c0_227] : memref<9x4x4xf32, #tpu.memory_space<vmem>>, vector<1x4x4xf32>
    %349 = vector.shape_cast %348 : vector<1x4x4xf32> to vector<4x4xf32>
    %cst_228 = arith.constant dense<0.000000e+00> : vector<144x4xf32>
    %350 = tpu.matmul %347, %349, %cst_228 {dimension_numbers = #tpu.dot_dimension_numbers<[1], [0], [0], [1], [0, 0, 1, 1], [], []>} : vector<144x4xf32>, vector<4x4xf32>, vector<144x4xf32> -> vector<144x4xf32>
    %351 = arith.addf %346, %350 : vector<144x4xf32>
    %c37_229 = arith.constant 37 : index
    %c0_230 = arith.constant 0 : index
    %352 = vector.load %arg8[%c37_229, %c0_230] : memref<326x4xf32, #tpu.memory_space<vmem>>, vector<144x4xf32>
    %c7_231 = arith.constant 7 : index
    %c0_232 = arith.constant 0 : index
    %c0_233 = arith.constant 0 : index
    %353 = vector.load %arg4[%c7_231, %c0_232, %c0_233] : memref<9x4x4xf32, #tpu.memory_space<vmem>>, vector<1x4x4xf32>
    %354 = vector.shape_cast %353 : vector<1x4x4xf32> to vector<4x4xf32>
    %cst_234 = arith.constant dense<0.000000e+00> : vector<144x4xf32>
    %355 = tpu.matmul %352, %354, %cst_234 {dimension_numbers = #tpu.dot_dimension_numbers<[1], [0], [0], [1], [0, 0, 1, 1], [], []>} : vector<144x4xf32>, vector<4x4xf32>, vector<144x4xf32> -> vector<144x4xf32>
    %356 = arith.addf %351, %355 : vector<144x4xf32>
    %c38_235 = arith.constant 38 : index
    %c0_236 = arith.constant 0 : index
    %357 = vector.load %arg8[%c38_235, %c0_236] : memref<326x4xf32, #tpu.memory_space<vmem>>, vector<144x4xf32>
    %c8_237 = arith.constant 8 : index
    %c0_238 = arith.constant 0 : index
    %c0_239 = arith.constant 0 : index
    %358 = vector.load %arg4[%c8_237, %c0_238, %c0_239] : memref<9x4x4xf32, #tpu.memory_space<vmem>>, vector<1x4x4xf32>
    %359 = vector.shape_cast %358 : vector<1x4x4xf32> to vector<4x4xf32>
    %cst_240 = arith.constant dense<0.000000e+00> : vector<144x4xf32>
    %360 = tpu.matmul %357, %359, %cst_240 {dimension_numbers = #tpu.dot_dimension_numbers<[1], [0], [0], [1], [0, 0, 1, 1], [], []>} : vector<144x4xf32>, vector<4x4xf32>, vector<144x4xf32> -> vector<144x4xf32>
    %361 = arith.addf %356, %360 : vector<144x4xf32>
    %362 = vector.extract_strided_slice %361 {offsets = [0, 0], sizes = [16, 4], strides = [1, 1]} : vector<144x4xf32> to vector<16x4xf32>
    %363 = vector.broadcast %1 : vector<1x4xf32> to vector<16x4xf32>
    %364 = arith.addf %362, %363 : vector<16x4xf32>
    %c0_241 = arith.constant 0 : index
    %c0_242 = arith.constant 0 : index
    %c0_243 = arith.constant 0 : index
    %c0_244 = arith.constant 0 : index
    %365 = vector.load %arg1[%c0_241, %c0_242, %c0_243, %c0_244] : memref<1x16x16x4xf32, #tpu.memory_space<vmem>>, vector<1x1x16x4xf32>
    %366 = vector.shape_cast %365 : vector<1x1x16x4xf32> to vector<16x4xf32>
    %367 = arith.addf %364, %366 : vector<16x4xf32>
    %cst_245 = arith.constant 0.000000e+00 : f32
    %368 = vector.broadcast %cst_245 : f32 to vector<16x4xf32>
    %369 = arith.maximumf %367, %368 : vector<16x4xf32>
    %c0_246 = arith.constant 0 : index
    %c0_247 = arith.constant 0 : index
    %c0_248 = arith.constant 0 : index
    %c0_249 = arith.constant 0 : index
    %370 = vector.load %arg6[%c0_246, %c0_247, %c0_248, %c0_249] : memref<1x16x16x4xf32, #tpu.memory_space<vmem>>, vector<1x1x16x4xf32>
    %371 = vector.shape_cast %370 : vector<1x1x16x4xf32> to vector<16x4xf32>
    %372 = vector.shape_cast %369 : vector<16x4xf32> to vector<1x1x16x4xf32>
    tpu.vector_store %arg6[%c0_246, %c0_247, %c0_248, %c0_249], %372 {strides = array<i32>} : memref<1x16x16x4xf32, #tpu.memory_space<vmem>>, vector<1x1x16x4xf32>,
    %373 = vector.extract_strided_slice %361 {offsets = [18, 0], sizes = [16, 4], strides = [1, 1]} : vector<144x4xf32> to vector<16x4xf32>
    %374 = vector.broadcast %1 : vector<1x4xf32> to vector<16x4xf32>
    %375 = arith.addf %373, %374 : vector<16x4xf32>
    %c0_250 = arith.constant 0 : index
    %c1_251 = arith.constant 1 : index
    %c0_252 = arith.constant 0 : index
    %c0_253 = arith.constant 0 : index
    %376 = vector.load %arg1[%c0_250, %c1_251, %c0_252, %c0_253] : memref<1x16x16x4xf32, #tpu.memory_space<vmem>>, vector<1x1x16x4xf32>
    %377 = vector.shape_cast %376 : vector<1x1x16x4xf32> to vector<16x4xf32>
    %378 = arith.addf %375, %377 : vector<16x4xf32>
    %cst_254 = arith.constant 0.000000e+00 : f32
    %379 = vector.broadcast %cst_254 : f32 to vector<16x4xf32>
    %380 = arith.maximumf %378, %379 : vector<16x4xf32>
    %c0_255 = arith.constant 0 : index
    %c1_256 = arith.constant 1 : index
    %c0_257 = arith.constant 0 : index
    %c0_258 = arith.constant 0 : index
    %381 = vector.load %arg6[%c0_255, %c1_256, %c0_257, %c0_258] : memref<1x16x16x4xf32, #tpu.memory_space<vmem>>, vector<1x1x16x4xf32>
    %382 = vector.shape_cast %381 : vector<1x1x16x4xf32> to vector<16x4xf32>
    %383 = vector.shape_cast %380 : vector<16x4xf32> to vector<1x1x16x4xf32>
    tpu.vector_store %arg6[%c0_255, %c1_256, %c0_257, %c0_258], %383 {strides = array<i32>} : memref<1x16x16x4xf32, #tpu.memory_space<vmem>>, vector<1x1x16x4xf32>,
    %384 = vector.extract_strided_slice %361 {offsets = [36, 0], sizes = [16, 4], strides = [1, 1]} : vector<144x4xf32> to vector<16x4xf32>
    %385 = vector.broadcast %1 : vector<1x4xf32> to vector<16x4xf32>
    %386 = arith.addf %384, %385 : vector<16x4xf32>
    %c0_259 = arith.constant 0 : index
    %c2_260 = arith.constant 2 : index
    %c0_261 = arith.constant 0 : index
    %c0_262 = arith.constant 0 : index
    %387 = vector.load %arg1[%c0_259, %c2_260, %c0_261, %c0_262] : memref<1x16x16x4xf32, #tpu.memory_space<vmem>>, vector<1x1x16x4xf32>
    %388 = vector.shape_cast %387 : vector<1x1x16x4xf32> to vector<16x4xf32>
    %389 = arith.addf %386, %388 : vector<16x4xf32>
    %cst_263 = arith.constant 0.000000e+00 : f32
    %390 = vector.broadcast %cst_263 : f32 to vector<16x4xf32>
    %391 = arith.maximumf %389, %390 : vector<16x4xf32>
    %c0_264 = arith.constant 0 : index
    %c2_265 = arith.constant 2 : index
    %c0_266 = arith.constant 0 : index
    %c0_267 = arith.constant 0 : index
    %392 = vector.load %arg6[%c0_264, %c2_265, %c0_266, %c0_267] : memref<1x16x16x4xf32, #tpu.memory_space<vmem>>, vector<1x1x16x4xf32>
    %393 = vector.shape_cast %392 : vector<1x1x16x4xf32> to vector<16x4xf32>
    %394 = vector.shape_cast %391 : vector<16x4xf32> to vector<1x1x16x4xf32>
    tpu.vector_store %arg6[%c0_264, %c2_265, %c0_266, %c0_267], %394 {strides = array<i32>} : memref<1x16x16x4xf32, #tpu.memory_space<vmem>>, vector<1x1x16x4xf32>,
    %395 = vector.extract_strided_slice %361 {offsets = [54, 0], sizes = [16, 4], strides = [1, 1]} : vector<144x4xf32> to vector<16x4xf32>
    %396 = vector.broadcast %1 : vector<1x4xf32> to vector<16x4xf32>
    %397 = arith.addf %395, %396 : vector<16x4xf32>
    %c0_268 = arith.constant 0 : index
    %c3_269 = arith.constant 3 : index
    %c0_270 = arith.constant 0 : index
    %c0_271 = arith.constant 0 : index
    %398 = vector.load %arg1[%c0_268, %c3_269, %c0_270, %c0_271] : memref<1x16x16x4xf32, #tpu.memory_space<vmem>>, vector<1x1x16x4xf32>
    %399 = vector.shape_cast %398 : vector<1x1x16x4xf32> to vector<16x4xf32>
    %400 = arith.addf %397, %399 : vector<16x4xf32>
    %cst_272 = arith.constant 0.000000e+00 : f32
    %401 = vector.broadcast %cst_272 : f32 to vector<16x4xf32>
    %402 = arith.maximumf %400, %401 : vector<16x4xf32>
    %c0_273 = arith.constant 0 : index
    %c3_274 = arith.constant 3 : index
    %c0_275 = arith.constant 0 : index
    %c0_276 = arith.constant 0 : index
    %403 = vector.load %arg6[%c0_273, %c3_274, %c0_275, %c0_276] : memref<1x16x16x4xf32, #tpu.memory_space<vmem>>, vector<1x1x16x4xf32>
    %404 = vector.shape_cast %403 : vector<1x1x16x4xf32> to vector<16x4xf32>
    %405 = vector.shape_cast %402 : vector<16x4xf32> to vector<1x1x16x4xf32>
    tpu.vector_store %arg6[%c0_273, %c3_274, %c0_275, %c0_276], %405 {strides = array<i32>} : memref<1x16x16x4xf32, #tpu.memory_space<vmem>>, vector<1x1x16x4xf32>,
    %406 = vector.extract_strided_slice %361 {offsets = [72, 0], sizes = [16, 4], strides = [1, 1]} : vector<144x4xf32> to vector<16x4xf32>
    %407 = vector.broadcast %1 : vector<1x4xf32> to vector<16x4xf32>
    %408 = arith.addf %406, %407 : vector<16x4xf32>
    %c0_277 = arith.constant 0 : index
    %c4_278 = arith.constant 4 : index
    %c0_279 = arith.constant 0 : index
    %c0_280 = arith.constant 0 : index
    %409 = vector.load %arg1[%c0_277, %c4_278, %c0_279, %c0_280] : memref<1x16x16x4xf32, #tpu.memory_space<vmem>>, vector<1x1x16x4xf32>
    %410 = vector.shape_cast %409 : vector<1x1x16x4xf32> to vector<16x4xf32>
    %411 = arith.addf %408, %410 : vector<16x4xf32>
    %cst_281 = arith.constant 0.000000e+00 : f32
    %412 = vector.broadcast %cst_281 : f32 to vector<16x4xf32>
    %413 = arith.maximumf %411, %412 : vector<16x4xf32>
    %c0_282 = arith.constant 0 : index
    %c4_283 = arith.constant 4 : index
    %c0_284 = arith.constant 0 : index
    %c0_285 = arith.constant 0 : index
    %414 = vector.load %arg6[%c0_282, %c4_283, %c0_284, %c0_285] : memref<1x16x16x4xf32, #tpu.memory_space<vmem>>, vector<1x1x16x4xf32>
    %415 = vector.shape_cast %414 : vector<1x1x16x4xf32> to vector<16x4xf32>
    %416 = vector.shape_cast %413 : vector<16x4xf32> to vector<1x1x16x4xf32>
    tpu.vector_store %arg6[%c0_282, %c4_283, %c0_284, %c0_285], %416 {strides = array<i32>} : memref<1x16x16x4xf32, #tpu.memory_space<vmem>>, vector<1x1x16x4xf32>,
    %417 = vector.extract_strided_slice %361 {offsets = [90, 0], sizes = [16, 4], strides = [1, 1]} : vector<144x4xf32> to vector<16x4xf32>
    %418 = vector.broadcast %1 : vector<1x4xf32> to vector<16x4xf32>
    %419 = arith.addf %417, %418 : vector<16x4xf32>
    %c0_286 = arith.constant 0 : index
    %c5_287 = arith.constant 5 : index
    %c0_288 = arith.constant 0 : index
    %c0_289 = arith.constant 0 : index
    %420 = vector.load %arg1[%c0_286, %c5_287, %c0_288, %c0_289] : memref<1x16x16x4xf32, #tpu.memory_space<vmem>>, vector<1x1x16x4xf32>
    %421 = vector.shape_cast %420 : vector<1x1x16x4xf32> to vector<16x4xf32>
    %422 = arith.addf %419, %421 : vector<16x4xf32>
    %cst_290 = arith.constant 0.000000e+00 : f32
    %423 = vector.broadcast %cst_290 : f32 to vector<16x4xf32>
    %424 = arith.maximumf %422, %423 : vector<16x4xf32>
    %c0_291 = arith.constant 0 : index
    %c5_292 = arith.constant 5 : index
    %c0_293 = arith.constant 0 : index
    %c0_294 = arith.constant 0 : index
    %425 = vector.load %arg6[%c0_291, %c5_292, %c0_293, %c0_294] : memref<1x16x16x4xf32, #tpu.memory_space<vmem>>, vector<1x1x16x4xf32>
    %426 = vector.shape_cast %425 : vector<1x1x16x4xf32> to vector<16x4xf32>
    %427 = vector.shape_cast %424 : vector<16x4xf32> to vector<1x1x16x4xf32>
    tpu.vector_store %arg6[%c0_291, %c5_292, %c0_293, %c0_294], %427 {strides = array<i32>} : memref<1x16x16x4xf32, #tpu.memory_space<vmem>>, vector<1x1x16x4xf32>,
    %428 = vector.extract_strided_slice %361 {offsets = [108, 0], sizes = [16, 4], strides = [1, 1]} : vector<144x4xf32> to vector<16x4xf32>
    %429 = vector.broadcast %1 : vector<1x4xf32> to vector<16x4xf32>
    %430 = arith.addf %428, %429 : vector<16x4xf32>
    %c0_295 = arith.constant 0 : index
    %c6_296 = arith.constant 6 : index
    %c0_297 = arith.constant 0 : index
    %c0_298 = arith.constant 0 : index
    %431 = vector.load %arg1[%c0_295, %c6_296, %c0_297, %c0_298] : memref<1x16x16x4xf32, #tpu.memory_space<vmem>>, vector<1x1x16x4xf32>
    %432 = vector.shape_cast %431 : vector<1x1x16x4xf32> to vector<16x4xf32>
    %433 = arith.addf %430, %432 : vector<16x4xf32>
    %cst_299 = arith.constant 0.000000e+00 : f32
    %434 = vector.broadcast %cst_299 : f32 to vector<16x4xf32>
    %435 = arith.maximumf %433, %434 : vector<16x4xf32>
    %c0_300 = arith.constant 0 : index
    %c6_301 = arith.constant 6 : index
    %c0_302 = arith.constant 0 : index
    %c0_303 = arith.constant 0 : index
    %436 = vector.load %arg6[%c0_300, %c6_301, %c0_302, %c0_303] : memref<1x16x16x4xf32, #tpu.memory_space<vmem>>, vector<1x1x16x4xf32>
    %437 = vector.shape_cast %436 : vector<1x1x16x4xf32> to vector<16x4xf32>
    %438 = vector.shape_cast %435 : vector<16x4xf32> to vector<1x1x16x4xf32>
    tpu.vector_store %arg6[%c0_300, %c6_301, %c0_302, %c0_303], %438 {strides = array<i32>} : memref<1x16x16x4xf32, #tpu.memory_space<vmem>>, vector<1x1x16x4xf32>,
    %439 = vector.extract_strided_slice %361 {offsets = [126, 0], sizes = [16, 4], strides = [1, 1]} : vector<144x4xf32> to vector<16x4xf32>
    %440 = vector.broadcast %1 : vector<1x4xf32> to vector<16x4xf32>
    %441 = arith.addf %439, %440 : vector<16x4xf32>
    %c0_304 = arith.constant 0 : index
    %c7_305 = arith.constant 7 : index
    %c0_306 = arith.constant 0 : index
    %c0_307 = arith.constant 0 : index
    %442 = vector.load %arg1[%c0_304, %c7_305, %c0_306, %c0_307] : memref<1x16x16x4xf32, #tpu.memory_space<vmem>>, vector<1x1x16x4xf32>
    %443 = vector.shape_cast %442 : vector<1x1x16x4xf32> to vector<16x4xf32>
    %444 = arith.addf %441, %443 : vector<16x4xf32>
    %cst_308 = arith.constant 0.000000e+00 : f32
    %445 = vector.broadcast %cst_308 : f32 to vector<16x4xf32>
    %446 = arith.maximumf %444, %445 : vector<16x4xf32>
    %c0_309 = arith.constant 0 : index
    %c7_310 = arith.constant 7 : index
    %c0_311 = arith.constant 0 : index
    %c0_312 = arith.constant 0 : index
    %447 = vector.load %arg6[%c0_309, %c7_310, %c0_311, %c0_312] : memref<1x16x16x4xf32, #tpu.memory_space<vmem>>, vector<1x1x16x4xf32>
    %448 = vector.shape_cast %447 : vector<1x1x16x4xf32> to vector<16x4xf32>
    %449 = vector.shape_cast %446 : vector<16x4xf32> to vector<1x1x16x4xf32>
    tpu.vector_store %arg6[%c0_309, %c7_310, %c0_311, %c0_312], %449 {strides = array<i32>} : memref<1x16x16x4xf32, #tpu.memory_space<vmem>>, vector<1x1x16x4xf32>,
    %c144_313 = arith.constant 144 : index
    %c0_314 = arith.constant 0 : index
    %450 = vector.load %arg8[%c144_313, %c0_314] : memref<326x4xf32, #tpu.memory_space<vmem>>, vector<144x4xf32>
    %c0_315 = arith.constant 0 : index
    %c0_316 = arith.constant 0 : index
    %c0_317 = arith.constant 0 : index
    %451 = vector.load %arg4[%c0_315, %c0_316, %c0_317] : memref<9x4x4xf32, #tpu.memory_space<vmem>>, vector<1x4x4xf32>
    %452 = vector.shape_cast %451 : vector<1x4x4xf32> to vector<4x4xf32>
    %cst_318 = arith.constant dense<0.000000e+00> : vector<144x4xf32>
    %453 = tpu.matmul %450, %452, %cst_318 {dimension_numbers = #tpu.dot_dimension_numbers<[1], [0], [0], [1], [0, 0, 1, 1], [], []>} : vector<144x4xf32>, vector<4x4xf32>, vector<144x4xf32> -> vector<144x4xf32>
    %c145_319 = arith.constant 145 : index
    %c0_320 = arith.constant 0 : index
    %454 = vector.load %arg8[%c145_319, %c0_320] : memref<326x4xf32, #tpu.memory_space<vmem>>, vector<144x4xf32>
    %c1_321 = arith.constant 1 : index
    %c0_322 = arith.constant 0 : index
    %c0_323 = arith.constant 0 : index
    %455 = vector.load %arg4[%c1_321, %c0_322, %c0_323] : memref<9x4x4xf32, #tpu.memory_space<vmem>>, vector<1x4x4xf32>
    %456 = vector.shape_cast %455 : vector<1x4x4xf32> to vector<4x4xf32>
    %cst_324 = arith.constant dense<0.000000e+00> : vector<144x4xf32>
    %457 = tpu.matmul %454, %456, %cst_324 {dimension_numbers = #tpu.dot_dimension_numbers<[1], [0], [0], [1], [0, 0, 1, 1], [], []>} : vector<144x4xf32>, vector<4x4xf32>, vector<144x4xf32> -> vector<144x4xf32>
    %458 = arith.addf %453, %457 : vector<144x4xf32>
    %c146_325 = arith.constant 146 : index
    %c0_326 = arith.constant 0 : index
    %459 = vector.load %arg8[%c146_325, %c0_326] : memref<326x4xf32, #tpu.memory_space<vmem>>, vector<144x4xf32>
    %c2_327 = arith.constant 2 : index
    %c0_328 = arith.constant 0 : index
    %c0_329 = arith.constant 0 : index
    %460 = vector.load %arg4[%c2_327, %c0_328, %c0_329] : memref<9x4x4xf32, #tpu.memory_space<vmem>>, vector<1x4x4xf32>
    %461 = vector.shape_cast %460 : vector<1x4x4xf32> to vector<4x4xf32>
    %cst_330 = arith.constant dense<0.000000e+00> : vector<144x4xf32>
    %462 = tpu.matmul %459, %461, %cst_330 {dimension_numbers = #tpu.dot_dimension_numbers<[1], [0], [0], [1], [0, 0, 1, 1], [], []>} : vector<144x4xf32>, vector<4x4xf32>, vector<144x4xf32> -> vector<144x4xf32>
    %463 = arith.addf %458, %462 : vector<144x4xf32>
    %c162_331 = arith.constant 162 : index
    %c0_332 = arith.constant 0 : index
    %464 = vector.load %arg8[%c162_331, %c0_332] : memref<326x4xf32, #tpu.memory_space<vmem>>, vector<144x4xf32>
    %c3_333 = arith.constant 3 : index
    %c0_334 = arith.constant 0 : index
    %c0_335 = arith.constant 0 : index
    %465 = vector.load %arg4[%c3_333, %c0_334, %c0_335] : memref<9x4x4xf32, #tpu.memory_space<vmem>>, vector<1x4x4xf32>
    %466 = vector.shape_cast %465 : vector<1x4x4xf32> to vector<4x4xf32>
    %cst_336 = arith.constant dense<0.000000e+00> : vector<144x4xf32>
    %467 = tpu.matmul %464, %466, %cst_336 {dimension_numbers = #tpu.dot_dimension_numbers<[1], [0], [0], [1], [0, 0, 1, 1], [], []>} : vector<144x4xf32>, vector<4x4xf32>, vector<144x4xf32> -> vector<144x4xf32>
    %468 = arith.addf %463, %467 : vector<144x4xf32>
    %c163_337 = arith.constant 163 : index
    %c0_338 = arith.constant 0 : index
    %469 = vector.load %arg8[%c163_337, %c0_338] : memref<326x4xf32, #tpu.memory_space<vmem>>, vector<144x4xf32>
    %c4_339 = arith.constant 4 : index
    %c0_340 = arith.constant 0 : index
    %c0_341 = arith.constant 0 : index
    %470 = vector.load %arg4[%c4_339, %c0_340, %c0_341] : memref<9x4x4xf32, #tpu.memory_space<vmem>>, vector<1x4x4xf32>
    %471 = vector.shape_cast %470 : vector<1x4x4xf32> to vector<4x4xf32>
    %cst_342 = arith.constant dense<0.000000e+00> : vector<144x4xf32>
    %472 = tpu.matmul %469, %471, %cst_342 {dimension_numbers = #tpu.dot_dimension_numbers<[1], [0], [0], [1], [0, 0, 1, 1], [], []>} : vector<144x4xf32>, vector<4x4xf32>, vector<144x4xf32> -> vector<144x4xf32>
    %473 = arith.addf %468, %472 : vector<144x4xf32>
    %c164_343 = arith.constant 164 : index
    %c0_344 = arith.constant 0 : index
    %474 = vector.load %arg8[%c164_343, %c0_344] : memref<326x4xf32, #tpu.memory_space<vmem>>, vector<144x4xf32>
    %c5_345 = arith.constant 5 : index
    %c0_346 = arith.constant 0 : index
    %c0_347 = arith.constant 0 : index
    %475 = vector.load %arg4[%c5_345, %c0_346, %c0_347] : memref<9x4x4xf32, #tpu.memory_space<vmem>>, vector<1x4x4xf32>
    %476 = vector.shape_cast %475 : vector<1x4x4xf32> to vector<4x4xf32>
    %cst_348 = arith.constant dense<0.000000e+00> : vector<144x4xf32>
    %477 = tpu.matmul %474, %476, %cst_348 {dimension_numbers = #tpu.dot_dimension_numbers<[1], [0], [0], [1], [0, 0, 1, 1], [], []>} : vector<144x4xf32>, vector<4x4xf32>, vector<144x4xf32> -> vector<144x4xf32>
    %478 = arith.addf %473, %477 : vector<144x4xf32>
    %c180_349 = arith.constant 180 : index
    %c0_350 = arith.constant 0 : index
    %479 = vector.load %arg8[%c180_349, %c0_350] : memref<326x4xf32, #tpu.memory_space<vmem>>, vector<144x4xf32>
    %c6_351 = arith.constant 6 : index
    %c0_352 = arith.constant 0 : index
    %c0_353 = arith.constant 0 : index
    %480 = vector.load %arg4[%c6_351, %c0_352, %c0_353] : memref<9x4x4xf32, #tpu.memory_space<vmem>>, vector<1x4x4xf32>
    %481 = vector.shape_cast %480 : vector<1x4x4xf32> to vector<4x4xf32>
    %cst_354 = arith.constant dense<0.000000e+00> : vector<144x4xf32>
    %482 = tpu.matmul %479, %481, %cst_354 {dimension_numbers = #tpu.dot_dimension_numbers<[1], [0], [0], [1], [0, 0, 1, 1], [], []>} : vector<144x4xf32>, vector<4x4xf32>, vector<144x4xf32> -> vector<144x4xf32>
    %483 = arith.addf %478, %482 : vector<144x4xf32>
    %c181_355 = arith.constant 181 : index
    %c0_356 = arith.constant 0 : index
    %484 = vector.load %arg8[%c181_355, %c0_356] : memref<326x4xf32, #tpu.memory_space<vmem>>, vector<144x4xf32>
    %c7_357 = arith.constant 7 : index
    %c0_358 = arith.constant 0 : index
    %c0_359 = arith.constant 0 : index
    %485 = vector.load %arg4[%c7_357, %c0_358, %c0_359] : memref<9x4x4xf32, #tpu.memory_space<vmem>>, vector<1x4x4xf32>
    %486 = vector.shape_cast %485 : vector<1x4x4xf32> to vector<4x4xf32>
    %cst_360 = arith.constant dense<0.000000e+00> : vector<144x4xf32>
    %487 = tpu.matmul %484, %486, %cst_360 {dimension_numbers = #tpu.dot_dimension_numbers<[1], [0], [0], [1], [0, 0, 1, 1], [], []>} : vector<144x4xf32>, vector<4x4xf32>, vector<144x4xf32> -> vector<144x4xf32>
    %488 = arith.addf %483, %487 : vector<144x4xf32>
    %c182_361 = arith.constant 182 : index
    %c0_362 = arith.constant 0 : index
    %489 = vector.load %arg8[%c182_361, %c0_362] : memref<326x4xf32, #tpu.memory_space<vmem>>, vector<144x4xf32>
    %c8_363 = arith.constant 8 : index
    %c0_364 = arith.constant 0 : index
    %c0_365 = arith.constant 0 : index
    %490 = vector.load %arg4[%c8_363, %c0_364, %c0_365] : memref<9x4x4xf32, #tpu.memory_space<vmem>>, vector<1x4x4xf32>
    %491 = vector.shape_cast %490 : vector<1x4x4xf32> to vector<4x4xf32>
    %cst_366 = arith.constant dense<0.000000e+00> : vector<144x4xf32>
    %492 = tpu.matmul %489, %491, %cst_366 {dimension_numbers = #tpu.dot_dimension_numbers<[1], [0], [0], [1], [0, 0, 1, 1], [], []>} : vector<144x4xf32>, vector<4x4xf32>, vector<144x4xf32> -> vector<144x4xf32>
    %493 = arith.addf %488, %492 : vector<144x4xf32>
    %494 = vector.extract_strided_slice %493 {offsets = [0, 0], sizes = [16, 4], strides = [1, 1]} : vector<144x4xf32> to vector<16x4xf32>
    %495 = vector.broadcast %1 : vector<1x4xf32> to vector<16x4xf32>
    %496 = arith.addf %494, %495 : vector<16x4xf32>
    %c0_367 = arith.constant 0 : index
    %c8_368 = arith.constant 8 : index
    %c0_369 = arith.constant 0 : index
    %c0_370 = arith.constant 0 : index
    %497 = vector.load %arg1[%c0_367, %c8_368, %c0_369, %c0_370] : memref<1x16x16x4xf32, #tpu.memory_space<vmem>>, vector<1x1x16x4xf32>
    %498 = vector.shape_cast %497 : vector<1x1x16x4xf32> to vector<16x4xf32>
    %499 = arith.addf %496, %498 : vector<16x4xf32>
    %cst_371 = arith.constant 0.000000e+00 : f32
    %500 = vector.broadcast %cst_371 : f32 to vector<16x4xf32>
    %501 = arith.maximumf %499, %500 : vector<16x4xf32>
    %c0_372 = arith.constant 0 : index
    %c8_373 = arith.constant 8 : index
    %c0_374 = arith.constant 0 : index
    %c0_375 = arith.constant 0 : index
    %502 = vector.load %arg6[%c0_372, %c8_373, %c0_374, %c0_375] : memref<1x16x16x4xf32, #tpu.memory_space<vmem>>, vector<1x1x16x4xf32>
    %503 = vector.shape_cast %502 : vector<1x1x16x4xf32> to vector<16x4xf32>
    %504 = vector.shape_cast %501 : vector<16x4xf32> to vector<1x1x16x4xf32>
    tpu.vector_store %arg6[%c0_372, %c8_373, %c0_374, %c0_375], %504 {strides = array<i32>} : memref<1x16x16x4xf32, #tpu.memory_space<vmem>>, vector<1x1x16x4xf32>,
    %505 = vector.extract_strided_slice %493 {offsets = [18, 0], sizes = [16, 4], strides = [1, 1]} : vector<144x4xf32> to vector<16x4xf32>
    %506 = vector.broadcast %1 : vector<1x4xf32> to vector<16x4xf32>
    %507 = arith.addf %505, %506 : vector<16x4xf32>
    %c0_376 = arith.constant 0 : index
    %c9_377 = arith.constant 9 : index
    %c0_378 = arith.constant 0 : index
    %c0_379 = arith.constant 0 : index
    %508 = vector.load %arg1[%c0_376, %c9_377, %c0_378, %c0_379] : memref<1x16x16x4xf32, #tpu.memory_space<vmem>>, vector<1x1x16x4xf32>
    %509 = vector.shape_cast %508 : vector<1x1x16x4xf32> to vector<16x4xf32>
    %510 = arith.addf %507, %509 : vector<16x4xf32>
    %cst_380 = arith.constant 0.000000e+00 : f32
    %511 = vector.broadcast %cst_380 : f32 to vector<16x4xf32>
    %512 = arith.maximumf %510, %511 : vector<16x4xf32>
    %c0_381 = arith.constant 0 : index
    %c9_382 = arith.constant 9 : index
    %c0_383 = arith.constant 0 : index
    %c0_384 = arith.constant 0 : index
    %513 = vector.load %arg6[%c0_381, %c9_382, %c0_383, %c0_384] : memref<1x16x16x4xf32, #tpu.memory_space<vmem>>, vector<1x1x16x4xf32>
    %514 = vector.shape_cast %513 : vector<1x1x16x4xf32> to vector<16x4xf32>
    %515 = vector.shape_cast %512 : vector<16x4xf32> to vector<1x1x16x4xf32>
    tpu.vector_store %arg6[%c0_381, %c9_382, %c0_383, %c0_384], %515 {strides = array<i32>} : memref<1x16x16x4xf32, #tpu.memory_space<vmem>>, vector<1x1x16x4xf32>,
    %516 = vector.extract_strided_slice %493 {offsets = [36, 0], sizes = [16, 4], strides = [1, 1]} : vector<144x4xf32> to vector<16x4xf32>
    %517 = vector.broadcast %1 : vector<1x4xf32> to vector<16x4xf32>
    %518 = arith.addf %516, %517 : vector<16x4xf32>
    %c0_385 = arith.constant 0 : index
    %c10_386 = arith.constant 10 : index
    %c0_387 = arith.constant 0 : index
    %c0_388 = arith.constant 0 : index
    %519 = vector.load %arg1[%c0_385, %c10_386, %c0_387, %c0_388] : memref<1x16x16x4xf32, #tpu.memory_space<vmem>>, vector<1x1x16x4xf32>
    %520 = vector.shape_cast %519 : vector<1x1x16x4xf32> to vector<16x4xf32>
    %521 = arith.addf %518, %520 : vector<16x4xf32>
    %cst_389 = arith.constant 0.000000e+00 : f32
    %522 = vector.broadcast %cst_389 : f32 to vector<16x4xf32>
    %523 = arith.maximumf %521, %522 : vector<16x4xf32>
    %c0_390 = arith.constant 0 : index
    %c10_391 = arith.constant 10 : index
    %c0_392 = arith.constant 0 : index
    %c0_393 = arith.constant 0 : index
    %524 = vector.load %arg6[%c0_390, %c10_391, %c0_392, %c0_393] : memref<1x16x16x4xf32, #tpu.memory_space<vmem>>, vector<1x1x16x4xf32>
    %525 = vector.shape_cast %524 : vector<1x1x16x4xf32> to vector<16x4xf32>
    %526 = vector.shape_cast %523 : vector<16x4xf32> to vector<1x1x16x4xf32>
    tpu.vector_store %arg6[%c0_390, %c10_391, %c0_392, %c0_393], %526 {strides = array<i32>} : memref<1x16x16x4xf32, #tpu.memory_space<vmem>>, vector<1x1x16x4xf32>,
    %527 = vector.extract_strided_slice %493 {offsets = [54, 0], sizes = [16, 4], strides = [1, 1]} : vector<144x4xf32> to vector<16x4xf32>
    %528 = vector.broadcast %1 : vector<1x4xf32> to vector<16x4xf32>
    %529 = arith.addf %527, %528 : vector<16x4xf32>
    %c0_394 = arith.constant 0 : index
    %c11_395 = arith.constant 11 : index
    %c0_396 = arith.constant 0 : index
    %c0_397 = arith.constant 0 : index
    %530 = vector.load %arg1[%c0_394, %c11_395, %c0_396, %c0_397] : memref<1x16x16x4xf32, #tpu.memory_space<vmem>>, vector<1x1x16x4xf32>
    %531 = vector.shape_cast %530 : vector<1x1x16x4xf32> to vector<16x4xf32>
    %532 = arith.addf %529, %531 : vector<16x4xf32>
    %cst_398 = arith.constant 0.000000e+00 : f32
    %533 = vector.broadcast %cst_398 : f32 to vector<16x4xf32>
    %534 = arith.maximumf %532, %533 : vector<16x4xf32>
    %c0_399 = arith.constant 0 : index
    %c11_400 = arith.constant 11 : index
    %c0_401 = arith.constant 0 : index
    %c0_402 = arith.constant 0 : index
    %535 = vector.load %arg6[%c0_399, %c11_400, %c0_401, %c0_402] : memref<1x16x16x4xf32, #tpu.memory_space<vmem>>, vector<1x1x16x4xf32>
    %536 = vector.shape_cast %535 : vector<1x1x16x4xf32> to vector<16x4xf32>
    %537 = vector.shape_cast %534 : vector<16x4xf32> to vector<1x1x16x4xf32>
    tpu.vector_store %arg6[%c0_399, %c11_400, %c0_401, %c0_402], %537 {strides = array<i32>} : memref<1x16x16x4xf32, #tpu.memory_space<vmem>>, vector<1x1x16x4xf32>,
    %538 = vector.extract_strided_slice %493 {offsets = [72, 0], sizes = [16, 4], strides = [1, 1]} : vector<144x4xf32> to vector<16x4xf32>
    %539 = vector.broadcast %1 : vector<1x4xf32> to vector<16x4xf32>
    %540 = arith.addf %538, %539 : vector<16x4xf32>
    %c0_403 = arith.constant 0 : index
    %c12_404 = arith.constant 12 : index
    %c0_405 = arith.constant 0 : index
    %c0_406 = arith.constant 0 : index
    %541 = vector.load %arg1[%c0_403, %c12_404, %c0_405, %c0_406] : memref<1x16x16x4xf32, #tpu.memory_space<vmem>>, vector<1x1x16x4xf32>
    %542 = vector.shape_cast %541 : vector<1x1x16x4xf32> to vector<16x4xf32>
    %543 = arith.addf %540, %542 : vector<16x4xf32>
    %cst_407 = arith.constant 0.000000e+00 : f32
    %544 = vector.broadcast %cst_407 : f32 to vector<16x4xf32>
    %545 = arith.maximumf %543, %544 : vector<16x4xf32>
    %c0_408 = arith.constant 0 : index
    %c12_409 = arith.constant 12 : index
    %c0_410 = arith.constant 0 : index
    %c0_411 = arith.constant 0 : index
    %546 = vector.load %arg6[%c0_408, %c12_409, %c0_410, %c0_411] : memref<1x16x16x4xf32, #tpu.memory_space<vmem>>, vector<1x1x16x4xf32>
    %547 = vector.shape_cast %546 : vector<1x1x16x4xf32> to vector<16x4xf32>
    %548 = vector.shape_cast %545 : vector<16x4xf32> to vector<1x1x16x4xf32>
    tpu.vector_store %arg6[%c0_408, %c12_409, %c0_410, %c0_411], %548 {strides = array<i32>} : memref<1x16x16x4xf32, #tpu.memory_space<vmem>>, vector<1x1x16x4xf32>,
    %549 = vector.extract_strided_slice %493 {offsets = [90, 0], sizes = [16, 4], strides = [1, 1]} : vector<144x4xf32> to vector<16x4xf32>
    %550 = vector.broadcast %1 : vector<1x4xf32> to vector<16x4xf32>
    %551 = arith.addf %549, %550 : vector<16x4xf32>
    %c0_412 = arith.constant 0 : index
    %c13_413 = arith.constant 13 : index
    %c0_414 = arith.constant 0 : index
    %c0_415 = arith.constant 0 : index
    %552 = vector.load %arg1[%c0_412, %c13_413, %c0_414, %c0_415] : memref<1x16x16x4xf32, #tpu.memory_space<vmem>>, vector<1x1x16x4xf32>
    %553 = vector.shape_cast %552 : vector<1x1x16x4xf32> to vector<16x4xf32>
    %554 = arith.addf %551, %553 : vector<16x4xf32>
    %cst_416 = arith.constant 0.000000e+00 : f32
    %555 = vector.broadcast %cst_416 : f32 to vector<16x4xf32>
    %556 = arith.maximumf %554, %555 : vector<16x4xf32>
    %c0_417 = arith.constant 0 : index
    %c13_418 = arith.constant 13 : index
    %c0_419 = arith.constant 0 : index
    %c0_420 = arith.constant 0 : index
    %557 = vector.load %arg6[%c0_417, %c13_418, %c0_419, %c0_420] : memref<1x16x16x4xf32, #tpu.memory_space<vmem>>, vector<1x1x16x4xf32>
    %558 = vector.shape_cast %557 : vector<1x1x16x4xf32> to vector<16x4xf32>
    %559 = vector.shape_cast %556 : vector<16x4xf32> to vector<1x1x16x4xf32>
    tpu.vector_store %arg6[%c0_417, %c13_418, %c0_419, %c0_420], %559 {strides = array<i32>} : memref<1x16x16x4xf32, #tpu.memory_space<vmem>>, vector<1x1x16x4xf32>,
    %560 = vector.extract_strided_slice %493 {offsets = [108, 0], sizes = [16, 4], strides = [1, 1]} : vector<144x4xf32> to vector<16x4xf32>
    %561 = vector.broadcast %1 : vector<1x4xf32> to vector<16x4xf32>
    %562 = arith.addf %560, %561 : vector<16x4xf32>
    %c0_421 = arith.constant 0 : index
    %c14_422 = arith.constant 14 : index
    %c0_423 = arith.constant 0 : index
    %c0_424 = arith.constant 0 : index
    %563 = vector.load %arg1[%c0_421, %c14_422, %c0_423, %c0_424] : memref<1x16x16x4xf32, #tpu.memory_space<vmem>>, vector<1x1x16x4xf32>
    %564 = vector.shape_cast %563 : vector<1x1x16x4xf32> to vector<16x4xf32>
    %565 = arith.addf %562, %564 : vector<16x4xf32>
    %cst_425 = arith.constant 0.000000e+00 : f32
    %566 = vector.broadcast %cst_425 : f32 to vector<16x4xf32>
    %567 = arith.maximumf %565, %566 : vector<16x4xf32>
    %c0_426 = arith.constant 0 : index
    %c14_427 = arith.constant 14 : index
    %c0_428 = arith.constant 0 : index
    %c0_429 = arith.constant 0 : index
    %568 = vector.load %arg6[%c0_426, %c14_427, %c0_428, %c0_429] : memref<1x16x16x4xf32, #tpu.memory_space<vmem>>, vector<1x1x16x4xf32>
    %569 = vector.shape_cast %568 : vector<1x1x16x4xf32> to vector<16x4xf32>
    %570 = vector.shape_cast %567 : vector<16x4xf32> to vector<1x1x16x4xf32>
    tpu.vector_store %arg6[%c0_426, %c14_427, %c0_428, %c0_429], %570 {strides = array<i32>} : memref<1x16x16x4xf32, #tpu.memory_space<vmem>>, vector<1x1x16x4xf32>,
    %571 = vector.extract_strided_slice %493 {offsets = [126, 0], sizes = [16, 4], strides = [1, 1]} : vector<144x4xf32> to vector<16x4xf32>
    %572 = vector.broadcast %1 : vector<1x4xf32> to vector<16x4xf32>
    %573 = arith.addf %571, %572 : vector<16x4xf32>
    %c0_430 = arith.constant 0 : index
    %c15_431 = arith.constant 15 : index
    %c0_432 = arith.constant 0 : index
    %c0_433 = arith.constant 0 : index
    %574 = vector.load %arg1[%c0_430, %c15_431, %c0_432, %c0_433] : memref<1x16x16x4xf32, #tpu.memory_space<vmem>>, vector<1x1x16x4xf32>
    %575 = vector.shape_cast %574 : vector<1x1x16x4xf32> to vector<16x4xf32>
    %576 = arith.addf %573, %575 : vector<16x4xf32>
    %cst_434 = arith.constant 0.000000e+00 : f32
    %577 = vector.broadcast %cst_434 : f32 to vector<16x4xf32>
    %578 = arith.maximumf %576, %577 : vector<16x4xf32>
    %c0_435 = arith.constant 0 : index
    %c15_436 = arith.constant 15 : index
    %c0_437 = arith.constant 0 : index
    %c0_438 = arith.constant 0 : index
    %579 = vector.load %arg6[%c0_435, %c15_436, %c0_437, %c0_438] : memref<1x16x16x4xf32, #tpu.memory_space<vmem>>, vector<1x1x16x4xf32>
    %580 = vector.shape_cast %579 : vector<1x1x16x4xf32> to vector<16x4xf32>
    %581 = vector.shape_cast %578 : vector<16x4xf32> to vector<1x1x16x4xf32>
    tpu.vector_store %arg6[%c0_435, %c15_436, %c0_437, %c0_438], %581 {strides = array<i32>} : memref<1x16x16x4xf32, #tpu.memory_space<vmem>>, vector<1x1x16x4xf32>,
    return
  }
  func.func @transform_0(%arg0: i32) -> (i32, i32, i32, i32) {
    %c0_i32 = arith.constant 0 : i32
    %c0_i32_0 = arith.constant 0 : i32
    %c0_i32_1 = arith.constant 0 : i32
    %c0_i32_2 = arith.constant 0 : i32
    return %arg0, %c0_i32, %c0_i32_0, %c0_i32_1 : i32, i32, i32, i32
  }
  func.func @transform_1(%arg0: i32) -> (i32, i32, i32) {
    %c0_i32 = arith.constant 0 : i32
    %c0_i32_0 = arith.constant 0 : i32
    %c0_i32_1 = arith.constant 0 : i32
    %c0_i32_2 = arith.constant 0 : i32
    return %c0_i32, %c0_i32_0, %c0_i32_1 : i32, i32, i32
  }
  func.func @transform_2(%arg0: i32) -> (i32, i32) {
    %c0_i32 = arith.constant 0 : i32
    %c0_i32_0 = arith.constant 0 : i32
    %c0_i32_1 = arith.constant 0 : i32
    return %c0_i32, %c0_i32_0 : i32, i32
  }
  func.func @transform_3(%arg0: i32) -> (i32, i32, i32) {
    %c0_i32 = arith.constant 0 : i32
    %c0_i32_0 = arith.constant 0 : i32
    %c0_i32_1 = arith.constant 0 : i32
    %c0_i32_2 = arith.constant 0 : i32
    return %c0_i32, %c0_i32_0, %c0_i32_1 : i32, i32, i32
  }
  func.func @transform_4(%arg0: i32) -> (i32, i32) {
    %c0_i32 = arith.constant 0 : i32
    %c0_i32_0 = arith.constant 0 : i32
    %c0_i32_1 = arith.constant 0 : i32
    return %c0_i32, %c0_i32_0 : i32, i32
  }
  func.func @transform_5(%arg0: i32) -> (i32, i32, i32, i32) {
    %c0_i32 = arith.constant 0 : i32
    %c0_i32_0 = arith.constant 0 : i32
    %c0_i32_1 = arith.constant 0 : i32
    %c0_i32_2 = arith.constant 0 : i32
    return %arg0, %c0_i32, %c0_i32_0, %c0_i32_1 : i32, i32, i32, i32
  }
}

</mosaic_0001>

<bundles_post_ra>
// kernel: residual_block.1
= control target key start
LH: loop header
LB: loop body
LE: loop exit
PB: predicated region body
PF: predicated region fallthrough
CT: control target
= control target key end

     0   :  { %s13573_s18 = smov 0   ;;  %s15404_s0 = inlined_call_operand.vmem [shape: f32[2,16,16,4], index: 0, kind: input, shape index: {}]   ;;  %s15405_s1 = inlined_call_operand.vmem [shape: f32[9,4,4], index: 1, kind: input, shape index: {}]   ;;  %s15406_s2 = inlined_call_operand.vmem [shape: f32[1,4], index: 2, kind: input, shape index: {}]   ;;  %s15407_s3 = inlined_call_operand.vmem [shape: f32[9,4,4], index: 3, kind: input, shape index: {}]   ;;  %s15408_s4 = inlined_call_operand.vmem [shape: f32[1,4], index: 4, kind: input, shape index: {}]   ;;  %s15409_s5 = inlined_call_operand.vmem [shape: f32[2,16,16,4], index: 5, kind: output, shape index: {}]  }
   0x1 LB: > { %s10388_s19 = sadd.s32 4294967295, %s13540_s18   ;;  %p10392_p0 = scmp.ge.s32.totalorder %s13540_s18, 1  ;;  %s13540_s18 = sphi %s13573_s18, %s15_s18  }
   0x2   : > { %p187_p1 = scmp.lt.s32.totalorder %s13540_s18, 3 }
   0x4   : > { %p188_p2 = pnand %p10392_p0, %p187_p1 }
   0x5   : > { %vm370_vm0 = vcmask (!%p188_p2), 1043456   ;;  %v10607_v0 = vld [vmem:[%s15405_s1 + $0x4] sm:$0xf] (!%p188_p2)  ;;  %p215_p3 = scmp.lt.s32.totalorder (!%p188_p2), %s10388_s19, 1  ;;  %v13591_v2 = vld [vmem:[%s15405_s1] sm:$0xf] (!%p188_p2) }
   0x6   : > { %191 = sbr.rel (%p188_p2) target bundleno = 1165 (0x48d), region = 40  ;;  %12166 = vmatprep.subr.msk.mxu1 (!%p188_p2), %vm370_vm0, %v10607_v0  ;;  %v10427_v1 = vld [vmem:[%s15405_s1 + $0x4] sm:$0xf] (!%p188_p2)  ;;  %v13600_v3 = vld [vmem:[%s15405_s1] sm:$0xf] (!%p188_p2)  ;;  %vm233_vm1 = vcmask (!%p188_p2), 1040384  }
   0x7   : > { %12167 = vmatpush3.msk.msra.mxu1 (!%p188_p2), %vm370_vm0, %v10607_v0  ;;  %11905 = vmatprep.subr.msk.mxu0 (!%p188_p2), %vm370_vm0, %v10427_v1  ;;  %vm381_vm2 = vcmask (!%p188_p2), 1045504   ;;  %vm426_vm3 = vcmask (!%p188_p2), 31744   ;;  %vm359_vm4 = vcmask (!%p188_p2), 1041408   ;;  %vm659_vm5 = vcmask (!%p188_p2), 25600  }
   0x8   : > { %11906 = vmatpush3.msk.msra.mxu0 (!%p188_p2), %vm370_vm0, %v10427_v1  ;;  %12195 = vmatprep.subr.msk.mxu1 (!%p188_p2), %vm370_vm0, %v13600_v3  ;;  %vm2921_vm6 = vcmask (!%p188_p2), 1046528   ;;  %vm2941_vm7 = vcmask (!%p188_p2), 1044480   ;;  %vm2961_vm8 = vcmask (!%p188_p2), 1042432   ;;  %vm7842_vm9 = vcmask (!%p188_p2), 31746  }
   0x9   : > { %11934 = vmatprep.subr.msk.mxu0 (!%p188_p2), %vm370_vm0, %v13591_v2  ;;  %vm7865_vm10 = vcmask (!%p188_p2), 31748   ;;  %vm7868_vm11 = vcmask (!%p188_p2), 27648   ;;  %vm7889_vm12 = vcmask (!%p188_p2), 31750   ;;  %vm7892_vm13 = vcmask (!%p188_p2), 29696  }
   0xd   : > { %s15411_s19 = smov (!%p215_p3, %s10388_s19), 1 }
   0xe   : > { %s11219_s28 = sshll.u32 %s15411_s19, 8 }
   0xf   : > { %s13613_s6 = scalar_lea.vmem %s15404_s0, %s11219_s28  ;;  %s15227_s14 = scalar_lea.vmem %s15409_s5, %s11219_s28 }
  0x10   : > { %v13616_v4 = vld [vmem:[%s13613_s6 + $0x60] sm:$0xff]  ;;  %v10408_v5 = vld [vmem:[%s13613_s6 + $0x68] sm:$0xff]  ;;  %v10409_v6 = vld [vmem:[%s13613_s6 + $0x70] sm:$0xff] }
  0x11   : > { %v332_v7 = vrot.slane %v13616_v4, 7  ;;  %v333_v8 = vrot.slane %v10408_v5, 7  ;;  %v337_v9 = vrot.slane %v10408_v5, 5  ;;  %v10410_v10 = vld [vmem:[%s13613_s6 + $0x78] sm:$0xff]  ;;  %v345_v11 = vrot.slane %v10409_v6, 1  ;;  %v10411_v12 = vld [vmem:[%s13613_s6 + $0x80] sm:$0xff] }
  0x12   : > { %v348_v13 = vrot.slane %v10409_v6, 7  ;;  %v349_v14 = vrot.slane %v10410_v10, 7  ;;  %v353_v15 = vrot.slane %v10410_v10, 5  ;;  %v449_v16 = vrot.slane %v10411_v12, 1  ;;  %v10412_v17 = vld [vmem:[%s13613_s6 + $0x88] sm:$0xff]  ;;  %v10397_v31 = vld [vmem:[%s13613_s6 + $0x10] sm:$0xff] }
  0x13   : > { %v13627_v18 = vsel %vm233_vm1, %v332_v7, %v333_v8  ;;  %v340_v19 = vsel %vm233_vm1, %v333_v8, %v337_v9  ;;  %v452_v20 = vrot.slane %v10411_v12, 7  ;;  %v453_v21 = vrot.slane %v10412_v17, 7  ;;  %v13634_v26 = vld [vmem:[%s13613_s6 + $0x8] sm:$0xff]  ;;  %v10398_v32 = vld [vmem:[%s13613_s6 + $0x18] sm:$0xff]  ;;  %v13646_v37 = vld [vmem:[%s13613_s6 + $0x20] sm:$0xff] }
  0x14   : > { %v350_v22 = vsel %vm233_vm1, %v348_v13, %v349_v14  ;;  %v355_v23 = vsel %vm233_vm1, %v345_v11, %v348_v13  ;;  %v403_v24 = vrot.slane %v13627_v18, 4  ;;  %v405_v25 = vrot.slane %v340_v19, 4  ;;  %v10413_v42 = vld [vmem:[%s13613_s6 + $0x90] sm:$0xff]  ;;  %v10414_v51 = vld [vmem:[%s13613_s6 + $0x98] sm:$0xff]  ;;  %v227_v56 = vld [vmem:[%s13613_s6] sm:$0xff] }
  0x15   : > { %v412_v27 = vrot.slane %v355_v23, 2  ;;  %v413_v28 = vrot.slane %v350_v22, 2  ;;  %v356_v29 = vsel %vm233_vm1, %v349_v14, %v353_v15  ;;  %v460_v30 = vsel %vm233_vm1, %v449_v16, %v452_v20  ;;  %v10415_v9 = vld [vmem:[%s13613_s6 + $0xa0] sm:$0xff]  ;;  %v10416_v14 = vld [vmem:[%s13613_s6 + $0xa8] sm:$0xff] }
  0x16   : > { %v406_v33 = vsel %vm370_vm0, %v403_v24, %v405_v25  ;;  %v415_v34 = vrot.slane %v356_v29, 2  ;;  %641 = vst.msk [vmem:[#allocation2 + $0xa2] sm:$0xff] %vm426_vm3, %v460_v30  ;;  %v454_v35 = vsel %vm233_vm1, %v452_v20, %v453_v21  ;;  %v458_v36 = vrot.slane %v10412_v17, 5  ;;  %v13690_v22 = vld [vmem:[%s15405_s1 + $0x8] sm:$0xf]  ;;  %v10418_v30 = vld [vmem:[%s13613_s6 + $0xb8] sm:$0xff] }
  0x17   : > { %v414_v38 = vsel %vm381_vm2, %v412_v27, %v413_v28  ;;  %v425_v39 = vsel %vm381_vm2, %v406_v33, %v412_v27  ;;  %642 = vst.msk [vmem:[#allocation2 + $0xaa] sm:$0xff] %vm426_vm3, %v454_v35  ;;  %v235_v40 = vrot.slane %v13634_v26, 7  ;;  %v240_v41 = vrot.slane %v13634_v26, 5  ;;  %v10400_v35 = vld [vmem:[%s13613_s6 + $0x28] sm:$0xff] }
  0x18   : > { %442 = vst.msk [vmem:[#allocation2 + $0x8a] sm:$0xff] %vm426_vm3, %v425_v39  ;;  %443 = vst.msk [vmem:[#allocation2 + $0x92] sm:$0xff] %vm426_vm3, %v414_v38  ;;  %v416_v43 = vsel %vm381_vm2, %v413_v28, %v415_v34  ;;  %v248_v44 = vrot.slane %v10397_v31, 1  ;;  %v251_v45 = vrot.slane %v10397_v31, 7  ;;  %v252_v46 = vrot.slane %v10398_v32, 7 }
  0x19   : > { %444 = vst.msk [vmem:[#allocation2 + $0x9a] sm:$0xff] %vm426_vm3, %v416_v43  ;;  %v243_v47 = vsel %vm233_vm1, %v235_v40, %v240_v41  ;;  %v256_v48 = vrot.slane %v10398_v32, 5  ;;  %v264_v49 = vrot.slane %v13646_v37, 1  ;;  %v267_v50 = vrot.slane %v13646_v37, 7 }
  0x1a   : > { %v253_v52 = vsel %vm233_vm1, %v251_v45, %v252_v46  ;;  %v258_v53 = vsel %vm233_vm1, %v248_v44, %v251_v45  ;;  %v461_v54 = vsel %vm233_vm1, %v453_v21, %v458_v36  ;;  %v466_v55 = vrot.slane %v10413_v42, 1  ;;  %v10417_v21 = vld [vmem:[%s13613_s6 + $0xb0] sm:$0xff] }
  0x1b   : > { %v259_v57 = vsel %vm233_vm1, %v252_v46, %v256_v48  ;;  %v13670_v58 = vsel %vm233_vm1, %v264_v49, %v267_v50  ;;  %v360_v59 = vrot.slane %v258_v53, 6  ;;  %v361_v60 = vrot.slane %v253_v52, 6 }
  0x1c   : > { %v363_v61 = vrot.slane %v259_v57, 6  ;;  %v371_v62 = vrot.slane %v13670_v58, 4  ;;  %v469_v63 = vrot.slane %v10413_v42, 7  ;;  %v470_v0 = vrot.slane %v10414_v51, 7 }
  0x1d   : > { %v362_v1 = vsel %vm359_vm4, %v360_v59, %v361_v60  ;;  %v420_v5 = vsel %vm359_vm4, %v243_v47, %v360_v59  ;;  %v474_v6 = vrot.slane %v10414_v51, 5  ;;  %v230_v8 = vrot.slane %v227_v56, 1 }
  0x1e   : > { %v364_v10 = vsel %vm359_vm4, %v361_v60, %v363_v61  ;;  %429 = vst.msk [vmem:[#allocation2 + $0x22] sm:$0xff] %vm426_vm3, %v420_v5  ;;  %430 = vst.msk [vmem:[#allocation2 + $0x2a] sm:$0xff] %vm426_vm3, %v362_v1  ;;  %v476_v11 = vsel %vm233_vm1, %v466_v55, %v469_v63  ;;  %v471_v12 = vsel %vm233_vm1, %v469_v63, %v470_v0  ;;  %v234_v13 = vrot.slane %v227_v56, 7  ;;  %v3157_v36 = vld [vmem:[#allocation2 + $0xa9] sm:$0xff]  ;;  %v10419_v55 = vld [vmem:[%s13613_s6 + $0xc0] sm:$0xff] }
  0x1f   : > { %v3154_v15 = vld [vmem:[#allocation2 + $0x91] sm:$0xff]  ;;  %v421_v16 = vsel %vm370_vm0, %v364_v10, %v371_v62  ;;  %v577_v17 = vrot.slane %v476_v11, 6  ;;  %v578_v19 = vrot.slane %v471_v12, 6  ;;  %v477_v20 = vsel %vm233_vm1, %v470_v0, %v474_v6 }
  0x20   : > { %12168 = vmatprep.mubr.msk.f32.mxu1 %vm426_vm3, %v3154_v15  ;;  %v3155_v23 = vld [vmem:[#allocation2 + $0x99] sm:$0xff]  ;;  %v3156_v25 = vld [vmem:[#allocation2 + $0xa1] sm:$0xff]  ;;  %431 = vst.msk [vmem:[#allocation2 + $0x32] sm:$0xff] %vm426_vm3, %v421_v16  ;;  %v242_v26 = vsel %vm233_vm1, %v230_v8, %v234_v13  ;;  %v482_v27 = vrot.slane %v10415_v9, 1  ;;  %v485_v28 = vrot.slane %v10415_v9, 7  ;;  %v580_v29 = vrot.slane %v477_v20, 6 }
  0x21   : > { %12169 = vmatmul.mubr.msk.f32.vlgmr.msra.gmra.mrb[0].mxu1 %vm426_vm3, %v3155_v23  ;;  %v635_v31 = vsel %vm359_vm4, %v461_v54, %v577_v17  ;;  %v579_v32 = vsel %vm359_vm4, %v577_v17, %v578_v19  ;;  %427 = vst.msk [vmem:[#allocation2 + $0x12] sm:$0xff] %vm426_vm3, %v242_v26  ;;  %v236_v33 = vsel %vm233_vm1, %v234_v13, %v235_v40  ;;  %v486_v34 = vrot.slane %v10416_v14, 7  ;;  %v10401_v61 = vld [vmem:[%s13613_s6 + $0x30] sm:$0xff]  ;;  %v10420_v9 = vld [vmem:[%s13613_s6 + $0xc8] sm:$0xff] }
  0x22   : > { %12171 = vmatprep.mubr.msk.f32.mxu1 %vm426_vm3, %v3156_v25  ;;  %643 = vst.msk [vmem:[#allocation2 + $0xb2] sm:$0xff] %vm426_vm3, %v635_v31  ;;  %644 = vst.msk [vmem:[#allocation2 + $0xba] sm:$0xff] %vm426_vm3, %v579_v32  ;;  %v492_v38 = vsel %vm233_vm1, %v482_v27, %v485_v28  ;;  %v581_v39 = vsel %vm359_vm4, %v578_v19, %v580_v29  ;;  %v490_v41 = vrot.slane %v10416_v14, 5  ;;  %v498_v42 = vrot.slane %v10417_v21, 1  ;;  %v10402_v14 = vld [vmem:[%s13613_s6 + $0x38] sm:$0xff]  ;;  %v10421_v15 = vld [vmem:[%s13613_s6 + $0xd0] sm:$0xff] }
  0x23   : > { %428 = vst.msk [vmem:[#allocation2 + $0x1a] sm:$0xff] %vm426_vm3, %v236_v33  ;;  %12196 = vmatpush3.msk.msra.mxu1 %vm370_vm0, %v13600_v3  ;;  %v587_v40 = vrot.slane %v492_v38, 4  ;;  %v487_v43 = vsel %vm233_vm1, %v485_v28, %v486_v34  ;;  %v501_v44 = vrot.slane %v10417_v21, 7  ;;  %v502_v45 = vrot.slane %v10418_v30, 7  ;;  %v10422_v31 = vld [vmem:[%s13613_s6 + $0xd8] sm:$0xff] }
  0x24   : > { %12224 = vmatprep.subr.msk.mxu1 %vm370_vm0, %v13690_v22  ;;  %v588_v46 = vrot.slane %v487_v43, 4  ;;  %v493_v47 = vsel %vm233_vm1, %v486_v34, %v490_v41  ;;  %v506_v48 = vrot.slane %v10418_v30, 5  ;;  %v268_v49 = vrot.slane %v10400_v35, 7  ;;  %v13754_v34 = vld [vmem:[%s13613_s6 + $0x40] sm:$0xff] }
  0x25   : > { %12172 = vmatmul.mubr.msk.f32.gmra.mrb[2].mxu1 %vm426_vm3, %v3157_v36  ;;  %v661_v51 = vld [vmem:[#allocation2 + $0x24] sm:$0xff]  ;;  %v636_v3 = vsel %vm370_vm0, %v581_v39, %v587_v40  ;;  %v508_v52 = vsel %vm233_vm1, %v498_v42, %v501_v44  ;;  %v590_v53 = vrot.slane %v493_v47, 4  ;;  %v503_v54 = vsel %vm233_vm1, %v501_v44, %v502_v45 }
  0x26   : > { %664 = vst.msk [vmem:[#allocation2] sm:$0xff] %vm426_vm3, %v661_v51  ;;  %645 = vst.msk [vmem:[#allocation2 + $0xc2] sm:$0xff] %vm426_vm3, %v636_v3  ;;  %v589_v56 = vsel %vm370_vm0, %v587_v40, %v588_v46  ;;  %v597_v57 = vrot.slane %v508_v52, 2  ;;  %v598_v59 = vrot.slane %v503_v54, 2  ;;  %v509_v60 = vsel %vm233_vm1, %v502_v45, %v506_v48  ;;  %v10404_v47 = vld [vmem:[%s13613_s6 + $0x48] sm:$0xff] }
  0x27   : > { %v662_v63 = vld [vmem:[#allocation2 + $0x2c] sm:$0xff]  ;;  %v663_v0 = vld [vmem:[#allocation2 + $0x34] sm:$0x3]  ;;  %646 = vst.msk [vmem:[#allocation2 + $0xca] sm:$0xff] %vm426_vm3, %v589_v56  ;;  %v591_v1 = vsel %vm370_vm0, %v588_v46, %v590_v53  ;;  %v600_v5 = vrot.slane %v509_v60, 2  ;;  %v269_v6 = vsel %vm233_vm1, %v267_v50, %v268_v49  ;;  %v272_v8 = vrot.slane %v10400_v35, 5 }
  0x28   : > { %665 = vst.msk [vmem:[#allocation2 + $0x8] sm:$0xff] %vm426_vm3, %v662_v63  ;;  %v637_v10 = vsel %vm381_vm2, %v591_v1, %v597_v57  ;;  %v599_v11 = vsel %vm381_vm2, %v597_v57, %v598_v59  ;;  %v372_v12 = vrot.slane %v269_v6, 4  ;;  %v514_v13 = vrot.slane %v10419_v55, 1  ;;  %v10423_v46 = vld [vmem:[%s13613_s6 + $0xe0] sm:$0xff]  ;;  %v13766_v48 = vld [vmem:[%s15405_s1 + $0x8] sm:$0xf] }
  0x29   : > { %666 = vst.msk [vmem:[#allocation2 + $0x10] sm:$0x3] %vm659_vm5, %v663_v0  ;;  %v3158_v16 = vld [vmem:[#allocation2 + $0xb1] sm:$0xff]  ;;  %v3159_v17 = vld [vmem:[#allocation2 + $0xb9] sm:$0xff]  ;;  %v601_v37 = vsel %vm381_vm2, %v598_v59, %v600_v5  ;;  %v517_v50 = vrot.slane %v10419_v55, 7  ;;  %v275_v19 = vsel %vm233_vm1, %v268_v49, %v272_v8  ;;  %v280_v20 = vrot.slane %v10401_v61, 1 }
  0x2a   : > { %647 = vst.msk [vmem:[#allocation2 + $0xd2] sm:$0xff] %vm426_vm3, %v637_v10  ;;  %648 = vst.msk [vmem:[#allocation2 + $0xda] sm:$0xff] %vm426_vm3, %v599_v11  ;;  %12174 = vmatprep.mubr.msk.f32.mxu1 %vm426_vm3, %v3158_v16  ;;  %v373_v21 = vsel %vm370_vm0, %v371_v62, %v372_v12  ;;  %v283_v23 = vrot.slane %v10401_v61, 7  ;;  %v374_v25 = vrot.slane %v275_v19, 4  ;;  %v518_v26 = vrot.slane %v10420_v9, 7  ;;  %v10424_v0 = vld [vmem:[%s13613_s6 + $0xe8] sm:$0xff] }
  0x2b   : > { %649 = vst.msk [vmem:[#allocation2 + $0xe2] sm:$0xff] %vm426_vm3, %v601_v37  ;;  %12175 = vmatmul.mubr.msk.f32.gmra.mrb[4].mxu1 %vm426_vm3, %v3159_v17  ;;  %432 = vst.msk [vmem:[#allocation2 + $0x3a] sm:$0xff] %vm426_vm3, %v373_v21  ;;  %v525_v27 = vsel %vm233_vm1, %v514_v13, %v517_v50  ;;  %v523_v28 = vrot.slane %v10420_v9, 5  ;;  %v284_v29 = vrot.slane %v10402_v14, 7  ;;  %v531_v30 = vrot.slane %v10421_v15, 1  ;;  %v10405_v10 = vld [vmem:[%s13613_s6 + $0x50] sm:$0xff] }
  0x2c   : > { %650 = vst.msk [vmem:[#allocation2 + $0xea] sm:$0xff] %vm426_vm3, %v525_v27  ;;  %v290_v58 = vsel %vm233_vm1, %v280_v20, %v283_v23  ;;  %v375_v62 = vsel %vm370_vm0, %v372_v12, %v374_v25  ;;  %v519_v32 = vsel %vm233_vm1, %v517_v50, %v518_v26  ;;  %v534_v33 = vrot.slane %v10421_v15, 7  ;;  %v695_v11 = vld [vmem:[#allocation2 + $0x19] sm:$0xff]  ;;  %v696_v16 = vld [vmem:[#allocation2 + $0x21] sm:$0xff]  ;;  %v13795_v19 = vld [vmem:[%s13613_s6 + $0xf0] sm:$0xff] }
  0x2d   : > { %v3160_v35 = vld [vmem:[#allocation2 + $0xc1] sm:$0xff]  ;;  %v382_v36 = vrot.slane %v290_v58, 2  ;;  %651 = vst.msk [vmem:[#allocation2 + $0xf2] sm:$0xff] %vm426_vm3, %v519_v32  ;;  %v285_v38 = vsel %vm233_vm1, %v283_v23, %v284_v29  ;;  %v526_v39 = vsel %vm233_vm1, %v518_v26, %v523_v28  ;;  %v288_v41 = vrot.slane %v10402_v14, 5  ;;  %v10406_v27 = vld [vmem:[%s13613_s6 + $0x58] sm:$0xff] }
  0x2e   : > { %12177 = vmatprep.mubr.msk.f32.mxu1 %vm426_vm3, %v3160_v35  ;;  %v3161_v42 = vld [vmem:[#allocation2 + $0xc9] sm:$0xff]  ;;  %v383_v40 = vrot.slane %v285_v38, 2  ;;  %v541_v43 = vsel %vm233_vm1, %v531_v30, %v534_v33  ;;  %v535_v44 = vrot.slane %v10422_v31, 7  ;;  %v539_v45 = vrot.slane %v10422_v31, 5 }
  0x2f   : > { %v692_v49 = vld [vmem:[#allocation2 + $0x1] sm:$0xff]  ;;  %12178 = vmatmul.mubr.msk.f32.gmra.mrb[6].mxu1 %vm426_vm3, %v3161_v42  ;;  %v422_v52 = vsel %vm381_vm2, %v375_v62, %v382_v36  ;;  %v607_v53 = vrot.slane %v541_v43, 6  ;;  %v291_v54 = vsel %vm233_vm1, %v284_v29, %v288_v41  ;;  %v296_v55 = vrot.slane %v13754_v34, 1  ;;  %v697_v62 = vld [vmem:[#allocation2 + $0x29] sm:$0xff] }
  0x30   : > { %v693_v51 = vld [vmem:[#allocation2 + $0x9] sm:$0xff]  ;;  %v694_v3 = vld [vmem:[#allocation2 + $0x11] sm:$0xff]  ;;  %11907 = vmatprep.mubr.msk.f32.mxu0 %vm426_vm3, %v692_v49  ;;  %433 = vst.msk [vmem:[#allocation2 + $0x42] sm:$0xff] %vm426_vm3, %v422_v52  ;;  %v384_v59 = vsel %vm381_vm2, %v382_v36, %v383_v40  ;;  %v385_v60 = vrot.slane %v291_v54, 2  ;;  %v536_v61 = vsel %vm233_vm1, %v534_v33, %v535_v44  ;;  %v299_v63 = vrot.slane %v13754_v34, 7 }
  0x31   : > { %v3162_v56 = vld [vmem:[#allocation2 + $0xd1] sm:$0xff]  ;;  %v3163_v57 = vld [vmem:[#allocation2 + $0xd9] sm:$0xff]  ;;  %11908 = vmatmul.mubr.msk.f32.vlgmr.msra.gmra.mrb[0].mxu0 %vm426_vm3, %v693_v51  ;;  %434 = vst.msk [vmem:[#allocation2 + $0x4a] sm:$0xff] %vm426_vm3, %v384_v59  ;;  %v638_v5 = vsel %vm359_vm4, %v526_v39, %v607_v53  ;;  %v608_v6 = vrot.slane %v536_v61, 6  ;;  %v542_v8 = vsel %vm233_vm1, %v535_v44, %v539_v45  ;;  %v547_v9 = vrot.slane %v10423_v46, 1 }
  0x32   : > { %12180 = vmatprep.mubr.msk.f32.mxu1 %vm426_vm3, %v3162_v56  ;;  %v3164_v1 = vld [vmem:[#allocation2 + $0xe1] sm:$0xff]  ;;  %11935 = vmatpush3.msk.msra.mxu0 %vm370_vm0, %v13591_v2  ;;  %652 = vst.msk [vmem:[#allocation2 + $0xfa] sm:$0xff] %vm426_vm3, %v638_v5  ;;  %v386_v12 = vsel %vm381_vm2, %v383_v40, %v385_v60  ;;  %v307_v13 = vsel %vm233_vm1, %v296_v55, %v299_v63  ;;  %v550_v14 = vrot.slane %v10423_v46, 7  ;;  %v610_v15 = vrot.slane %v542_v8, 6  ;;  %v698_v36 = vld [vmem:[#allocation2 + $0x31] sm:$0xff] }
  0x33   : > { %11910 = vmatprep.mubr.msk.f32.mxu0 %vm426_vm3, %v694_v3  ;;  %12181 = vmatmul.mubr.msk.f32.gmra.mrb[8].mxu1 %vm426_vm3, %v3163_v57  ;;  %435 = vst.msk [vmem:[#allocation2 + $0x52] sm:$0xff] %vm426_vm3, %v386_v12  ;;  %v609_v2 = vsel %vm359_vm4, %v607_v53, %v608_v6  ;;  %436 = vst.msk [vmem:[#allocation2 + $0x5a] sm:$0xff] %vm426_vm3, %v307_v13  ;;  %v300_v17 = vrot.slane %v10404_v47, 7  ;;  %v305_v37 = vrot.slane %v10404_v47, 5  ;;  %v551_v50 = vrot.slane %v10424_v0, 7  ;;  %v3165_v20 = vld [vmem:[#allocation2 + $0xe9] sm:$0xff] }
  0x34   : > { %11963 = vmatprep.subr.msk.mxu0 %vm370_vm0, %v13766_v48  ;;  %12183 = vmatprep.mubr.msk.f32.mxu1 %vm426_vm3, %v3164_v1  ;;  %653 = vst.msk [vmem:[#allocation2 + $0x102] sm:$0xff] %vm426_vm3, %v609_v2  ;;  %v557_v21 = vsel %vm233_vm1, %v547_v9, %v550_v14  ;;  %v611_v23 = vsel %vm359_vm4, %v608_v6, %v610_v15  ;;  %v555_v25 = vrot.slane %v10424_v0, 5  ;;  %v313_v26 = vrot.slane %v10405_v10, 1  ;;  %v3166_v28 = vld [vmem:[#allocation2 + $0xf1] sm:$0xff]  ;;  %v699_v53 = vld [vmem:[#allocation2 + $0x39] sm:$0xff] }
  0x35   : > { %11911 = vmatmul.mubr.msk.f32.gmra.mrb[2].mxu0 %vm426_vm3, %v695_v11  ;;  %v617_v29 = vrot.slane %v557_v21, 4  ;;  %v301_v30 = vsel %vm233_vm1, %v299_v63, %v300_v17  ;;  %v552_v31 = vsel %vm233_vm1, %v550_v14, %v551_v50  ;;  %v308_v58 = vsel %vm233_vm1, %v300_v17, %v305_v37  ;;  %v10426_v46 = vld [vmem:[%s13613_s6 + $0xf8] sm:$0xff] }
  0x36   : > { %11913 = vmatprep.mubr.msk.f32.mxu0 %vm426_vm3, %v696_v16  ;;  %437 = vst.msk [vmem:[#allocation2 + $0x62] sm:$0xff] %vm426_vm3, %v301_v30  ;;  %v618_v32 = vrot.slane %v552_v31, 4  ;;  %v316_v33 = vrot.slane %v10405_v10, 7  ;;  %v558_v34 = vsel %vm233_vm1, %v551_v50, %v555_v25  ;;  %v563_v35 = vrot.slane %v13795_v19, 1  ;;  %v3135_v50 = vld [vmem:[#allocation2 + $0x90] sm:$0xff]  ;;  %v3136_v21 = vld [vmem:[#allocation2 + $0x98] sm:$0xff] }
  0x37   : > { %12184 = vmatmul.mubr.msk.f32.gmra.mrb[10].mxu1 %vm426_vm3, %v3165_v20  ;;  %v639_v38 = vsel %vm370_vm0, %v611_v23, %v617_v29  ;;  %v566_v39 = vrot.slane %v13795_v19, 7  ;;  %v620_v41 = vrot.slane %v558_v34, 4  ;;  %v317_v42 = vrot.slane %v10406_v27, 7  ;;  %v700_v59 = vld [vmem:[#allocation2 + $0x41] sm:$0xff]  ;;  %v3139_v30 = vld [vmem:[#allocation2 + $0xb0] sm:$0xff] }
  0x38   : > { %12186 = vmatprep.mubr.msk.f32.mxu1 %vm426_vm3, %v3166_v28  ;;  %654 = vst.msk [vmem:[#allocation2 + $0x10a] sm:$0xff] %vm426_vm3, %v639_v38  ;;  %v619_v40 = vsel %vm370_vm0, %v617_v29, %v618_v32  ;;  %v323_v43 = vsel %vm233_vm1, %v313_v26, %v316_v33  ;;  %v321_v44 = vrot.slane %v10406_v27, 5  ;;  %v329_v45 = vrot.slane %v13616_v4, 1  ;;  %v701_v10 = vld [vmem:[#allocation2 + $0x49] sm:$0xff]  ;;  %v3137_v25 = vld [vmem:[#allocation2 + $0xa0] sm:$0xff] }
  0x39   : > { %11914 = vmatmul.mubr.msk.f32.gmra.mrb[4].mxu0 %vm426_vm3, %v697_v62  ;;  %v3167_v47 = vld [vmem:[#allocation2 + $0xf9] sm:$0xff]  ;;  %655 = vst.msk [vmem:[#allocation2 + $0x112] sm:$0xff] %vm426_vm3, %v619_v40  ;;  %v392_v49 = vrot.slane %v323_v43, 6  ;;  %v573_v51 = vsel %vm233_vm1, %v563_v35, %v566_v39  ;;  %v621_v3 = vsel %vm370_vm0, %v618_v32, %v620_v41  ;;  %v318_v52 = vsel %vm233_vm1, %v316_v33, %v317_v42  ;;  %v13867_v26 = vld [vmem:[%s15405_s1 + $0xc] sm:$0xf]  ;;  %v675_v35 = vld [vmem:[#allocation2 + $0x10] sm:$0xff] }
  0x3a   : > { %11916 = vmatprep.mubr.msk.f32.mxu0 %vm426_vm3, %v698_v36  ;;  %v627_v54 = vrot.slane %v573_v51, 2  ;;  %v393_v55 = vrot.slane %v318_v52, 6  ;;  %v324_v56 = vsel %vm233_vm1, %v317_v42, %v321_v44  ;;  %v339_v57 = vsel %vm233_vm1, %v329_v45, %v332_v7  ;;  %v702_v14 = vld [vmem:[#allocation2 + $0x51] sm:$0xff]  ;;  %v703_v17 = vld [vmem:[#allocation2 + $0x59] sm:$0xff]  ;;  %v3138_v28 = vld [vmem:[#allocation2 + $0xa8] sm:$0xff] }
  0x3b   : > { %12187 = vmatmul.mubr.msk.f32.gmra.mrb[12].mxu1 %vm426_vm3, %v3167_v47  ;;  %v3168_v60 = vld [vmem:[#allocation2 + $0x101] sm:$0xff]  ;;  %v423_v61 = vsel %vm359_vm4, %v308_v58, %v392_v49  ;;  %v395_v63 = vrot.slane %v324_v56, 6  ;;  %v402_v0 = vrot.slane %v339_v57, 4  ;;  %v567_v1 = vrot.slane %v10426_v46, 7  ;;  %v3140_v58 = vld [vmem:[#allocation2 + $0xb8] sm:$0xff]  ;;  %v3143_v36 = vld [vmem:[#allocation2 + $0xd0] sm:$0xff] }
  0x3c   : > { %12189 = vmatprep.mubr.msk.f32.mxu1 %vm426_vm3, %v3168_v60  ;;  %438 = vst.msk [vmem:[#allocation2 + $0x6a] sm:$0xff] %vm426_vm3, %v423_v61  ;;  %v640_v5 = vsel %vm381_vm2, %v621_v3, %v627_v54  ;;  %v394_v6 = vsel %vm359_vm4, %v392_v49, %v393_v55  ;;  %v571_v4 = vrot.slane %v10426_v46, 5  ;;  %v673_v62 = vld [vmem:[#allocation2] sm:$0xff]  ;;  %v3142_v34 = vld [vmem:[#allocation2 + $0xc8] sm:$0xff]  ;;  %v3144_v41 = vld [vmem:[#allocation2 + $0xd8] sm:$0xff] }
  0x3d   : > { %11917 = vmatmul.mubr.msk.f32.gmra.mrb[6].mxu0 %vm426_vm3, %v699_v53  ;;  %656 = vst.msk [vmem:[#allocation2 + $0x11a] sm:$0xff] %vm426_vm3, %v640_v5  ;;  %439 = vst.msk [vmem:[#allocation2 + $0x72] sm:$0xff] %vm426_vm3, %v394_v6  ;;  %v396_v7 = vsel %vm359_vm4, %v393_v55, %v395_v63  ;;  %v404_v8 = vsel %vm370_vm0, %v402_v0, %v403_v24  ;;  %v568_v9 = vsel %vm233_vm1, %v566_v39, %v567_v1  ;;  %v704_v37 = vld [vmem:[#allocation2 + $0x61] sm:$0xff]  ;;  %v13890_v38 = vld [vmem:[%s15405_s1 + $0xc] sm:$0xf] }
  0x3e   : > { %11919 = vmatprep.mubr.msk.f32.mxu0 %vm426_vm3, %v700_v59  ;;  %v424_v11 = vsel %vm370_vm0, %v396_v7, %v402_v0  ;;  %441 = vst.msk [vmem:[#allocation2 + $0x82] sm:$0xff] %vm426_vm3, %v404_v8  ;;  %v628_v12 = vrot.slane %v568_v9, 2  ;;  %v574_v13 = vsel %vm233_vm1, %v567_v1, %v571_v4  ;;  %v3141_v32 = vld [vmem:[#allocation2 + $0xc0] sm:$0xff]  ;;  %v676_v39 = vld [vmem:[#allocation2 + $0x18] sm:$0xff]  ;;  %v678_v43 = vld [vmem:[#allocation2 + $0x28] sm:$0xff] }
  0x3f   : > { %v3169_v15 = vld [vmem:[#allocation2 + $0x109] sm:$0xff]  ;;  %440 = vst.msk [vmem:[#allocation2 + $0x7a] sm:$0xff] %vm426_vm3, %v424_v11  ;;  %v630_v16 = vrot.slane %v574_v13, 2  ;;  %v677_v42 = vld [vmem:[#allocation2 + $0x20] sm:$0xff]  ;;  %v680_v46 = vld [vmem:[#allocation2 + $0x38] sm:$0xff] }
  0x40   : > { %12190 = vmatmul.mubr.msk.f32.gmra.mrb[14].mxu1 %vm426_vm3, %v3169_v15  ;;  %v3170_v18 = vld [vmem:[#allocation2 + $0x111] sm:$0xff]  ;;  %v629_v24 = vsel %vm381_vm2, %v627_v54, %v628_v12  ;;  %v3145_v40 = vld [vmem:[#allocation2 + $0xe0] sm:$0xff]  ;;  %v682_v3 = vld [vmem:[#allocation2 + $0x48] sm:$0xff] }
  0x41   : > { %11920 = vmatmul.mubr.msk.f32.gmra.mrb[8].mxu0 %vm426_vm3, %v701_v10  ;;  %12192 = vmatprep.mubr.msk.f32.mxu1 %vm426_vm3, %v3170_v18  ;;  %657 = vst.msk [vmem:[#allocation2 + $0x122] sm:$0xff] %vm426_vm3, %v629_v24  ;;  %v631_v2 = vsel %vm381_vm2, %v628_v12, %v630_v16  ;;  %v13879_v33 = vld [vmem:[#allocation2 + $0x10e] sm:$0xff]  ;;  %v3148_v47 = vld [vmem:[#allocation2 + $0xf8] sm:$0xff]  ;;  %v681_v49 = vld [vmem:[#allocation2 + $0x40] sm:$0xff] }
  0x42   : > { %11922 = vmatprep.mubr.msk.f32.mxu0 %vm426_vm3, %v702_v14  ;;  %658 = vst.msk [vmem:[#allocation2 + $0x12a] sm:$0xff] %vm426_vm3, %v631_v2  ;;  %670 = vst.msk [vmem:[#allocation2 + $0x132] sm:$0xff] %vm426_vm3, %v13879_v33  ;;  %v679_v44 = vld [vmem:[#allocation2 + $0x30] sm:$0xff]  ;;  %v3149_v51 = vld [vmem:[#allocation2 + $0x100] sm:$0xff] }
  0x43   : > { %v705_v20 = vld [vmem:[#allocation2 + $0x69] sm:$0xff]  ;;  %v684_v55 = vld [vmem:[#allocation2 + $0x58] sm:$0xff]  ;;  %v685_v57 = vld [vmem:[#allocation2 + $0x60] sm:$0xff] }
  0x44   : > { %v3171_v19 = vld [vmem:[#allocation2 + $0x119] sm:$0xff]  ;;  %v706_v23 = vld [vmem:[#allocation2 + $0x71] sm:$0xff]  ;;  %v3150_v52 = vld [vmem:[#allocation2 + $0x108] sm:$0xff] }
  0x45   : > { %11923 = vmatmul.mubr.msk.f32.gmra.mrb[10].mxu0 %vm426_vm3, %v703_v17  ;;  %12193 = vmatmul.mubr.msk.f32.gmra.mrb[16].mxu1 %vm426_vm3, %v3171_v19  ;;  %v709_v31 = vld [vmem:[#allocation2 + $0x89] sm:$0xff]  ;;  %v3152_v56 = vld [vmem:[#allocation2 + $0x118] sm:$0xff] }
  0x46   : > { %11925 = vmatprep.mubr.msk.f32.mxu0 %vm426_vm3, %v704_v37  ;;  %12197 = vmatprep.mubr.msk.f32.mxu1 %vm426_vm3, %v3135_v50  ;;  %v707_v27 = vld [vmem:[#allocation2 + $0x79] sm:$0xff]  ;;  %v708_v29 = vld [vmem:[#allocation2 + $0x81] sm:$0xff]  ;;  %v3147_v45 = vld [vmem:[#allocation2 + $0xf0] sm:$0xff] }
  0x47   : > { %v683_v53 = vld [vmem:[#allocation2 + $0x50] sm:$0xff]  ;;  %v686_v60 = vld [vmem:[#allocation2 + $0x68] sm:$0xff]  ;;  %v13923_v61 = vld [vmem:[#allocation2 + $0x9a] sm:$0xff] }
  0x48   : > { %v3151_v54 = vld [vmem:[#allocation2 + $0x110] sm:$0xff]  ;;  %v13925_v0 = vld [vmem:[#allocation2 + $0xa2] sm:$0xff]  ;;  %v688_v5 = vld [vmem:[#allocation2 + $0x78] sm:$0xff] }
  0x49   : > { %11926 = vmatmul.mubr.msk.f32.gmra.mrb[12].mxu0 %vm426_vm3, %v705_v20  ;;  %12198 = vmatmul.mubr.msk.f32.vlgmr.msra.gmra.mrb[0].mxu1 %vm426_vm3, %v3136_v21  ;;  %v13916_v59 = vld [vmem:[#allocation2 + $0x92] sm:$0xff]  ;;  %v13938_v6 = vld [vmem:[#allocation2 + $0xaa] sm:$0xff]  ;;  %v689_v4 = vld [vmem:[#allocation2 + $0x80] sm:$0xff] }
  0x4a   : > { %11928 = vmatprep.mubr.msk.f32.mxu0 %vm426_vm3, %v706_v23  ;;  %12200 = vmatprep.mubr.msk.f32.mxu1 %vm426_vm3, %v3137_v25  ;;  %v687_v63 = vld [vmem:[#allocation2 + $0x70] sm:$0xff]  ;;  %v690_v8 = vld [vmem:[#allocation2 + $0x88] sm:$0xff]  ;;  %v13952_v9 = vld [vmem:[#allocation2 + $0xba] sm:$0xff] }
  0x4b   : > { %12225 = vmatpush3.msk.msra.mxu1 %vm370_vm0, %v13690_v22  ;;  %v674_v22 = vld [vmem:[#allocation2 + $0x8] sm:$0xff]  ;;  %v13933_v1 = vld [vmem:[%s15405_s1 + $0x10] sm:$0xf]  ;;  %v13980_v18 = vld [vmem:[#allocation2 + $0x1a] sm:$0xff] }
  0x4c   : > { %12253 = vmatprep.subr.msk.mxu1 %vm370_vm0, %v13867_v26  ;;  %v13940_v7 = vld [vmem:[#allocation2 + $0xb2] sm:$0xff]  ;;  %v1136_v10 = vld [vmem:[#allocation2 + $0x2] sm:$0xff]  ;;  %v1137_v12 = vld [vmem:[#allocation2 + $0xa] sm:$0xff] }
  0x4d   : > { %11929 = vmatmul.mubr.msk.f32.gmra.mrb[14].mxu0 %vm426_vm3, %v707_v27  ;;  %12201 = vmatmul.mubr.msk.f32.gmra.mrb[2].mxu1 %vm426_vm3, %v3138_v28  ;;  %v13954_v11 = vld [vmem:[#allocation2 + $0xc2] sm:$0xff]  ;;  %v13962_v13 = vld [vmem:[#allocation2 + $0xca] sm:$0xff]  ;;  %v13964_v14 = vld [vmem:[#allocation2 + $0x12] sm:$0xff] }
  0x4e   : > { %11931 = vmatprep.mubr.msk.f32.mxu0 %vm426_vm3, %v708_v29  ;;  %12203 = vmatprep.mubr.msk.f32.mxu1 %vm426_vm3, %v3139_v30  ;;  %v13966_v15 = vld [vmem:[#allocation2 + $0xd2] sm:$0xff]  ;;  %v13982_v24 = vld [vmem:[#allocation2 + $0xda] sm:$0xff]  ;;  %v13984_v2 = vld [vmem:[#allocation2 + $0x22] sm:$0xff] }
  0x4f   : > { %v13971_v16 = vld [vmem:[%s15405_s1 + $0x10] sm:$0xf]  ;;  %v13988_v17 = vld [vmem:[#allocation2 + $0xe2] sm:$0xff]  ;;  %v1143_v21 = vld [vmem:[#allocation2 + $0x3a] sm:$0xff] }
  0x50   : > { %v13998_v37 = vld [vmem:[#allocation2 + $0x2a] sm:$0xff]  ;;  %v1142_v19 = vld [vmem:[#allocation2 + $0x32] sm:$0xff]  ;;  %v3610_v23 = vld [vmem:[#allocation2 + $0xfa] sm:$0xff] }
  0x51   : > { %11932 = vmatmul.mubr.msk.f32.gmra.mrb[16].mxu0 %vm426_vm3, %v709_v31  ;;  %12204 = vmatmul.mubr.msk.f32.gmra.mrb[4].mxu1 %vm426_vm3, %v3140_v58  ;;  %v3608_v50 = vld [vmem:[#allocation2 + $0xea] sm:$0xff]  ;;  %v3609_v20 = vld [vmem:[#allocation2 + $0xf2] sm:$0xff]  ;;  %v1144_v25 = vld [vmem:[#allocation2 + $0x42] sm:$0xff] }
  0x52   : > { %11936 = vmatprep.mubr.msk.f32.mxu0 %vm426_vm3, %v673_v62  ;;  %12206 = vmatprep.mubr.msk.f32.mxu1 %vm426_vm3, %v3141_v32  ;;  %v1145_v27 = vld [vmem:[#allocation2 + $0x4a] sm:$0xff]  ;;  %v1146_v29 = vld [vmem:[#allocation2 + $0x52] sm:$0xff]  ;;  %v1147_v31 = vld [vmem:[#allocation2 + $0x5a] sm:$0xff] }
  0x53   : > { %v3612_v28 = vld [vmem:[#allocation2 + $0x10a] sm:$0xff]  ;;  %v3613_v30 = vld [vmem:[#allocation2 + $0x112] sm:$0xff]  ;;  %v3614_v58 = vld [vmem:[#allocation2 + $0x11a] sm:$0xff] }
  0x54   : > { %v1148_v62 = vld [vmem:[#allocation2 + $0x62] sm:$0xff]  ;;  %v1149_v32 = vld [vmem:[#allocation2 + $0x6a] sm:$0xff] }
  0x55   : > { %11937 = vmatmul.mubr.msk.f32.vlgmr.msra.gmra.mrb[0].mxu0 %vm426_vm3, %v674_v22  ;;  %12207 = vmatmul.mubr.msk.f32.gmra.mrb[6].mxu1 %vm426_vm3, %v3142_v34  ;;  %v1150_v22 = vld [vmem:[#allocation2 + $0x72] sm:$0xff] }
  0x56   : > { %11964 = vmatpush3.msk.msra.mxu0 %vm370_vm0, %v13766_v48  ;;  %11939 = vmatprep.mubr.msk.f32.mxu0 %vm426_vm3, %v675_v35  ;;  %v3146_v48 = vld [vmem:[#allocation2 + $0xe8] sm:$0xff]  ;;  %v10706_v34 = vld [vmem:[%s15405_s1 + $0x14] sm:$0xf]  ;;  %v1151_v35 = vld [vmem:[#allocation2 + $0x7a] sm:$0xff] }
  0x57   : > { %12209 = vmatprep.mubr.msk.f32.mxu1 %vm426_vm3, %v3143_v36  ;;  %11992 = vmatprep.subr.msk.mxu0 %vm370_vm0, %v13890_v38  ;;  %v1152_v36 = vld [vmem:[#allocation2 + $0x82] sm:$0xff] }
  0x59   : > { %11940 = vmatmul.mubr.msk.f32.gmra.mrb[2].mxu0 %vm426_vm3, %v676_v39  ;;  %12210 = vmatmul.mubr.msk.f32.gmra.mrb[8].mxu1 %vm426_vm3, %v3144_v41  ;;  %v14038_v39 = vld [vmem:[#allocation2 + $0x116] sm:$0xff]  ;;  %v669_v41 = vld [vmem:[#allocation2 + $0x11e] sm:$0x3] }
  0x5a   : > { %11942 = vmatprep.mubr.msk.f32.mxu0 %vm426_vm3, %v677_v42  ;;  %12212 = vmatprep.mubr.msk.f32.mxu1 %vm426_vm3, %v3145_v40  ;;  %671 = vst.msk [vmem:[#allocation2 + $0x13a] sm:$0xff] %vm426_vm3, %v14038_v39  ;;  %v10526_v42 = vld [vmem:[%s15405_s1 + $0x14] sm:$0xf]  ;;  %v3862_v40 = vld [vmem:[#allocation2 + $0x122] sm:$0xff] }
  0x5b   : > { %672 = vst.msk [vmem:[#allocation2 + $0x142] sm:$0x3] %vm659_vm5, %v669_v41  ;;  %v4355_v41 = vld [vmem:[#allocation2 + $0xfc] sm:$0xff] }
  0x5d   : > { %11943 = vmatmul.mubr.msk.f32.gmra.mrb[4].mxu0 %vm426_vm3, %v678_v43  ;;  %12213 = vmatmul.mubr.msk.f32.gmra.mrb[10].mxu1 %vm426_vm3, %v3146_v48  ;;  %v3863_v43 = vld [vmem:[#allocation2 + $0x12a] sm:$0xff] }
  0x5e   : > { %11945 = vmatprep.mubr.msk.f32.mxu0 %vm426_vm3, %v679_v44  ;;  %12215 = vmatprep.mubr.msk.f32.mxu1 %vm426_vm3, %v3147_v45  ;;  %v4095_v48 = vld [vmem:[#allocation2 + $0xa3] sm:$0xff]  ;;  %v4096_v44 = vld [vmem:[#allocation2 + $0xab] sm:$0xff]  ;;  %v4097_v45 = vld [vmem:[#allocation2 + $0xb3] sm:$0xff] }
  0x61   : > { %11946 = vmatmul.mubr.msk.f32.gmra.mrb[6].mxu0 %vm426_vm3, %v680_v46  ;;  %12216 = vmatmul.mubr.msk.f32.gmra.mrb[12].mxu1 %vm426_vm3, %v3148_v47  ;;  %v14090_v46 = vld [vmem:[%s15405_s1 + $0x18] sm:$0xf] }
  0x62   : > { %11948 = vmatprep.mubr.msk.f32.mxu0 %vm426_vm3, %v681_v49  ;;  %12218 = vmatprep.mubr.msk.f32.mxu1 %vm426_vm3, %v3149_v51  ;;  %v4098_v47 = vld [vmem:[#allocation2 + $0xbb] sm:$0xff]  ;;  %v4099_v49 = vld [vmem:[#allocation2 + $0xc3] sm:$0xff]  ;;  %v4100_v51 = vld [vmem:[#allocation2 + $0xcb] sm:$0xff] }
  0x65   : > { %11949 = vmatmul.mubr.msk.f32.gmra.mrb[8].mxu0 %vm426_vm3, %v682_v3  ;;  %12219 = vmatmul.mubr.msk.f32.gmra.mrb[14].mxu1 %vm426_vm3, %v3150_v52  ;;  %v1636_v3 = vld [vmem:[#allocation2 + $0x13] sm:$0xff] }
  0x66   : > { %11951 = vmatprep.mubr.msk.f32.mxu0 %vm426_vm3, %v683_v53  ;;  %12221 = vmatprep.mubr.msk.f32.mxu1 %vm426_vm3, %v3151_v54  ;;  %v4101_v52 = vld [vmem:[#allocation2 + $0xd3] sm:$0xff]  ;;  %v13542_v53 = vmov 0.0   ;;  %v1637_v54 = vld [vmem:[#allocation2 + $0x1b] sm:$0xff] }
  0x67   : > { %660 = vst.msk [vmem:[#allocation2 + $0x144] sm:$0x3] %vm659_vm5, %v13542_v53  ;;  %5580 = vst.msk [vmem:[#allocation3 + $0x144] sm:$0x3] %vm659_vm5, %v13542_v53  ;;  %v1898_v53 = vld [vmem:[#allocation2 + $0x74] sm:$0xff] }
  0x69   : > { %11952 = vmatmul.mubr.msk.f32.gmra.mrb[10].mxu0 %vm426_vm3, %v684_v55  ;;  %12222 = vmatmul.mubr.msk.f32.gmra.mrb[16].mxu1 %vm426_vm3, %v3152_v56  ;;  %v4102_v55 = vld [vmem:[#allocation2 + $0xdb] sm:$0xff]  ;;  %v1638_v56 = vld [vmem:[#allocation2 + $0x23] sm:$0xff] }
  0x6a   : > { %11954 = vmatprep.mubr.msk.f32.mxu0 %vm426_vm3, %v685_v57  ;;  %12226 = vmatprep.mubr.msk.f32.mxu1 %vm426_vm3, %v13916_v59  ;;  %v4103_v57 = vld [vmem:[#allocation2 + $0xe3] sm:$0xff] }
  0x6d   : > { %11955 = vmatmul.mubr.msk.f32.gmra.mrb[12].mxu0 %vm426_vm3, %v686_v60  ;;  %12227 = vmatmul.mubr.msk.f32.vlgmr.msra.gmra.mrb[0].mxu1 %vm426_vm3, %v13923_v61  ;;  %v1639_v60 = vld [vmem:[#allocation2 + $0x2b] sm:$0xff] }
  0x6e   : > { %11957 = vmatprep.mubr.msk.f32.mxu0 %vm426_vm3, %v687_v63  ;;  %12229 = vmatprep.mubr.msk.f32.mxu1 %vm426_vm3, %v13925_v0  ;;  %v1640_v63 = vld [vmem:[#allocation2 + $0x33] sm:$0xff] }
  0x6f   : > { %12254 = vmatpush3.msk.msra.mxu1 %vm370_vm0, %v13867_v26  ;;  %v3611_v26 = vld [vmem:[#allocation2 + $0x102] sm:$0xff] }
  0x70   : > { %12282 = vmatprep.subr.msk.mxu1 %vm370_vm0, %v13933_v1 }
  0x71   : > { %11958 = vmatmul.mubr.msk.f32.gmra.mrb[14].mxu0 %vm426_vm3, %v688_v5  ;;  %12230 = vmatmul.mubr.msk.f32.gmra.mrb[2].mxu1 %vm426_vm3, %v13938_v6  ;;  %v4106_v5 = vld [vmem:[#allocation2 + $0xfb] sm:$0xff] }
  0x72   : > { %11960 = vmatprep.mubr.msk.f32.mxu0 %vm426_vm3, %v689_v4  ;;  %12232 = vmatprep.mubr.msk.f32.mxu1 %vm426_vm3, %v13940_v7  ;;  %v4107_v4 = vld [vmem:[#allocation2 + $0x103] sm:$0xff] }
  0x75   : > { %11961 = vmatmul.mubr.msk.f32.gmra.mrb[16].mxu0 %vm426_vm3, %v690_v8  ;;  %12233 = vmatmul.mubr.msk.f32.gmra.mrb[4].mxu1 %vm426_vm3, %v13952_v9  ;;  %v4108_v8 = vld [vmem:[#allocation2 + $0x10b] sm:$0xff] }
  0x76   : > { %11965 = vmatprep.mubr.msk.f32.mxu0 %vm426_vm3, %v1136_v10  ;;  %12235 = vmatprep.mubr.msk.f32.mxu1 %vm426_vm3, %v13954_v11  ;;  %v4109_v10 = vld [vmem:[#allocation2 + $0x113] sm:$0xff] }
  0x79   : > { %11966 = vmatmul.mubr.msk.f32.vlgmr.msra.gmra.mrb[0].mxu0 %vm426_vm3, %v1137_v12  ;;  %12236 = vmatmul.mubr.msk.f32.gmra.mrb[6].mxu1 %vm426_vm3, %v13962_v13  ;;  %v4110_v12 = vld [vmem:[#allocation2 + $0x11b] sm:$0xff] }
  0x7a   : > { %11993 = vmatpush3.msk.msra.mxu0 %vm370_vm0, %v13890_v38  ;;  %11968 = vmatprep.mubr.msk.f32.mxu0 %vm426_vm3, %v13964_v14  ;;  %v1153_v38 = vld [vmem:[#allocation2 + $0x8a] sm:$0xff] }
  0x7b   : > { %12238 = vmatprep.mubr.msk.f32.mxu1 %vm426_vm3, %v13966_v15  ;;  %12021 = vmatprep.subr.msk.mxu0 %vm370_vm0, %v13971_v16 }
  0x7d   : > { %11969 = vmatmul.mubr.msk.f32.gmra.mrb[2].mxu0 %vm426_vm3, %v13980_v18  ;;  %12239 = vmatmul.mubr.msk.f32.gmra.mrb[8].mxu1 %vm426_vm3, %v13982_v24 }
  0x7e   : > { %11971 = vmatprep.mubr.msk.f32.mxu0 %vm426_vm3, %v13984_v2  ;;  %12241 = vmatprep.mubr.msk.f32.mxu1 %vm426_vm3, %v13988_v17 }
  0x81   : > { %11972 = vmatmul.mubr.msk.f32.gmra.mrb[4].mxu0 %vm426_vm3, %v13998_v37  ;;  %12242 = vmatmul.mubr.msk.f32.gmra.mrb[10].mxu1 %vm426_vm3, %v3608_v50 }
  0x82   : > { %11974 = vmatprep.mubr.msk.f32.mxu0 %vm426_vm3, %v1142_v19  ;;  %12244 = vmatprep.mubr.msk.f32.mxu1 %vm426_vm3, %v3609_v20 }
  0x85   : > { %11975 = vmatmul.mubr.msk.f32.gmra.mrb[6].mxu0 %vm426_vm3, %v1143_v21  ;;  %12245 = vmatmul.mubr.msk.f32.gmra.mrb[12].mxu1 %vm426_vm3, %v3610_v23 }
  0x86   : > { %11977 = vmatprep.mubr.msk.f32.mxu0 %vm426_vm3, %v1144_v25  ;;  %12247 = vmatprep.mubr.msk.f32.mxu1 %vm426_vm3, %v3611_v26 }
  0x89   : > { %11978 = vmatmul.mubr.msk.f32.gmra.mrb[8].mxu0 %vm426_vm3, %v1145_v27  ;;  %12248 = vmatmul.mubr.msk.f32.gmra.mrb[14].mxu1 %vm426_vm3, %v3612_v28 }
  0x8a   : > { %11980 = vmatprep.mubr.msk.f32.mxu0 %vm426_vm3, %v1146_v29  ;;  %12250 = vmatprep.mubr.msk.f32.mxu1 %vm426_vm3, %v3613_v30 }
  0x8d   : > { %11981 = vmatmul.mubr.msk.f32.gmra.mrb[10].mxu0 %vm426_vm3, %v1147_v31  ;;  %12251 = vmatmul.mubr.msk.f32.gmra.mrb[16].mxu1 %vm426_vm3, %v3614_v58 }
  0x8e   : > { %11983 = vmatprep.mubr.msk.f32.mxu0 %vm426_vm3, %v1148_v62  ;;  %12255 = vmatprep.mubr.msk.f32.mxu1 %vm426_vm3, %v13925_v0  ;;  %v4105_v0 = vld [vmem:[#allocation2 + $0xf3] sm:$0xff] }
  0x91   : > { %11984 = vmatmul.mubr.msk.f32.gmra.mrb[12].mxu0 %vm426_vm3, %v1149_v32  ;;  %12256 = vmatmul.mubr.msk.f32.vlgmr.msra.gmra.mrb[0].mxu1 %vm426_vm3, %v13938_v6  ;;  %v1642_v6 = vld [vmem:[#allocation2 + $0x43] sm:$0xff] }
  0x92   : > { %11986 = vmatprep.mubr.msk.f32.mxu0 %vm426_vm3, %v1150_v22  ;;  %12258 = vmatprep.mubr.msk.f32.mxu1 %vm426_vm3, %v13940_v7  ;;  %v1643_v7 = vld [vmem:[#allocation2 + $0x4b] sm:$0xff] }
  0x93   : > { %12283 = vmatpush3.msk.msra.mxu1 %vm370_vm0, %v13933_v1  ;;  %v1641_v1 = vld [vmem:[#allocation2 + $0x3b] sm:$0xff] }
  0x94   : > { %12311 = vmatprep.subr.msk.mxu1 %vm370_vm0, %v10706_v34 }
  0x95   : > { %11987 = vmatmul.mubr.msk.f32.gmra.mrb[14].mxu0 %vm426_vm3, %v1151_v35  ;;  %12259 = vmatmul.mubr.msk.f32.gmra.mrb[2].mxu1 %vm426_vm3, %v13952_v9  ;;  %v1644_v9 = vld [vmem:[#allocation2 + $0x53] sm:$0xff] }
  0x96   : > { %11989 = vmatprep.mubr.msk.f32.mxu0 %vm426_vm3, %v1152_v36  ;;  %12261 = vmatprep.mubr.msk.f32.mxu1 %vm426_vm3, %v13954_v11  ;;  %v1645_v11 = vld [vmem:[#allocation2 + $0x5b] sm:$0xff] }
  0x99   : > { %11990 = vmatmul.mubr.msk.f32.gmra.mrb[16].mxu0 %vm426_vm3, %v1153_v38  ;;  %12262 = vmatmul.mubr.msk.f32.gmra.mrb[4].mxu1 %vm426_vm3, %v13962_v13  ;;  %v1646_v13 = vld [vmem:[#allocation2 + $0x63] sm:$0xff] }
  0x9a   : > { %11994 = vmatprep.mubr.msk.f32.mxu0 %vm426_vm3, %v13964_v14  ;;  %12264 = vmatprep.mubr.msk.f32.mxu1 %vm426_vm3, %v13966_v15  ;;  %v4111_v14 = vld [vmem:[#allocation2 + $0x123] sm:$0xff]  ;;  %v1647_v15 = vld [vmem:[#allocation2 + $0x6b] sm:$0xff] }
  0x9d   : > { %11995 = vmatmul.mubr.msk.f32.vlgmr.msra.gmra.mrb[0].mxu0 %vm426_vm3, %v13980_v18  ;;  %12265 = vmatmul.mubr.msk.f32.gmra.mrb[6].mxu1 %vm426_vm3, %v13982_v24  ;;  %v1648_v18 = vld [vmem:[#allocation2 + $0x73] sm:$0xff]  ;;  %v14137_v24 = vld [vmem:[#allocation2 + $0xa4] sm:$0xff] }
  0x9e   : > { %12022 = vmatpush3.msk.msra.mxu0 %vm370_vm0, %v13971_v16  ;;  %11997 = vmatprep.mubr.msk.f32.mxu0 %vm426_vm3, %v13984_v2  ;;  %v4112_v16 = vld [vmem:[#allocation2 + $0x12b] sm:$0xff]  ;;  %v1649_v2 = vld [vmem:[#allocation2 + $0x7b] sm:$0xff] }
  0x9f   : > { %12267 = vmatprep.mubr.msk.f32.mxu1 %vm426_vm3, %v13988_v17  ;;  %12050 = vmatprep.subr.msk.mxu0 %vm370_vm0, %v10526_v42  ;;  %v14144_v17 = vld [vmem:[#allocation2 + $0xac] sm:$0xff] }
  0xa1   : > { %11998 = vmatmul.mubr.msk.f32.gmra.mrb[2].mxu0 %vm426_vm3, %v13998_v37  ;;  %12268 = vmatmul.mubr.msk.f32.gmra.mrb[8].mxu1 %vm426_vm3, %v3608_v50  ;;  %v1650_v37 = vld [vmem:[#allocation2 + $0x83] sm:$0xff]  ;;  %v14146_v50 = vld [vmem:[#allocation2 + $0xb4] sm:$0xff] }
  0xa2   : > { %12000 = vmatprep.mubr.msk.f32.mxu0 %vm426_vm3, %v1142_v19  ;;  %12270 = vmatprep.mubr.msk.f32.mxu1 %vm426_vm3, %v3609_v20  ;;  %v14154_v19 = vld [vmem:[%s15405_s1 + $0x1c] sm:$0xf]  ;;  %v1651_v20 = vld [vmem:[#allocation2 + $0x8b] sm:$0xff] }
  0xa5   : > { %12001 = vmatmul.mubr.msk.f32.gmra.mrb[4].mxu0 %vm426_vm3, %v1143_v21  ;;  %12271 = vmatmul.mubr.msk.f32.gmra.mrb[10].mxu1 %vm426_vm3, %v3610_v23  ;;  %v14159_v21 = vld [vmem:[#allocation2 + $0xbc] sm:$0xff]  ;;  %v1652_v23 = vld [vmem:[#allocation2 + $0x93] sm:$0xff] }
  0xa6   : > { %12003 = vmatprep.mubr.msk.f32.mxu0 %vm426_vm3, %v1144_v25  ;;  %12273 = vmatprep.mubr.msk.f32.mxu1 %vm426_vm3, %v3611_v26  ;;  %v14161_v25 = vld [vmem:[#allocation2 + $0xc4] sm:$0xff]  ;;  %v1653_v26 = vld [vmem:[#allocation2 + $0x9b] sm:$0xff] }
  0xa9   : > { %12004 = vmatmul.mubr.msk.f32.gmra.mrb[6].mxu0 %vm426_vm3, %v1145_v27  ;;  %12274 = vmatmul.mubr.msk.f32.gmra.mrb[12].mxu1 %vm426_vm3, %v3612_v28  ;;  %v14173_v27 = vld [vmem:[#allocation2 + $0xcc] sm:$0xff]  ;;  %v1886_v28 = vld [vmem:[#allocation2 + $0x14] sm:$0xff] }
  0xaa   : > { %12006 = vmatprep.mubr.msk.f32.mxu0 %vm426_vm3, %v1146_v29  ;;  %12276 = vmatprep.mubr.msk.f32.mxu1 %vm426_vm3, %v3613_v30  ;;  %v14175_v29 = vld [vmem:[#allocation2 + $0xd4] sm:$0xff]  ;;  %v1887_v30 = vld [vmem:[#allocation2 + $0x1c] sm:$0xff] }
  0xad   : > { %12007 = vmatmul.mubr.msk.f32.gmra.mrb[8].mxu0 %vm426_vm3, %v1147_v31  ;;  %12277 = vmatmul.mubr.msk.f32.gmra.mrb[14].mxu1 %vm426_vm3, %v3614_v58  ;;  %v14183_v31 = vld [vmem:[#allocation2 + $0xdc] sm:$0xff]  ;;  %v14185_v58 = vld [vmem:[#allocation2 + $0x24] sm:$0xff] }
  0xae   : > { %12009 = vmatprep.mubr.msk.f32.mxu0 %vm426_vm3, %v1148_v62  ;;  %12279 = vmatprep.mubr.msk.f32.mxu1 %vm426_vm3, %v3862_v40  ;;  %v14187_v62 = vld [vmem:[#allocation2 + $0xe4] sm:$0xff] }
  0xaf   : > { %v4356_v40 = vld [vmem:[#allocation2 + $0x104] sm:$0xff] }
  0xb1   : > { %12010 = vmatmul.mubr.msk.f32.gmra.mrb[10].mxu0 %vm426_vm3, %v1149_v32  ;;  %12280 = vmatmul.mubr.msk.f32.gmra.mrb[16].mxu1 %vm426_vm3, %v3863_v43  ;;  %v14192_v32 = vld [vmem:[%s15405_s1 + $0x1c] sm:$0xf]  ;;  %v1893_v43 = vld [vmem:[#allocation2 + $0x4c] sm:$0xff] }
  0xb2   : > { %12012 = vmatprep.mubr.msk.f32.mxu0 %vm426_vm3, %v1150_v22  ;;  %12284 = vmatprep.mubr.msk.f32.mxu1 %vm426_vm3, %v4095_v48  ;;  %v1889_v22 = vld [vmem:[#allocation2 + $0x2c] sm:$0xff] }
  0xb3   : > { %v4357_v48 = vld [vmem:[#allocation2 + $0x10c] sm:$0xff] }
  0xb5   : > { %12013 = vmatmul.mubr.msk.f32.gmra.mrb[12].mxu0 %vm426_vm3, %v1151_v35  ;;  %12285 = vmatmul.mubr.msk.f32.vlgmr.msra.gmra.mrb[0].mxu1 %vm426_vm3, %v4096_v44  ;;  %v14201_v35 = vld [vmem:[#allocation2 + $0x34] sm:$0xff] }
  0xb6   : > { %12015 = vmatprep.mubr.msk.f32.mxu0 %vm426_vm3, %v1152_v36  ;;  %12287 = vmatprep.mubr.msk.f32.mxu1 %vm426_vm3, %v4097_v45  ;;  %v4354_v36 = vld [vmem:[#allocation2 + $0xf4] sm:$0xff] }
  0xb7   : > { %12312 = vmatpush3.msk.msra.mxu1 %vm370_vm0, %v10706_v34  ;;  %v4353_v34 = vld [vmem:[#allocation2 + $0xec] sm:$0xff]  ;;  %v1894_v44 = vld [vmem:[#allocation2 + $0x54] sm:$0xff] }
  0xb8   : > { %12340 = vmatprep.subr.msk.mxu1 %vm370_vm0, %v14090_v46  ;;  %v4358_v45 = vld [vmem:[#allocation2 + $0x114] sm:$0xff] }
  0xb9   : > { %12016 = vmatmul.mubr.msk.f32.gmra.mrb[14].mxu0 %vm426_vm3, %v1153_v38  ;;  %12288 = vmatmul.mubr.msk.f32.gmra.mrb[2].mxu1 %vm426_vm3, %v4098_v47  ;;  %v1891_v38 = vld [vmem:[#allocation2 + $0x3c] sm:$0xff] }
  0xba   : > { %12018 = vmatprep.mubr.msk.f32.mxu0 %vm426_vm3, %v13916_v59  ;;  %12290 = vmatprep.mubr.msk.f32.mxu1 %vm426_vm3, %v4099_v49  ;;  %v14112_v59 = vld [vmem:[%s15405_s1 + $0x18] sm:$0xf]  ;;  %v4359_v47 = vld [vmem:[#allocation2 + $0x11c] sm:$0xff]  ;;  %v1896_v49 = vld [vmem:[#allocation2 + $0x64] sm:$0xff] }
  0xbd   : > { %12019 = vmatmul.mubr.msk.f32.gmra.mrb[16].mxu0 %vm426_vm3, %v13923_v61  ;;  %12291 = vmatmul.mubr.msk.f32.gmra.mrb[4].mxu1 %vm426_vm3, %v4100_v51  ;;  %v4104_v61 = vld [vmem:[#allocation2 + $0xeb] sm:$0xff] }
  0xbe   : > { %12023 = vmatprep.mubr.msk.f32.mxu0 %vm426_vm3, %v1636_v3  ;;  %12293 = vmatprep.mubr.msk.f32.mxu1 %vm426_vm3, %v4101_v52  ;;  %v4360_v51 = vld [vmem:[#allocation2 + $0x124] sm:$0xff]  ;;  %v1897_v3 = vld [vmem:[#allocation2 + $0x6c] sm:$0xff] }
  0xbf   : > { %v4361_v52 = vld [vmem:[#allocation2 + $0x12c] sm:$0xff] }
  0xc1   : > { %12024 = vmatmul.mubr.msk.f32.vlgmr.msra.gmra.mrb[0].mxu0 %vm426_vm3, %v1637_v54  ;;  %12294 = vmatmul.mubr.msk.f32.gmra.mrb[6].mxu1 %vm426_vm3, %v4102_v55  ;;  %v1899_v54 = vld [vmem:[#allocation2 + $0x7c] sm:$0xff]  ;;  %v1900_v55 = vld [vmem:[#allocation2 + $0x84] sm:$0xff] }
  0xc2   : > { %12051 = vmatpush3.msk.msra.mxu0 %vm370_vm0, %v10526_v42  ;;  %12026 = vmatprep.mubr.msk.f32.mxu0 %vm426_vm3, %v1638_v56  ;;  %v1892_v42 = vld [vmem:[#allocation2 + $0x44] sm:$0xff]  ;;  %v10766_v56 = vld [vmem:[%s15405_s1 + $0x20] sm:$0xf] }
  0xc3   : > { %12296 = vmatprep.mubr.msk.f32.mxu1 %vm426_vm3, %v4103_v57  ;;  %12079 = vmatprep.subr.msk.mxu0 %vm370_vm0, %v14112_v59  ;;  %v1901_v57 = vld [vmem:[#allocation2 + $0x8c] sm:$0xff] }
  0xc5   : > { %12027 = vmatmul.mubr.msk.f32.gmra.mrb[2].mxu0 %vm426_vm3, %v1639_v60  ;;  %12297 = vmatmul.mubr.msk.f32.gmra.mrb[8].mxu1 %vm426_vm3, %v4104_v61  ;;  %v1903_v60 = vld [vmem:[#allocation2 + $0x9c] sm:$0xff] }
  0xc6   : > { %12029 = vmatprep.mubr.msk.f32.mxu0 %vm426_vm3, %v1640_v63  ;;  %12299 = vmatprep.mubr.msk.f32.mxu1 %vm426_vm3, %v4105_v0  ;;  %v10586_v61 = vld [vmem:[%s15405_s1 + $0x20] sm:$0xf]  ;;  %v4609_v63 = vld [vmem:[#allocation2 + $0x134] sm:$0xff] }
  0xc7   : > { %v4610_v0 = vld [vmem:[#allocation2 + $0x13c] sm:$0xff] }
  0xc9   : > { %12030 = vmatmul.mubr.msk.f32.gmra.mrb[4].mxu0 %vm426_vm3, %v1641_v1  ;;  %12300 = vmatmul.mubr.msk.f32.gmra.mrb[10].mxu1 %vm426_vm3, %v4106_v5  ;;  %v4842_v1 = vld [vmem:[#allocation2 + $0xb5] sm:$0xff]  ;;  %v4843_v5 = vld [vmem:[#allocation2 + $0xbd] sm:$0xff] }
  0xca   : > { %12032 = vmatprep.mubr.msk.f32.mxu0 %vm426_vm3, %v1642_v6  ;;  %12302 = vmatprep.mubr.msk.f32.mxu1 %vm426_vm3, %v4107_v4  ;;  %v4844_v6 = vld [vmem:[#allocation2 + $0xc5] sm:$0xff]  ;;  %v4845_v4 = vld [vmem:[#allocation2 + $0xcd] sm:$0xff] }
  0xcd   : > { %12033 = vmatmul.mubr.msk.f32.gmra.mrb[6].mxu0 %vm426_vm3, %v1643_v7  ;;  %12303 = vmatmul.mubr.msk.f32.gmra.mrb[12].mxu1 %vm426_vm3, %v4108_v8  ;;  %v4846_v7 = vld [vmem:[#allocation2 + $0xd5] sm:$0xff]  ;;  %v4847_v8 = vld [vmem:[#allocation2 + $0xdd] sm:$0xff] }
  0xce   : > { %12035 = vmatprep.mubr.msk.f32.mxu0 %vm426_vm3, %v1644_v9  ;;  %12305 = vmatprep.mubr.msk.f32.mxu1 %vm426_vm3, %v4109_v10  ;;  %v2386_v9 = vld [vmem:[#allocation2 + $0x25] sm:$0xff] }
  0xcf   : > { %v4848_v10 = vld [vmem:[#allocation2 + $0xe5] sm:$0xff] }
  0xd1   : > { %12036 = vmatmul.mubr.msk.f32.gmra.mrb[8].mxu0 %vm426_vm3, %v1645_v11  ;;  %12306 = vmatmul.mubr.msk.f32.gmra.mrb[14].mxu1 %vm426_vm3, %v4110_v12  ;;  %v2387_v11 = vld [vmem:[#allocation2 + $0x2d] sm:$0xff] }
  0xd2   : > { %12038 = vmatprep.mubr.msk.f32.mxu0 %vm426_vm3, %v1646_v13  ;;  %12308 = vmatprep.mubr.msk.f32.mxu1 %vm426_vm3, %v4111_v14  ;;  %v4849_v12 = vld [vmem:[#allocation2 + $0xed] sm:$0xff]  ;;  %v2388_v13 = vld [vmem:[#allocation2 + $0x35] sm:$0xff] }
  0xd3   : > { %v4850_v14 = vld [vmem:[#allocation2 + $0xf5] sm:$0xff] }
  0xd5   : > { %12039 = vmatmul.mubr.msk.f32.gmra.mrb[10].mxu0 %vm426_vm3, %v1647_v15  ;;  %12309 = vmatmul.mubr.msk.f32.gmra.mrb[16].mxu1 %vm426_vm3, %v4112_v16  ;;  %v2389_v15 = vld [vmem:[#allocation2 + $0x3d] sm:$0xff] }
  0xd6   : > { %12041 = vmatprep.mubr.msk.f32.mxu0 %vm426_vm3, %v1648_v18  ;;  %12313 = vmatprep.mubr.msk.f32.mxu1 %vm426_vm3, %v14137_v24  ;;  %v4851_v16 = vld [vmem:[#allocation2 + $0xfd] sm:$0xff]  ;;  %v2390_v18 = vld [vmem:[#allocation2 + $0x45] sm:$0xff] }
  0xd9   : > { %12042 = vmatmul.mubr.msk.f32.gmra.mrb[12].mxu0 %vm426_vm3, %v1649_v2  ;;  %12314 = vmatmul.mubr.msk.f32.vlgmr.msra.gmra.mrb[0].mxu1 %vm426_vm3, %v14144_v17  ;;  %v2391_v2 = vld [vmem:[#allocation2 + $0x4d] sm:$0xff] }
  0xda   : > { %12044 = vmatprep.mubr.msk.f32.mxu0 %vm426_vm3, %v1650_v37  ;;  %12316 = vmatprep.mubr.msk.f32.mxu1 %vm426_vm3, %v14146_v50  ;;  %v2392_v37 = vld [vmem:[#allocation2 + $0x55] sm:$0xff] }
  0xdb   : > { %12341 = vmatpush3.msk.msra.mxu1 %vm370_vm0, %v14090_v46  ;;  %v1895_v46 = vld [vmem:[#allocation2 + $0x5c] sm:$0xff] }
  0xdc   : > { %12369 = vmatprep.subr.msk.mxu1 %vm370_vm0, %v14154_v19 }
  0xdd   : > { %12045 = vmatmul.mubr.msk.f32.gmra.mrb[14].mxu0 %vm426_vm3, %v1651_v20  ;;  %12317 = vmatmul.mubr.msk.f32.gmra.mrb[2].mxu1 %vm426_vm3, %v14159_v21  ;;  %v4855_v20 = vld [vmem:[#allocation2 + $0x11d] sm:$0xff] }
  0xde   : > { %12047 = vmatprep.mubr.msk.f32.mxu0 %vm426_vm3, %v1652_v23  ;;  %12319 = vmatprep.mubr.msk.f32.mxu1 %vm426_vm3, %v14161_v25  ;;  %v4856_v23 = vld [vmem:[#allocation2 + $0x125] sm:$0xff] }
  0xe1   : > { %12048 = vmatmul.mubr.msk.f32.gmra.mrb[16].mxu0 %vm426_vm3, %v1653_v26  ;;  %12320 = vmatmul.mubr.msk.f32.gmra.mrb[4].mxu1 %vm426_vm3, %v14173_v27  ;;  %v4857_v26 = vld [vmem:[#allocation2 + $0x12d] sm:$0xff] }
  0xe2   : > { %12052 = vmatprep.mubr.msk.f32.mxu0 %vm426_vm3, %v1886_v28  ;;  %12322 = vmatprep.mubr.msk.f32.mxu1 %vm426_vm3, %v14175_v29  ;;  %v4858_v28 = vld [vmem:[#allocation2 + $0x135] sm:$0xff] }
  0xe5   : > { %12053 = vmatmul.mubr.msk.f32.vlgmr.msra.gmra.mrb[0].mxu0 %vm426_vm3, %v1887_v30  ;;  %12323 = vmatmul.mubr.msk.f32.gmra.mrb[6].mxu1 %vm426_vm3, %v14183_v31  ;;  %v4859_v30 = vld [vmem:[#allocation2 + $0x13d] sm:$0xff] }
  0xe6   : > { %12080 = vmatpush3.msk.msra.mxu0 %vm370_vm0, %v14112_v59  ;;  %12055 = vmatprep.mubr.msk.f32.mxu0 %vm426_vm3, %v14185_v58  ;;  %v1902_v59 = vld [vmem:[#allocation2 + $0x94] sm:$0xff] }
  0xe7   : > { %12325 = vmatprep.mubr.msk.f32.mxu1 %vm426_vm3, %v14187_v62  ;;  %12108 = vmatprep.subr.msk.mxu0 %vm370_vm0, %v14192_v32 }
  0xe9   : > { %12056 = vmatmul.mubr.msk.f32.gmra.mrb[2].mxu0 %vm426_vm3, %v1889_v22  ;;  %12326 = vmatmul.mubr.msk.f32.gmra.mrb[8].mxu1 %vm426_vm3, %v4353_v34 }
  0xea   : > { %12058 = vmatprep.mubr.msk.f32.mxu0 %vm426_vm3, %v14201_v35  ;;  %12328 = vmatprep.mubr.msk.f32.mxu1 %vm426_vm3, %v4354_v36 }
  0xed   : > { %12059 = vmatmul.mubr.msk.f32.gmra.mrb[4].mxu0 %vm426_vm3, %v1891_v38  ;;  %12329 = vmatmul.mubr.msk.f32.gmra.mrb[10].mxu1 %vm426_vm3, %v4355_v41 }
  0xee   : > { %12061 = vmatprep.mubr.msk.f32.mxu0 %vm426_vm3, %v1892_v42  ;;  %12331 = vmatprep.mubr.msk.f32.mxu1 %vm426_vm3, %v4356_v40 }
  0xf1   : > { %12062 = vmatmul.mubr.msk.f32.gmra.mrb[6].mxu0 %vm426_vm3, %v1893_v43  ;;  %12332 = vmatmul.mubr.msk.f32.gmra.mrb[12].mxu1 %vm426_vm3, %v4357_v48 }
  0xf2   : > { %12064 = vmatprep.mubr.msk.f32.mxu0 %vm426_vm3, %v1894_v44  ;;  %12334 = vmatprep.mubr.msk.f32.mxu1 %vm426_vm3, %v4358_v45 }
  0xf5   : > { %12065 = vmatmul.mubr.msk.f32.gmra.mrb[8].mxu0 %vm426_vm3, %v1895_v46  ;;  %12335 = vmatmul.mubr.msk.f32.gmra.mrb[14].mxu1 %vm426_vm3, %v4359_v47 }
  0xf6   : > { %12067 = vmatprep.mubr.msk.f32.mxu0 %vm426_vm3, %v1896_v49  ;;  %12337 = vmatprep.mubr.msk.f32.mxu1 %vm426_vm3, %v4360_v51 }
  0xf9   : > { %12068 = vmatmul.mubr.msk.f32.gmra.mrb[10].mxu0 %vm426_vm3, %v1897_v3  ;;  %12338 = vmatmul.mubr.msk.f32.gmra.mrb[16].mxu1 %vm426_vm3, %v4361_v52 }
  0xfa   : > { %12070 = vmatprep.mubr.msk.f32.mxu0 %vm426_vm3, %v1898_v53  ;;  %12342 = vmatprep.mubr.msk.f32.mxu1 %vm426_vm3, %v14146_v50  ;;  %v4854_v50 = vld [vmem:[#allocation2 + $0x115] sm:$0xff] }
  0xfd   : > { %12071 = vmatmul.mubr.msk.f32.gmra.mrb[12].mxu0 %vm426_vm3, %v1899_v54  ;;  %12343 = vmatmul.mubr.msk.f32.vlgmr.msra.gmra.mrb[0].mxu1 %vm426_vm3, %v14159_v21  ;;  %v2394_v21 = vld [vmem:[#allocation2 + $0x65] sm:$0xff] }
  0xfe   : > { %12073 = vmatprep.mubr.msk.f32.mxu0 %vm426_vm3, %v1900_v55  ;;  %12345 = vmatprep.mubr.msk.f32.mxu1 %vm426_vm3, %v14161_v25  ;;  %v2395_v25 = vld [vmem:[#allocation2 + $0x6d] sm:$0xff] }
  0xff   : > { %12370 = vmatpush3.msk.msra.mxu1 %vm370_vm0, %v14154_v19  ;;  %v2393_v19 = vld [vmem:[#allocation2 + $0x5d] sm:$0xff] }
 0x100   : > { %12398 = vmatprep.subr.msk.mxu1 %vm370_vm0, %v10766_v56 }
 0x101   : > { %12074 = vmatmul.mubr.msk.f32.gmra.mrb[14].mxu0 %vm426_vm3, %v1901_v57  ;;  %12346 = vmatmul.mubr.msk.f32.gmra.mrb[2].mxu1 %vm426_vm3, %v14173_v27  ;;  %v2396_v27 = vld [vmem:[#allocation2 + $0x75] sm:$0xff] }
 0x102   : > { %12076 = vmatprep.mubr.msk.f32.mxu0 %vm426_vm3, %v1902_v59  ;;  %12348 = vmatprep.mubr.msk.f32.mxu1 %vm426_vm3, %v14175_v29  ;;  %v2397_v29 = vld [vmem:[#allocation2 + $0x7d] sm:$0xff] }
 0x105   : > { %12077 = vmatmul.mubr.msk.f32.gmra.mrb[16].mxu0 %vm426_vm3, %v1903_v60  ;;  %12349 = vmatmul.mubr.msk.f32.gmra.mrb[4].mxu1 %vm426_vm3, %v14183_v31  ;;  %v2398_v31 = vld [vmem:[#allocation2 + $0x85] sm:$0xff] }
 0x106   : > { %12081 = vmatprep.mubr.msk.f32.mxu0 %vm426_vm3, %v14185_v58  ;;  %12351 = vmatprep.mubr.msk.f32.mxu1 %vm426_vm3, %v14187_v62  ;;  %v5091_v58 = vld [vmem:[#allocation2 + $0xb6] sm:$0xff]  ;;  %v2399_v62 = vld [vmem:[#allocation2 + $0x8d] sm:$0xff] }
 0x109   : > { %12082 = vmatmul.mubr.msk.f32.vlgmr.msra.gmra.mrb[0].mxu0 %vm426_vm3, %v1889_v22  ;;  %12352 = vmatmul.mubr.msk.f32.gmra.mrb[6].mxu1 %vm426_vm3, %v4353_v34  ;;  %v2400_v22 = vld [vmem:[#allocation2 + $0x95] sm:$0xff]  ;;  %v5093_v34 = vld [vmem:[#allocation2 + $0xc6] sm:$0xff] }
 0x10a   : > { %12109 = vmatpush3.msk.msra.mxu0 %vm370_vm0, %v14192_v32  ;;  %12084 = vmatprep.mubr.msk.f32.mxu0 %vm426_vm3, %v14201_v35  ;;  %v5092_v32 = vld [vmem:[#allocation2 + $0xbe] sm:$0xff] }
 0x10b   : > { %12354 = vmatprep.mubr.msk.f32.mxu1 %vm426_vm3, %v4354_v36  ;;  %12137 = vmatprep.subr.msk.mxu0 %vm370_vm0, %v10586_v61  ;;  %v2401_v35 = vld [vmem:[#allocation2 + $0x9d] sm:$0xff]  ;;  %v5094_v36 = vld [vmem:[#allocation2 + $0xce] sm:$0xff] }
 0x10d   : > { %12085 = vmatmul.mubr.msk.f32.gmra.mrb[2].mxu0 %vm426_vm3, %v1891_v38  ;;  %12355 = vmatmul.mubr.msk.f32.gmra.mrb[8].mxu1 %vm426_vm3, %v4355_v41  ;;  %v2402_v38 = vld [vmem:[#allocation2 + $0xa5] sm:$0xff]  ;;  %v5095_v41 = vld [vmem:[#allocation2 + $0xd6] sm:$0xff] }
 0x10e   : > { %12087 = vmatprep.mubr.msk.f32.mxu0 %vm426_vm3, %v1892_v42  ;;  %12357 = vmatprep.mubr.msk.f32.mxu1 %vm426_vm3, %v4356_v40  ;;  %v2403_v42 = vld [vmem:[#allocation2 + $0xad] sm:$0xff]  ;;  %v5096_v40 = vld [vmem:[#allocation2 + $0xde] sm:$0xff] }
 0x111   : > { %12088 = vmatmul.mubr.msk.f32.gmra.mrb[4].mxu0 %vm426_vm3, %v1893_v43  ;;  %12358 = vmatmul.mubr.msk.f32.gmra.mrb[10].mxu1 %vm426_vm3, %v4357_v48  ;;  %v2636_v43 = vld [vmem:[#allocation2 + $0x26] sm:$0xff] }
 0x112   : > { %12090 = vmatprep.mubr.msk.f32.mxu0 %vm426_vm3, %v1894_v44  ;;  %12360 = vmatprep.mubr.msk.f32.mxu1 %vm426_vm3, %v4358_v45  ;;  %v5097_v48 = vld [vmem:[#allocation2 + $0xe6] sm:$0xff]  ;;  %v2637_v44 = vld [vmem:[#allocation2 + $0x2e] sm:$0xff] }
 0x113   : > { %v5098_v45 = vld [vmem:[#allocation2 + $0xee] sm:$0xff] }
 0x115   : > { %12091 = vmatmul.mubr.msk.f32.gmra.mrb[6].mxu0 %vm426_vm3, %v1895_v46  ;;  %12361 = vmatmul.mubr.msk.f32.gmra.mrb[12].mxu1 %vm426_vm3, %v4359_v47  ;;  %v2638_v46 = vld [vmem:[#allocation2 + $0x36] sm:$0xff] }
 0x116   : > { %12093 = vmatprep.mubr.msk.f32.mxu0 %vm426_vm3, %v1896_v49  ;;  %12363 = vmatprep.mubr.msk.f32.mxu1 %vm426_vm3, %v4360_v51  ;;  %v5099_v47 = vld [vmem:[#allocation2 + $0xf6] sm:$0xff]  ;;  %v2639_v49 = vld [vmem:[#allocation2 + $0x3e] sm:$0xff] }
 0x117   : > { %v5100_v51 = vld [vmem:[#allocation2 + $0xfe] sm:$0xff] }
 0x119   : > { %12094 = vmatmul.mubr.msk.f32.gmra.mrb[8].mxu0 %vm426_vm3, %v1897_v3  ;;  %12364 = vmatmul.mubr.msk.f32.gmra.mrb[14].mxu1 %vm426_vm3, %v4361_v52  ;;  %v2640_v3 = vld [vmem:[#allocation2 + $0x46] sm:$0xff] }
 0x11a   : > { %12096 = vmatprep.mubr.msk.f32.mxu0 %vm426_vm3, %v1898_v53  ;;  %12366 = vmatprep.mubr.msk.f32.mxu1 %vm426_vm3, %v4609_v63  ;;  %v5101_v52 = vld [vmem:[#allocation2 + $0x106] sm:$0xff]  ;;  %v2641_v53 = vld [vmem:[#allocation2 + $0x4e] sm:$0xff]  ;;  %v5107_v63 = vld [vmem:[#allocation2 + $0x136] sm:$0xff] }
 0x11d   : > { %12097 = vmatmul.mubr.msk.f32.gmra.mrb[10].mxu0 %vm426_vm3, %v1899_v54  ;;  %12367 = vmatmul.mubr.msk.f32.gmra.mrb[16].mxu1 %vm426_vm3, %v4610_v0  ;;  %v2642_v54 = vld [vmem:[#allocation2 + $0x56] sm:$0xff]  ;;  %v5108_v0 = vld [vmem:[#allocation2 + $0x13e] sm:$0xff] }
 0x11e   : > { %12099 = vmatprep.mubr.msk.f32.mxu0 %vm426_vm3, %v1900_v55  ;;  %12371 = vmatprep.mubr.msk.f32.mxu1 %vm426_vm3, %v4842_v1  ;;  %v2643_v55 = vld [vmem:[#allocation2 + $0x5e] sm:$0xff]  ;;  %v2648_v1 = vld [vmem:[#allocation2 + $0x86] sm:$0xff] }
 0x121   : > { %12100 = vmatmul.mubr.msk.f32.gmra.mrb[12].mxu0 %vm426_vm3, %v1901_v57  ;;  %12372 = vmatmul.mubr.msk.f32.vlgmr.msra.gmra.mrb[0].mxu1 %vm426_vm3, %v4843_v5  ;;  %v2644_v57 = vld [vmem:[#allocation2 + $0x66] sm:$0xff]  ;;  %v2649_v5 = vld [vmem:[#allocation2 + $0x8e] sm:$0xff] }
 0x122   : > { %12102 = vmatprep.mubr.msk.f32.mxu0 %vm426_vm3, %v1902_v59  ;;  %12374 = vmatprep.mubr.msk.f32.mxu1 %vm426_vm3, %v4844_v6  ;;  %v5105_v59 = vld [vmem:[#allocation2 + $0x126] sm:$0xff]  ;;  %v2650_v6 = vld [vmem:[#allocation2 + $0x96] sm:$0xff] }
 0x123   : > { %12399 = vmatpush3.msk.msra.mxu1 %vm370_vm0, %v10766_v56  ;;  %v5104_v56 = vld [vmem:[#allocation2 + $0x11e] sm:$0xff] }
 0x125   : > { %12103 = vmatmul.mubr.msk.f32.gmra.mrb[14].mxu0 %vm426_vm3, %v1903_v60  ;;  %12375 = vmatmul.mubr.msk.f32.gmra.mrb[2].mxu1 %vm426_vm3, %v4845_v4  ;;  %v2645_v60 = vld [vmem:[#allocation2 + $0x6e] sm:$0xff]  ;;  %v2651_v4 = vld [vmem:[#allocation2 + $0x9e] sm:$0xff] }
 0x126   : > { %12105 = vmatprep.mubr.msk.f32.mxu0 %vm426_vm3, %v14137_v24  ;;  %12377 = vmatprep.mubr.msk.f32.mxu1 %vm426_vm3, %v4846_v7  ;;  %v4852_v24 = vld [vmem:[#allocation2 + $0x105] sm:$0xff] }
 0x127   : > { %v2652_v7 = vld [vmem:[#allocation2 + $0xa6] sm:$0xff] }
 0x129   : > { %12106 = vmatmul.mubr.msk.f32.gmra.mrb[16].mxu0 %vm426_vm3, %v14144_v17  ;;  %12378 = vmatmul.mubr.msk.f32.gmra.mrb[4].mxu1 %vm426_vm3, %v4847_v8  ;;  %v4853_v17 = vld [vmem:[#allocation2 + $0x10d] sm:$0xff] }
 0x12a   : > { %12110 = vmatprep.mubr.msk.f32.mxu0 %vm426_vm3, %v2386_v9  ;;  %12380 = vmatprep.mubr.msk.f32.mxu1 %vm426_vm3, %v4848_v10  ;;  %v2653_v8 = vld [vmem:[#allocation2 + $0xae] sm:$0xff]  ;;  %v10786_v9 = vld [vmem:[%s15407_s3 + $0x4] sm:$0xf] }
 0x12b   : > { %v11000_v10 = vld [vmem:[%s15407_s3 + $0x4] sm:$0xf] }
 0x12c   : > { %12688 = vmatprep.subr.msk.mxu1 %vm370_vm0, %v11000_v10 }
 0x12d   : > { %12111 = vmatmul.mubr.msk.f32.vlgmr.msra.gmra.mrb[0].mxu0 %vm426_vm3, %v2387_v11  ;;  %12381 = vmatmul.mubr.msk.f32.gmra.mrb[6].mxu1 %vm426_vm3, %v4849_v12  ;;  %v14380_v11 = vld [vmem:[%s15407_s3] sm:$0xf] }
 0x12e   : > { %12138 = vmatpush3.msk.msra.mxu0 %vm370_vm0, %v10586_v61  ;;  %12113 = vmatprep.mubr.msk.f32.mxu0 %vm426_vm3, %v2388_v13  ;;  %v5106_v61 = vld [vmem:[#allocation2 + $0x12e] sm:$0xff]  ;;  %v14387_v12 = vld [vmem:[%s15407_s3] sm:$0xf] }
 0x12f   : > { %12383 = vmatprep.mubr.msk.f32.mxu1 %vm426_vm3, %v4850_v14  ;;  %12427 = vmatprep.subr.msk.mxu0 %vm370_vm0, %v10786_v9  ;;  %v14394_v13 = vld [vmem:[%s15406_s2] ss:$0 sm:$0xff] }
 0x131   : > { %12114 = vmatmul.mubr.msk.f32.gmra.mrb[2].mxu0 %vm426_vm3, %v2389_v15  ;;  %12384 = vmatmul.mubr.msk.f32.gmra.mrb[8].mxu1 %vm426_vm3, %v4851_v16 }
 0x132   : > { %12116 = vmatprep.mubr.msk.f32.mxu0 %vm426_vm3, %v2390_v18  ;;  %12386 = vmatprep.mubr.msk.f32.mxu1 %vm426_vm3, %v4852_v24 }
 0x135   : > { %12117 = vmatmul.mubr.msk.f32.gmra.mrb[4].mxu0 %vm426_vm3, %v2391_v2  ;;  %12387 = vmatmul.mubr.msk.f32.gmra.mrb[10].mxu1 %vm426_vm3, %v4853_v17 }
 0x136   : > { %12119 = vmatprep.mubr.msk.f32.mxu0 %vm426_vm3, %v2392_v37  ;;  %12389 = vmatprep.mubr.msk.f32.mxu1 %vm426_vm3, %v4854_v50 }
 0x139   : > { %12120 = vmatmul.mubr.msk.f32.gmra.mrb[6].mxu0 %vm426_vm3, %v2393_v19  ;;  %12390 = vmatmul.mubr.msk.f32.gmra.mrb[12].mxu1 %vm426_vm3, %v4855_v20 }
 0x13a   : > { %12122 = vmatprep.mubr.msk.f32.mxu0 %vm426_vm3, %v2394_v21  ;;  %12392 = vmatprep.mubr.msk.f32.mxu1 %vm426_vm3, %v4856_v23 }
 0x13d   : > { %12123 = vmatmul.mubr.msk.f32.gmra.mrb[8].mxu0 %vm426_vm3, %v2395_v25  ;;  %12393 = vmatmul.mubr.msk.f32.gmra.mrb[14].mxu1 %vm426_vm3, %v4857_v26 }
 0x13e   : > { %12125 = vmatprep.mubr.msk.f32.mxu0 %vm426_vm3, %v2396_v27  ;;  %12395 = vmatprep.mubr.msk.f32.mxu1 %vm426_vm3, %v4858_v28 }
 0x141   : > { %12126 = vmatmul.mubr.msk.f32.gmra.mrb[10].mxu0 %vm426_vm3, %v2397_v29  ;;  %12396 = vmatmul.mubr.msk.f32.gmra.mrb[16].mxu1 %vm426_vm3, %v4859_v30 }
 0x142   : > { %12128 = vmatprep.mubr.msk.f32.mxu0 %vm426_vm3, %v2398_v31  ;;  %12400 = vmatprep.mubr.msk.f32.mxu1 %vm426_vm3, %v5091_v58 }
 0x145   : > { %12129 = vmatmul.mubr.msk.f32.gmra.mrb[12].mxu0 %vm426_vm3, %v2399_v62  ;;  %12401 = vmatmul.mubr.msk.f32.vlgmr.msra.gmra.mrb[0].mxu1 %vm426_vm3, %v5092_v32 }
 0x146   : > { %12131 = vmatprep.mubr.msk.f32.mxu0 %vm426_vm3, %v2400_v22  ;;  %12403 = vmatprep.mubr.msk.f32.mxu1 %vm426_vm3, %v5093_v34 }
 0x147   : > { %12689 = vmatpush3.msk.msra.mxu1 %vm370_vm0, %v11000_v10 }
 0x148   : > { %12717 = vmatprep.subr.msk.mxu1 %vm370_vm0, %v14387_v12 }
 0x149   : > { %12132 = vmatmul.mubr.msk.f32.gmra.mrb[14].mxu0 %vm426_vm3, %v2401_v35  ;;  %12404 = vmatmul.mubr.msk.f32.gmra.mrb[2].mxu1 %vm426_vm3, %v5094_v36 }
 0x14a   : > { %12134 = vmatprep.mubr.msk.f32.mxu0 %vm426_vm3, %v2402_v38  ;;  %12406 = vmatprep.mubr.msk.f32.mxu1 %vm426_vm3, %v5095_v41 }
 0x14d   : > { %12135 = vmatmul.mubr.msk.f32.gmra.mrb[16].mxu0 %vm426_vm3, %v2403_v42  ;;  %12407 = vmatmul.mubr.msk.f32.gmra.mrb[4].mxu1 %vm426_vm3, %v5096_v40 }
 0x14e   : > { %12139 = vmatprep.mubr.msk.f32.mxu0 %vm426_vm3, %v2636_v43  ;;  %12409 = vmatprep.mubr.msk.f32.mxu1 %vm426_vm3, %v5097_v48 }
 0x151   : > { %12140 = vmatmul.mubr.msk.f32.vlgmr.msra.gmra.mrb[0].mxu0 %vm426_vm3, %v2637_v44  ;;  %12410 = vmatmul.mubr.msk.f32.gmra.mrb[6].mxu1 %vm426_vm3, %v5098_v45 }
 0x152   : > { %12142 = vmatprep.mubr.msk.f32.mxu0 %vm426_vm3, %v2638_v46  ;;  %12412 = vmatprep.mubr.msk.f32.mxu1 %vm426_vm3, %v5099_v47 }
 0x153   : > { %12428 = vmatpush3.msk.msra.mxu0 %vm370_vm0, %v10786_v9 }
 0x154   : > { %12456 = vmatprep.subr.msk.mxu0 %vm370_vm0, %v14380_v11 }
 0x155   : > { %12143 = vmatmul.mubr.msk.f32.gmra.mrb[2].mxu0 %vm426_vm3, %v2639_v49  ;;  %12413 = vmatmul.mubr.msk.f32.gmra.mrb[8].mxu1 %vm426_vm3, %v5100_v51 }
 0x156   : > { %12145 = vmatprep.mubr.msk.f32.mxu0 %vm426_vm3, %v2640_v3  ;;  %12415 = vmatprep.mubr.msk.f32.mxu1 %vm426_vm3, %v5101_v52 }
 0x159   : > { %12146 = vmatmul.mubr.msk.f32.gmra.mrb[4].mxu0 %vm426_vm3, %v2641_v53  ;;  %12416 = vmatmul.mubr.msk.f32.gmra.mrb[10].mxu1 %vm426_vm3, %v13879_v33  ;;  %v2646_v33 = vld [vmem:[#allocation2 + $0x76] sm:$0xff] }
 0x15a   : > { %12148 = vmatprep.mubr.msk.f32.mxu0 %vm426_vm3, %v2642_v54  ;;  %12418 = vmatprep.mubr.msk.f32.mxu1 %vm426_vm3, %v14038_v39  ;;  %v2647_v39 = vld [vmem:[#allocation2 + $0x7e] sm:$0xff] }
 0x15d   : > { %12149 = vmatmul.mubr.msk.f32.gmra.mrb[6].mxu0 %vm426_vm3, %v2643_v55  ;;  %12419 = vmatmul.mubr.msk.f32.gmra.mrb[12].mxu1 %vm426_vm3, %v5104_v56 }
 0x15e   : > { %12151 = vmatprep.mubr.msk.f32.mxu0 %vm426_vm3, %v2644_v57  ;;  %12421 = vmatprep.mubr.msk.f32.mxu1 %vm426_vm3, %v5105_v59 }
 0x161   : > { %12152 = vmatmul.mubr.msk.f32.gmra.mrb[8].mxu0 %vm426_vm3, %v2645_v60  ;;  %12422 = vmatmul.mubr.msk.f32.gmra.mrb[14].mxu1 %vm426_vm3, %v5106_v61 }
 0x162   : > { %12154 = vmatprep.mubr.msk.f32.mxu0 %vm426_vm3, %v2646_v33  ;;  %12424 = vmatprep.mubr.msk.f32.mxu1 %vm426_vm3, %v5107_v63 }
 0x165   : > { %12155 = vmatmul.mubr.msk.f32.gmra.mrb[10].mxu0 %vm426_vm3, %v2647_v39  ;;  %12425 = vmatmul.mubr.msk.f32.gmra.mrb[16].mxu1 %vm426_vm3, %v5108_v0 }
 0x166   : > { %12157 = vmatprep.mubr.msk.f32.mxu0 %vm426_vm3, %v2648_v1 }
 0x169   : > { %12158 = vmatmul.mubr.msk.f32.gmra.mrb[12].mxu0 %vm426_vm3, %v2649_v5 }
 0x16a   : > { %12160 = vmatprep.mubr.msk.f32.mxu0 %vm426_vm3, %v2650_v6 }
 0x16d   : > { %12161 = vmatmul.mubr.msk.f32.gmra.mrb[14].mxu0 %vm426_vm3, %v2651_v4 }
 0x16e   : > { %12163 = vmatprep.mubr.msk.f32.mxu0 %vm426_vm3, %v2652_v7 }
 0x171   : > { %12164 = vmatmul.mubr.msk.f32.gmra.mrb[16].mxu0 %vm426_vm3, %v2653_v8 }
 0x218   : > { %v12402_v14 = vpop.f32.mrb[0].mxu1 }
 0x219   : > { %v5341_v15 = vadd.f32 %v12402_v14, %v14394_v13  ;;  %v5233_v16 = vpop.f32.mrb[1].mxu1 }
 0x21a   : > { %v5340_v18 = vadd.f32 %v14394_v13, %v5233_v16 }
 0x21b   : > { %v5343_v24 = vmax.f32 %v5341_v15, 0.0 }
 0x21c   : > { %v5342_v2 = vmax.f32 %v5340_v18, 0.0  ;;  %v12405_v17 = vpop.f32.mrb[2].mxu1 }
 0x21d   : > { %v5349_v37 = vrot.slane %v5343_v24, 7  ;;  %v5359_v50 = vadd.f32 %v12405_v17, %v14394_v13  ;;  %v5243_v19 = vpop.f32.mrb[3].mxu1  ;;  %v5354_v30 = vrot.slane %v5343_v24, 5 }
 0x21e   : > { %v5345_v20 = vrot.slane %v5342_v2, 1  ;;  %v5348_v21 = vrot.slane %v5342_v2, 7  ;;  %v5358_v23 = vadd.f32 %v14394_v13, %v5243_v19 }
 0x21f   : > { %v5362_v25 = vmax.f32 %v5359_v50, 0.0  ;;  %v5357_v40 = vsel %vm233_vm1, %v5349_v37, %v5354_v30 }
 0x220   : > { %v5350_v26 = vsel %vm233_vm1, %v5348_v21, %v5349_v37  ;;  %v5356_v27 = vsel %vm233_vm1, %v5345_v20, %v5348_v21  ;;  %v5361_v28 = vmax.f32 %v5358_v23, 0.0  ;;  %v12408_v29 = vpop.f32.mrb[4].mxu1 }
 0x221   : > { %5562 = vst.msk [vmem:[#allocation3 + $0xa2] sm:$0xff] %vm426_vm3, %v5356_v27  ;;  %5563 = vst.msk [vmem:[#allocation3 + $0xaa] sm:$0xff] %vm426_vm3, %v5350_v26  ;;  %v5370_v31 = vrot.slane %v5362_v25, 1  ;;  %v5380_v58 = vadd.f32 %v12408_v29, %v14394_v13  ;;  %v5253_v62 = vpop.f32.mrb[5].mxu1 }
 0x222   : > { %v5365_v32 = vrot.slane %v5361_v28, 3  ;;  %v5369_v22 = vrot.slane %v5361_v28, 1  ;;  %v5360_v34 = vadd.f32 %v14394_v13, %v5253_v62 }
 0x223   : > { %v5382_v35 = vmax.f32 %v5380_v58, 0.0 }
 0x224   : > { %v5371_v36 = vsel %vm2921_vm6, %v5369_v22, %v5370_v31  ;;  %v12141_v38 = vpop.f32.mrb[0].mxu0  ;;  %v5363_v41 = vmax.f32 %v5360_v34, 0.0  ;;  %v12411_v42 = vpop.f32.mrb[6].mxu1 }
 0x225   : > { %v5378_v43 = vsel %vm233_vm1, %v5365_v32, %v5371_v36  ;;  %v2893_v48 = vadd.f32 %v12141_v38, %v14394_v13  ;;  %v14410_v44 = vrot.slane %v5382_v35, 3  ;;  %v2779_v45 = vpop.f32.mrb[1].mxu0  ;;  %v5263_v46 = vpop.f32.mrb[7].mxu1  ;;  %v5399_v55 = vadd.f32 %v12411_v42, %v14394_v13 }
 0x226   : > { %v5498_v47 = vrot.slane %v5378_v43, 6  ;;  %v2892_v49 = vadd.f32 %v14394_v13, %v2779_v45  ;;  %v5372_v51 = vrot.slane %v5363_v41, 1  ;;  %v5376_v3 = vrot.slane %v5363_v41, 7 }
 0x227   : > { %v2895_v52 = vmax.f32 %v2893_v48, 0.0  ;;  %v5384_v53 = vrot.slane %v5363_v41, 5  ;;  %v5388_v54 = vrot.slane %v5363_v41, 3  ;;  %v5401_v16 = vmax.f32 %v5399_v55, 0.0 }
 0x228   : > { %v5556_v56 = vsel %vm359_vm4, %v5357_v40, %v5498_v47  ;;  %v2894_v57 = vmax.f32 %v2892_v49, 0.0  ;;  %v5373_v59 = vsel %vm2921_vm6, %v5370_v31, %v5372_v51  ;;  %v5379_v60 = vsel %vm233_vm1, %v5372_v51, %v5376_v3  ;;  %v12144_v61 = vpop.f32.mrb[2].mxu0  ;;  %v12414_v33 = vpop.f32.mrb[8].mxu1 }
 0x229   : > { %5564 = vst.msk [vmem:[#allocation3 + $0xb2] sm:$0xff] %vm426_vm3, %v5556_v56  ;;  %v2901_v63 = vrot.slane %v2895_v52, 7  ;;  %v2906_v39 = vrot.slane %v2895_v52, 5  ;;  %v5390_v0 = vsel %vm2941_vm7, %v5388_v54, %v14410_v44  ;;  %v5499_v1 = vrot.slane %v5373_v59, 6  ;;  %v2789_v5 = vpop.f32.mrb[3].mxu0  ;;  %v5273_v6 = vpop.f32.mrb[9].mxu1 }
 0x22a   : > { %v2897_v4 = vrot.slane %v2894_v57, 1  ;;  %v2900_v7 = vrot.slane %v2894_v57, 7  ;;  %v14421_v8 = vsel %vm233_vm1, %v5384_v53, %v5390_v0  ;;  %v5501_v9 = vrot.slane %v5379_v60, 6 }
 0x22b   : > { %v5500_v10 = vsel %vm359_vm4, %v5498_v47, %v5499_v1  ;;  %v5508_v14 = vrot.slane %v14421_v8, 4  ;;  %v2911_v15 = vadd.f32 %v12144_v61, %v14394_v13  ;;  %v2909_v18 = vsel %vm233_vm1, %v2901_v63, %v2906_v39 }
 0x22c   : > { %v2902_v24 = vsel %vm233_vm1, %v2900_v7, %v2901_v63  ;;  %v2908_v2 = vsel %vm233_vm1, %v2897_v4, %v2900_v7  ;;  %v5502_v17 = vsel %vm359_vm4, %v5499_v1, %v5501_v9  ;;  %5565 = vst.msk [vmem:[#allocation3 + $0xba] sm:$0xff] %vm426_vm3, %v5500_v10  ;;  %v12147_v37 = vpop.f32.mrb[4].mxu0  ;;  %v14431_v50 = vpop.f32.mrb[10].mxu1  ;;  %v2910_v21 = vadd.f32 %v14394_v13, %v2789_v5 }
 0x22d   : > { %3117 = vst.msk [vmem:[#allocation3 + $0x12] sm:$0xff] %vm426_vm3, %v2908_v2  ;;  %3118 = vst.msk [vmem:[#allocation3 + $0x1a] sm:$0xff] %vm426_vm3, %v2902_v24  ;;  %v5557_v19 = vsel %vm370_vm0, %v5502_v17, %v5508_v14  ;;  %v2914_v20 = vmax.f32 %v2911_v15, 0.0  ;;  %v5381_v23 = vadd.f32 %v14394_v13, %v5263_v46  ;;  %v2799_v25 = vpop.f32.mrb[5].mxu0  ;;  %v14438_v26 = vpop.f32.mrb[11].mxu1  ;;  %v2933_v27 = vadd.f32 %v12147_v37, %v14394_v13 }
 0x22e   : > { %5566 = vst.msk [vmem:[#allocation3 + $0xc2] sm:$0xff] %vm426_vm3, %v5557_v19  ;;  %v5418_v28 = vadd.f32 %v12414_v33, %v14394_v13  ;;  %v2912_v29 = vadd.f32 %v14394_v13, %v2799_v25  ;;  %v5400_v30 = vadd.f32 %v14394_v13, %v5273_v6  ;;  %v5408_v58 = vrot.slane %v5401_v16, 5 }
 0x22f   : > { %v2923_v31 = vrot.slane %v2914_v20, 1  ;;  %v2913_v62 = vmax.f32 %v2910_v21, 0.0  ;;  %v5383_v32 = vmax.f32 %v5381_v23, 0.0  ;;  %v2935_v22 = vmax.f32 %v2933_v27, 0.0 }
 0x230   : > { %v5420_v34 = vmax.f32 %v5418_v28, 0.0  ;;  %v2915_v35 = vmax.f32 %v2912_v29, 0.0  ;;  %v5402_v36 = vmax.f32 %v5400_v30, 0.0  ;;  %v12150_v38 = vpop.f32.mrb[6].mxu0  ;;  %v14445_v41 = vpop.f32.mrb[12].mxu1 }
 0x231   : > { %v2917_v42 = vrot.slane %v2913_v62, 3  ;;  %v2922_v40 = vrot.slane %v2913_v62, 1  ;;  %v5391_v43 = vrot.slane %v5383_v32, 3  ;;  %v5395_v48 = vrot.slane %v5383_v32, 1  ;;  %v2809_v45 = vpop.f32.mrb[7].mxu0  ;;  %v14447_v46 = vpop.f32.mrb[13].mxu1 }
 0x232   : > { %v5403_v47 = vrot.slane %v5383_v32, 7  ;;  %v5407_v49 = vrot.slane %v5383_v32, 5  ;;  %v14449_v51 = vrot.slane %v2935_v22, 3  ;;  %v5423_v3 = vrot.slane %v5420_v34, 1 }
 0x233   : > { %v2924_v52 = vsel %vm2921_vm6, %v2922_v40, %v2923_v31  ;;  %v5392_v53 = vsel %vm2941_vm7, %v14410_v44, %v5391_v43  ;;  %v5398_v54 = vsel %vm233_vm1, %v5391_v43, %v5395_v48  ;;  %v14455_v55 = vrot.slane %v5420_v34, 7 }
 0x234   : > { %v2931_v56 = vsel %vm233_vm1, %v2917_v42, %v2924_v52  ;;  %v5409_v57 = vsel %vm2961_vm8, %v5407_v49, %v5408_v58  ;;  %v5509_v59 = vrot.slane %v5392_v53, 4  ;;  %v5511_v60 = vrot.slane %v5398_v54, 4  ;;  %v12153_v61 = vpop.f32.mrb[8].mxu0  ;;  %v12423_v33 = vpop.f32.mrb[14].mxu1 }
 0x235   : > { %v3053_v63 = vrot.slane %v2931_v56, 6  ;;  %v5416_v39 = vsel %vm233_vm1, %v5403_v47, %v5409_v57  ;;  %v5434_v0 = vsel %vm233_vm1, %v5423_v3, %v14455_v55  ;;  %v2925_v1 = vrot.slane %v2915_v35, 1  ;;  %v2819_v44 = vpop.f32.mrb[9].mxu0  ;;  %v14462_v5 = vpop.f32.mrb[15].mxu1 }
 0x236   : > { %v5510_v6 = vsel %vm370_vm0, %v5508_v14, %v5509_v59  ;;  %v5512_v4 = vsel %vm370_vm0, %v5509_v59, %v5511_v60  ;;  %v5518_v7 = vrot.slane %v5416_v39, 2  ;;  %5571 = vst.msk [vmem:[#allocation3 + $0xea] sm:$0xff] %vm426_vm3, %v5434_v0  ;;  %v2929_v8 = vrot.slane %v2915_v35, 7 }
 0x237   : > { %v3111_v9 = vsel %vm359_vm4, %v2909_v18, %v3053_v63  ;;  %5567 = vst.msk [vmem:[#allocation3 + $0xca] sm:$0xff] %vm426_vm3, %v5510_v6  ;;  %v2926_v10 = vsel %vm2921_vm6, %v2923_v31, %v2925_v1  ;;  %v2937_v15 = vrot.slane %v2915_v35, 5  ;;  %v2942_v16 = vrot.slane %v2915_v35, 3 }
 0x238   : > { %3119 = vst.msk [vmem:[#allocation3 + $0x22] sm:$0xff] %vm426_vm3, %v3111_v9  ;;  %v5558_v24 = vsel %vm381_vm2, %v5512_v4, %v5518_v7  ;;  %v2932_v14 = vsel %vm233_vm1, %v2925_v1, %v2929_v8  ;;  %v3054_v2 = vrot.slane %v2926_v10, 6  ;;  %v5410_v17 = vrot.slane %v5402_v36, 5  ;;  %v14473_v37 = vpop.f32.mrb[10].mxu0  ;;  %v14475_v19 = vpop.f32.mrb[16].mxu1 }
 0x239   : > { %5568 = vst.msk [vmem:[#allocation3 + $0xd2] sm:$0xff] %vm426_vm3, %v5558_v24  ;;  %v2944_v18 = vsel %vm2941_vm7, %v2942_v16, %v14449_v51  ;;  %v3056_v20 = vrot.slane %v2932_v14, 6  ;;  %v5414_v21 = vrot.slane %v5402_v36, 3  ;;  %v2953_v23 = vadd.f32 %v12150_v38, %v14394_v13  ;;  %v14481_v25 = vpop.f32.mrb[11].mxu0  ;;  %v14483_v27 = vpop.f32.mrb[17].mxu1 }
 0x23a   : > { %v14486_v28 = vsel %vm233_vm1, %v2937_v15, %v2944_v18  ;;  %v3055_v29 = vsel %vm359_vm4, %v3053_v63, %v3054_v2  ;;  %v5411_v30 = vsel %vm2961_vm8, %v5408_v58, %v5410_v17  ;;  %v5436_v31 = vadd.f32 %v14431_v50, %v14394_v13 }
 0x23b   : > { %v3057_v62 = vsel %vm359_vm4, %v3054_v2, %v3056_v20  ;;  %v3063_v32 = vrot.slane %v14486_v28, 4  ;;  %3120 = vst.msk [vmem:[#allocation3 + $0x2a] sm:$0xff] %vm426_vm3, %v3055_v29  ;;  %v5417_v22 = vsel %vm233_vm1, %v5410_v17, %v5414_v21  ;;  %v5519_v34 = vrot.slane %v5411_v30, 2 }
 0x23c   : > { %v5521_v35 = vrot.slane %v5417_v22, 2  ;;  %v2955_v36 = vmax.f32 %v2953_v23, 0.0  ;;  %v14496_v38 = vpop.f32.mrb[12].mxu0  ;;  %v2934_v40 = vadd.f32 %v14394_v13, %v2809_v45  ;;  %v5419_v50 = vadd.f32 %v14394_v13, %v14438_v26 }
 0x23d   : > { %v3112_v42 = vsel %vm370_vm0, %v3057_v62, %v3063_v32  ;;  %v5520_v58 = vsel %vm381_vm2, %v5518_v7, %v5519_v34  ;;  %v14503_v43 = vpop.f32.mrb[13].mxu0  ;;  %v5439_v47 = vmax.f32 %v5436_v31, 0.0  ;;  %v2973_v49 = vadd.f32 %v12153_v61, %v14394_v13 }
 0x23e   : > { %3121 = vst.msk [vmem:[#allocation3 + $0x32] sm:$0xff] %vm426_vm3, %v3112_v42  ;;  %v5522_v48 = vsel %vm381_vm2, %v5519_v34, %v5521_v35  ;;  %5569 = vst.msk [vmem:[#allocation3 + $0xda] sm:$0xff] %vm426_vm3, %v5520_v58  ;;  %v5438_v3 = vadd.f32 %v14445_v41, %v14394_v13  ;;  %v14512_v45 = vrot.slane %v2955_v36, 5  ;;  %v2936_v52 = vmax.f32 %v2934_v40, 0.0 }
 0x23f   : > { %5570 = vst.msk [vmem:[#allocation3 + $0xe2] sm:$0xff] %vm426_vm3, %v5522_v48  ;;  %v5421_v26 = vmax.f32 %v5419_v50, 0.0  ;;  %v2954_v53 = vadd.f32 %v14394_v13, %v2819_v44  ;;  %v2975_v54 = vmax.f32 %v2973_v49, 0.0  ;;  %v5437_v57 = vadd.f32 %v14394_v13, %v14447_v46 }
 0x240   : > { %v14515_v56 = vmax.f32 %v5438_v3, 0.0  ;;  %v5459_v59 = vadd.f32 %v12423_v33, %v14394_v13  ;;  %v14520_v60 = vpop.f32.mrb[14].mxu0  ;;  %v2945_v61 = vrot.slane %v2936_v52, 3  ;;  %v2949_v41 = vrot.slane %v2936_v52, 1 }
 0x241   : > { %v2957_v63 = vrot.slane %v2936_v52, 7  ;;  %v2962_v39 = vrot.slane %v2936_v52, 5  ;;  %v14522_v0 = vpop.f32.mrb[15].mxu0  ;;  %v5427_v1 = vrot.slane %v5421_v26, 7  ;;  %v5432_v6 = vrot.slane %v5421_v26, 5 }
 0x242   : > { %v2978_v4 = vrot.slane %v2975_v54, 1  ;;  %v14524_v44 = vrot.slane %v2975_v54, 7  ;;  %v14526_v7 = vld [vmem:[#allocation3 + $0x24] sm:$0xff]  ;;  %v2946_v46 = vsel %vm2941_vm7, %v14449_v51, %v2945_v61  ;;  %v2952_v33 = vsel %vm233_vm1, %v2945_v61, %v2949_v41 }
 0x243   : > { %v2964_v8 = vsel %vm2961_vm8, %v2962_v39, %v14512_v45  ;;  %v5450_v9 = vrot.slane %v14515_v56, 1  ;;  %5584 = vst.msk [vmem:[#allocation3] sm:$0xff] %vm426_vm3, %v14526_v7  ;;  %v3064_v15 = vrot.slane %v2946_v46, 4  ;;  %v3066_v16 = vrot.slane %v2952_v33, 4 }
 0x244   : > { %v2971_v10 = vsel %vm233_vm1, %v2957_v63, %v2964_v8  ;;  %v5428_v24 = vsel %vm233_vm1, %v14455_v55, %v5427_v1  ;;  %v14539_v14 = vpop.f32.mrb[16].mxu0  ;;  %v2989_v2 = vsel %vm233_vm1, %v2978_v4, %v14524_v44  ;;  %v5454_v17 = vrot.slane %v14515_v56, 7 }
 0x245   : > { %v3073_v51 = vrot.slane %v2971_v10, 2  ;;  %5572 = vst.msk [vmem:[#allocation3 + $0xf2] sm:$0xff] %vm426_vm3, %v5428_v24  ;;  %v2991_v18 = vadd.f32 %v14473_v37, %v14394_v13  ;;  %v14547_v20 = vpop.f32.mrb[17].mxu0  ;;  %v14549_v21 = vld [vmem:[#allocation3 + $0x2c] sm:$0xff]  ;;  %v5583_v23 = vld [vmem:[#allocation3 + $0x34] sm:$0x3]  ;;  %v3065_v29 = vsel %vm370_vm0, %v3063_v32, %v3064_v15  ;;  %v3067_v30 = vsel %vm370_vm0, %v3064_v15, %v3066_v16 }
 0x246   : > { %v5443_v28 = vrot.slane %v5439_v47, 3  ;;  %v5447_v55 = vrot.slane %v5439_v47, 1  ;;  %3126 = vst.msk [vmem:[#allocation3 + $0x5a] sm:$0xff] %vm426_vm3, %v2989_v2  ;;  %5585 = vst.msk [vmem:[#allocation3 + $0x8] sm:$0xff] %vm426_vm3, %v14549_v21  ;;  %v5457_v31 = vsel %vm233_vm1, %v5450_v9, %v5454_v17  ;;  %v2956_v62 = vmax.f32 %v2954_v53, 0.0 }
 0x247   : > { %5586 = vst.msk [vmem:[#allocation3 + $0x10] sm:$0x3] %vm659_vm5, %v5583_v23  ;;  %v3113_v37 = vsel %vm381_vm2, %v3067_v30, %v3073_v51  ;;  %v5440_v22 = vmax.f32 %v5437_v57, 0.0  ;;  %v5435_v32 = vsel %vm233_vm1, %v5427_v1, %v5432_v6  ;;  %v5462_v34 = vrot.slane %v14515_v56, 5  ;;  %v14595_v24 = vld [vmem:[%s15407_s3 + $0x8] sm:$0xf] }
 0x248   : > { %3122 = vst.msk [vmem:[#allocation3 + $0x3a] sm:$0xff] %vm426_vm3, %v3065_v29  ;;  %3123 = vst.msk [vmem:[#allocation3 + $0x42] sm:$0xff] %vm426_vm3, %v3113_v37  ;;  %v5531_v35 = vrot.slane %v5457_v31, 6  ;;  %v14563_v36 = vmax.f32 %v5459_v59, 0.0  ;;  %v2965_v42 = vrot.slane %v2956_v62, 5  ;;  %v2969_v58 = vrot.slane %v2956_v62, 3 }
 0x249   : > { %v5448_v40 = vrot.slane %v5440_v22, 1  ;;  %v2994_v50 = vmax.f32 %v2991_v18, 0.0  ;;  %v2974_v49 = vadd.f32 %v14394_v13, %v14481_v25  ;;  %v5458_v3 = vadd.f32 %v14394_v13, %v14462_v5  ;;  %v5615_v37 = vld [vmem:[#allocation3 + $0x19] sm:$0xff] }
 0x24a   : > { %v5469_v48 = vrot.slane %v14563_v36, 3  ;;  %v5473_v47 = vrot.slane %v14563_v36, 1  ;;  %v2966_v52 = vsel %vm2961_vm8, %v14512_v45, %v2965_v42  ;;  %v2972_v26 = vsel %vm233_vm1, %v2965_v42, %v2969_v58 }
 0x24b   : > { %v5449_v53 = vsel %vm2921_vm6, %v5447_v55, %v5448_v40  ;;  %v5451_v54 = vsel %vm2921_vm6, %v5448_v40, %v5450_v9  ;;  %v3074_v57 = vrot.slane %v2966_v52, 2  ;;  %v3076_v59 = vrot.slane %v2972_v26, 2 }
 0x24c   : > { %v5456_v61 = vsel %vm233_vm1, %v5443_v28, %v5449_v53  ;;  %v5529_v41 = vrot.slane %v5451_v54, 6  ;;  %v5466_v63 = vrot.slane %v14515_v56, 3  ;;  %v14578_v39 = vrot.slane %v2994_v50, 3  ;;  %v5618_v54 = vld [vmem:[#allocation3 + $0x31] sm:$0xff] }
 0x24d   : > { %v5528_v25 = vrot.slane %v5456_v61, 6  ;;  %v14580_v5 = vrot.slane %v2994_v50, 1  ;;  %v5612_v1 = vld [vmem:[#allocation3 + $0x1] sm:$0xff]  ;;  %v3075_v6 = vsel %vm381_vm2, %v3073_v51, %v3074_v57  ;;  %v3077_v4 = vsel %vm381_vm2, %v3074_v57, %v3076_v59 }
 0x24e   : > { %v5613_v45 = vld [vmem:[#allocation3 + $0x9] sm:$0xff]  ;;  %v5532_v46 = vsel %vm359_vm4, %v5529_v41, %v5531_v35  ;;  %v5476_v33 = vsel %vm233_vm1, %v5469_v48, %v5473_v47  ;;  %12429 = vmatprep.mubr.msk.f32.mxu0 %vm426_vm3, %v5612_v1  ;;  %3124 = vst.msk [vmem:[#allocation3 + $0x4a] sm:$0xff] %vm426_vm3, %v3075_v6  ;;  %3125 = vst.msk [vmem:[#allocation3 + $0x52] sm:$0xff] %vm426_vm3, %v3077_v4  ;;  %v2976_v10 = vmax.f32 %v2974_v49, 0.0  ;;  %v5460_v15 = vmax.f32 %v5458_v3, 0.0  ;;  %v5614_v16 = vld [vmem:[#allocation3 + $0x11] sm:$0xff] }
 0x24f   : > { %v5530_v8 = vsel %vm359_vm4, %v5528_v25, %v5529_v41  ;;  %v5559_v9 = vsel %vm359_vm4, %v5435_v32, %v5528_v25  ;;  %12430 = vmatmul.mubr.msk.f32.vlgmr.msra.gmra.mrb[18].mxu0 %vm426_vm3, %v5613_v45  ;;  %v2993_v51 = vadd.f32 %v14496_v38, %v14394_v13  ;;  %v5478_v2 = vadd.f32 %v14475_v19, %v14394_v13  ;;  %v5617_v3 = vld [vmem:[#allocation3 + $0x29] sm:$0xff] }
 0x250   : > { %5573 = vst.msk [vmem:[#allocation3 + $0xfa] sm:$0xff] %vm426_vm3, %v5559_v9  ;;  %5574 = vst.msk [vmem:[#allocation3 + $0x102] sm:$0xff] %vm426_vm3, %v5530_v8  ;;  %v2992_v17 = vadd.f32 %v14394_v13, %v14503_v43  ;;  %v5477_v18 = vadd.f32 %v14394_v13, %v14483_v27  ;;  %12432 = vmatprep.mubr.msk.f32.mxu0 %vm426_vm3, %v5614_v16  ;;  %v5481_v23 = vrot.slane %v14563_v36, 7  ;;  %v5541_v28 = vrot.slane %v5476_v33, 4 }
 0x251   : > { %v2982_v55 = vrot.slane %v2976_v10, 7  ;;  %v5467_v29 = vrot.slane %v5460_v15, 3  ;;  %12457 = vmatpush3.msk.msra.mxu0 %vm370_vm0, %v14380_v11  ;;  %v14611_v38 = vmax.f32 %v2993_v51, 0.0  ;;  %v5480_v30 = vmax.f32 %v5478_v2, 0.0  ;;  %v5616_v11 = vld [vmem:[#allocation3 + $0x21] sm:$0xff] }
 0x252   : > { %v2995_v19 = vmax.f32 %v2992_v17, 0.0  ;;  %v3014_v43 = vadd.f32 %v14520_v60, %v14394_v13  ;;  %12485 = vmatprep.subr.msk.mxu0 %vm370_vm0, %v14595_v24  ;;  %v5479_v22 = vmax.f32 %v5477_v18, 0.0  ;;  %v2987_v58 = vrot.slane %v2976_v10, 5  ;;  %v5620_v10 = vld [vmem:[#allocation3 + $0x41] sm:$0xff] }
 0x253   : > { %v2983_v27 = vsel %vm233_vm1, %v14524_v44, %v2982_v55  ;;  %v5468_v31 = vsel %vm2941_vm7, %v5466_v63, %v5467_v29  ;;  %v5470_v62 = vsel %vm2941_vm7, %v5467_v29, %v5469_v48  ;;  %12433 = vmatmul.mubr.msk.f32.gmra.mrb[20].mxu0 %vm426_vm3, %v5615_v37  ;;  %v3005_v35 = vrot.slane %v14611_v38, 1 }
 0x254   : > { %3127 = vst.msk [vmem:[#allocation3 + $0x62] sm:$0xff] %vm426_vm3, %v2983_v27  ;;  %v5475_v60 = vsel %vm233_vm1, %v5462_v34, %v5468_v31  ;;  %v5539_v32 = vrot.slane %v5470_v62, 4  ;;  %v3009_v42 = vrot.slane %v14611_v38, 7  ;;  %12435 = vmatprep.mubr.msk.f32.mxu0 %vm426_vm3, %v5616_v11  ;;  %v5485_v44 = vrot.slane %v14563_v36, 5 }
 0x255   : > { %v5538_v40 = vrot.slane %v5475_v60, 4  ;;  %v5488_v50 = vrot.slane %v5480_v30, 5  ;;  %v5492_v49 = vrot.slane %v5480_v30, 3  ;;  %v3003_v56 = vrot.slane %v2995_v19, 1  ;;  %v5621_v29 = vld [vmem:[#allocation3 + $0x49] sm:$0xff]  ;;  %v5622_v30 = vld [vmem:[#allocation3 + $0x51] sm:$0xff] }
 0x256   : > { %v5542_v48 = vsel %vm370_vm0, %v5539_v32, %v5541_v28  ;;  %v3012_v47 = vsel %vm233_vm1, %v3005_v35, %v3009_v42  ;;  %v5486_v53 = vrot.slane %v5479_v22, 5  ;;  %v14641_v61 = vmax.f32 %v3014_v43, 0.0 }
 0x257   : > { %v5540_v34 = vsel %vm370_vm0, %v5538_v40, %v5539_v32  ;;  %v5560_v52 = vsel %vm370_vm0, %v5532_v46, %v5538_v40  ;;  %v3086_v26 = vrot.slane %v3012_v47, 6  ;;  %12436 = vmatmul.mubr.msk.f32.gmra.mrb[22].mxu0 %vm426_vm3, %v5617_v3  ;;  %v5495_v36 = vsel %vm233_vm1, %v5488_v50, %v5492_v49  ;;  %v5619_v46 = vld [vmem:[#allocation3 + $0x39] sm:$0xff] }
 0x258   : > { %5575 = vst.msk [vmem:[#allocation3 + $0x10a] sm:$0xff] %vm426_vm3, %v5560_v52  ;;  %5576 = vst.msk [vmem:[#allocation3 + $0x112] sm:$0xff] %vm426_vm3, %v5540_v34  ;;  %v3004_v57 = vsel %vm2921_vm6, %v14580_v5, %v3003_v56  ;;  %v3006_v59 = vsel %vm2921_vm6, %v3003_v56, %v3005_v35  ;;  %12438 = vmatprep.mubr.msk.f32.mxu0 %vm426_vm3, %v5618_v54  ;;  %v5551_v41 = vrot.slane %v5495_v36, 2  ;;  %v3024_v16 = vrot.slane %v14641_v61, 3 }
 0x259   : > { %v3011_v63 = vsel %vm233_vm1, %v14578_v39, %v3004_v57  ;;  %v3084_v25 = vrot.slane %v3006_v59, 6  ;;  %v5487_v1 = vsel %vm2961_vm8, %v5485_v44, %v5486_v53  ;;  %v5489_v6 = vsel %vm2961_vm8, %v5486_v53, %v5488_v50 }
 0x25a   : > { %v3083_v45 = vrot.slane %v3011_v63, 6  ;;  %v5494_v4 = vsel %vm233_vm1, %v5481_v23, %v5487_v1  ;;  %v2990_v5 = vsel %vm233_vm1, %v2982_v55, %v2987_v58  ;;  %v5549_v9 = vrot.slane %v5489_v6, 2 }
 0x25b   : > { %v3087_v33 = vsel %vm359_vm4, %v3084_v25, %v3086_v26  ;;  %v5548_v8 = vrot.slane %v5494_v4, 2  ;;  %12439 = vmatmul.mubr.msk.f32.gmra.mrb[24].mxu0 %vm426_vm3, %v5619_v46  ;;  %v3028_v51 = vrot.slane %v14641_v61, 1  ;;  %v3013_v23 = vadd.f32 %v14394_v13, %v14522_v0  ;;  %v5624_v42 = vld [vmem:[#allocation3 + $0x61] sm:$0xff] }
 0x25c   : > { %v3085_v39 = vsel %vm359_vm4, %v3083_v45, %v3084_v25  ;;  %v3114_v15 = vsel %vm359_vm4, %v2990_v5, %v3083_v45  ;;  %12441 = vmatprep.mubr.msk.f32.mxu0 %vm426_vm3, %v5620_v10  ;;  %v5552_v17 = vsel %vm381_vm2, %v5549_v9, %v5551_v41  ;;  %v3033_v28 = vadd.f32 %v14539_v14, %v14394_v13  ;;  %v14715_v46 = vld [vmem:[%s15407_s3 + $0x8] sm:$0xf]  ;;  %v7995_v10 = vld [vmem:[#allocation3 + $0xb1] sm:$0xff] }
 0x25d   : > { %3128 = vst.msk [vmem:[#allocation3 + $0x6a] sm:$0xff] %vm426_vm3, %v3114_v15  ;;  %3129 = vst.msk [vmem:[#allocation3 + $0x72] sm:$0xff] %vm426_vm3, %v3085_v39  ;;  %v5550_v2 = vsel %vm381_vm2, %v5548_v8, %v5549_v9  ;;  %v5561_v18 = vsel %vm381_vm2, %v5542_v48, %v5548_v8  ;;  %v3032_v55 = vadd.f32 %v14394_v13, %v14547_v20  ;;  %v3015_v43 = vmax.f32 %v3013_v23, 0.0  ;;  %v5623_v13 = vld [vmem:[#allocation3 + $0x59] sm:$0xff]  ;;  %v7994_v9 = vld [vmem:[#allocation3 + $0xa9] sm:$0xff] }
 0x25e   : > { %5577 = vst.msk [vmem:[#allocation3 + $0x11a] sm:$0xff] %vm426_vm3, %v5561_v18  ;;  %5578 = vst.msk [vmem:[#allocation3 + $0x122] sm:$0xff] %vm426_vm3, %v5550_v2  ;;  %v3031_v19 = vsel %vm233_vm1, %v3024_v16, %v3028_v51  ;;  %v3035_v37 = vmax.f32 %v3033_v28, 0.0  ;;  %v3021_v31 = vrot.slane %v14611_v38, 3  ;;  %v3040_v0 = vrot.slane %v14641_v61, 5  ;;  %v5593_v8 = vld [vmem:[#allocation3] sm:$0xff] }
 0x25f   : > { %5579 = vst.msk [vmem:[#allocation3 + $0x12a] sm:$0xff] %vm426_vm3, %v5552_v17  ;;  %12442 = vmatmul.mubr.msk.f32.gmra.mrb[26].mxu0 %vm426_vm3, %v5621_v29  ;;  %v3034_v27 = vmax.f32 %v3032_v55, 0.0  ;;  %v3022_v62 = vrot.slane %v3015_v43, 3  ;;  %v14676_v20 = vld [vmem:[#allocation3 + $0x10e] sm:$0xff]  ;;  %v3017_v60 = vrot.slane %v14611_v38, 5  ;;  %v3036_v32 = vrot.slane %v14641_v61, 7 }
 0x260   : > { %12444 = vmatprep.mubr.msk.f32.mxu0 %vm426_vm3, %v5622_v30  ;;  %v3043_v14 = vrot.slane %v3035_v37, 5  ;;  %v3047_v22 = vrot.slane %v3035_v37, 3  ;;  %v3096_v35 = vrot.slane %v3031_v19, 4  ;;  %5590 = vst.msk [vmem:[#allocation3 + $0x132] sm:$0xff] %vm426_vm3, %v14676_v20  ;;  %v5594_v39 = vld [vmem:[#allocation3 + $0x8] sm:$0xff]  ;;  %v5595_v15 = vld [vmem:[#allocation3 + $0x10] sm:$0xff] }
 0x261   : > { %v3041_v11 = vrot.slane %v3034_v27, 5  ;;  %v3023_v44 = vsel %vm2941_vm7, %v3021_v31, %v3022_v62  ;;  %v3025_v58 = vsel %vm2941_vm7, %v3022_v62, %v3024_v16  ;;  %v7996_v16 = vld [vmem:[#allocation3 + $0xb9] sm:$0xff]  ;;  %v7997_v51 = vld [vmem:[#allocation3 + $0xc1] sm:$0xff]  ;;  %v7998_v18 = vld [vmem:[#allocation3 + $0xc9] sm:$0xff] }
 0x262   : > { %v3050_v40 = vsel %vm233_vm1, %v3043_v14, %v3047_v22  ;;  %v3030_v38 = vsel %vm233_vm1, %v3017_v60, %v3023_v44  ;;  %v3094_v48 = vrot.slane %v3025_v58, 4  ;;  %v5596_v2 = vld [vmem:[#allocation3 + $0x18] sm:$0xff]  ;;  %v5597_v17 = vld [vmem:[#allocation3 + $0x20] sm:$0xff]  ;;  %v5599_v28 = vld [vmem:[#allocation3 + $0x30] sm:$0xff] }
 0x263   : > { %12445 = vmatmul.mubr.msk.f32.gmra.mrb[28].mxu0 %vm426_vm3, %v5623_v13  ;;  %v3042_v50 = vsel %vm2961_vm8, %v3040_v0, %v3041_v11  ;;  %v3106_v47 = vrot.slane %v3050_v40, 2  ;;  %v3044_v49 = vsel %vm2961_vm8, %v3041_v11, %v3043_v14  ;;  %v3093_v56 = vrot.slane %v3030_v38, 4  ;;  %v7999_v23 = vld [vmem:[#allocation3 + $0xd1] sm:$0xff]  ;;  %v8000_v55 = vld [vmem:[#allocation3 + $0xd9] sm:$0xff]  ;;  %v8001_v29 = vld [vmem:[#allocation3 + $0xe1] sm:$0xff] }
 0x264   : > { %12447 = vmatprep.mubr.msk.f32.mxu0 %vm426_vm3, %v5624_v42  ;;  %v3049_v3 = vsel %vm233_vm1, %v3036_v32, %v3042_v50  ;;  %v3104_v34 = vrot.slane %v3044_v49, 2  ;;  %v5625_v52 = vld [vmem:[#allocation3 + $0x69] sm:$0xff]  ;;  %v3097_v26 = vsel %vm370_vm0, %v3094_v48, %v3096_v35  ;;  %v5626_v54 = vld [vmem:[#allocation3 + $0x71] sm:$0xff]  ;;  %v5601_v19 = vld [vmem:[#allocation3 + $0x40] sm:$0xff] }
 0x265   : > { %v3103_v53 = vrot.slane %v3049_v3, 2  ;;  %v3095_v36 = vsel %vm370_vm0, %v3093_v56, %v3094_v48  ;;  %v3115_v57 = vsel %vm370_vm0, %v3087_v33, %v3093_v56  ;;  %v14704_v63 = vld [vmem:[#allocation3 + $0x116] sm:$0xff]  ;;  %v5589_v25 = vld [vmem:[#allocation3 + $0x11e] sm:$0x3]  ;;  %v8002_v43 = vld [vmem:[#allocation3 + $0xe9] sm:$0xff] }
 0x266   : > { %v3107_v59 = vsel %vm381_vm2, %v3104_v34, %v3106_v47  ;;  %3130 = vst.msk [vmem:[#allocation3 + $0x7a] sm:$0xff] %vm426_vm3, %v3115_v57  ;;  %3131 = vst.msk [vmem:[#allocation3 + $0x82] sm:$0xff] %vm426_vm3, %v3095_v36  ;;  %v5600_v30 = vld [vmem:[#allocation3 + $0x38] sm:$0xff]  ;;  %v5602_v27 = vld [vmem:[#allocation3 + $0x48] sm:$0xff] }
 0x267   : > { %12448 = vmatmul.mubr.msk.f32.gmra.mrb[30].mxu0 %vm426_vm3, %v5625_v52  ;;  %v3105_v61 = vsel %vm381_vm2, %v3103_v53, %v3104_v34  ;;  %v3116_v41 = vsel %vm381_vm2, %v3097_v26, %v3103_v53  ;;  %3134 = vst.msk [vmem:[#allocation3 + $0x9a] sm:$0xff] %vm426_vm3, %v3107_v59  ;;  %5591 = vst.msk [vmem:[#allocation3 + $0x13a] sm:$0xff] %vm426_vm3, %v14704_v63  ;;  %v8003_v37 = vld [vmem:[#allocation3 + $0xf1] sm:$0xff]  ;;  %v8004_v0 = vld [vmem:[#allocation3 + $0xf9] sm:$0xff] }
 0x268   : > { %12450 = vmatprep.mubr.msk.f32.mxu0 %vm426_vm3, %v5626_v54  ;;  %3132 = vst.msk [vmem:[#allocation3 + $0x8a] sm:$0xff] %vm426_vm3, %v3116_v41  ;;  %3133 = vst.msk [vmem:[#allocation3 + $0x92] sm:$0xff] %vm426_vm3, %v3105_v61  ;;  %v5603_v31 = vld [vmem:[#allocation3 + $0x50] sm:$0xff]  ;;  %v8005_v62 = vld [vmem:[#allocation3 + $0x101] sm:$0xff] }
 0x269   : > { %5592 = vst.msk [vmem:[#allocation3 + $0x142] sm:$0x3] %vm659_vm5, %v5589_v25  ;;  %v5604_v14 = vld [vmem:[#allocation3 + $0x58] sm:$0xff]  ;;  %v5605_v22 = vld [vmem:[#allocation3 + $0x60] sm:$0xff]  ;;  %v8006_v11 = vld [vmem:[#allocation3 + $0x109] sm:$0xff] }
 0x26a   : > { %v8007_v13 = vld [vmem:[#allocation3 + $0x111] sm:$0xff]  ;;  %v5606_v60 = vld [vmem:[#allocation3 + $0x68] sm:$0xff]  ;;  %v8008_v35 = vld [vmem:[#allocation3 + $0x119] sm:$0xff] }
 0x26b   : > { %v5607_v32 = vld [vmem:[#allocation3 + $0x70] sm:$0xff]  ;;  %v14769_v50 = vld [vmem:[%s15407_s3 + $0xc] sm:$0xf]  ;;  %v7975_v49 = vld [vmem:[#allocation3 + $0xa8] sm:$0xff] }
 0x26c   : > { %v6056_v47 = vld [vmem:[#allocation3 + $0x2] sm:$0xff]  ;;  %v7976_v56 = vld [vmem:[#allocation3 + $0xb0] sm:$0xff]  ;;  %v7977_v26 = vld [vmem:[#allocation3 + $0xb8] sm:$0xff] }
 0x26d   : > { %v5627_v1 = vld [vmem:[#allocation3 + $0x79] sm:$0xff]  ;;  %v5628_v4 = vld [vmem:[#allocation3 + $0x81] sm:$0xff]  ;;  %v6057_v3 = vld [vmem:[#allocation3 + $0xa] sm:$0xff] }
 0x26e   : > { %12451 = vmatmul.mubr.msk.f32.gmra.mrb[32].mxu0 %vm426_vm3, %v5627_v1  ;;  %v7993_v5 = vld [vmem:[#allocation3 + $0xa1] sm:$0xff]  ;;  %v5608_v44 = vld [vmem:[#allocation3 + $0x78] sm:$0xff]  ;;  %v7980_v59 = vld [vmem:[#allocation3 + $0xd0] sm:$0xff] }
 0x26f   : > { %v7991_v45 = vld [vmem:[#allocation3 + $0x91] sm:$0xff]  ;;  %v7992_v6 = vld [vmem:[#allocation3 + $0x99] sm:$0xff]  ;;  %12453 = vmatprep.mubr.msk.f32.mxu0 %vm426_vm3, %v5628_v4  ;;  %v5629_v33 = vld [vmem:[#allocation3 + $0x89] sm:$0xff] }
 0x270   : > { %12690 = vmatprep.mubr.msk.f32.mxu1 %vm426_vm3, %v7991_v45  ;;  %v7972_v42 = vld [vmem:[#allocation3 + $0x90] sm:$0xff]  ;;  %v5609_v58 = vld [vmem:[#allocation3 + $0x80] sm:$0xff]  ;;  %v7973_v40 = vld [vmem:[#allocation3 + $0x98] sm:$0xff] }
 0x271   : > { %12691 = vmatmul.mubr.msk.f32.vlgmr.msra.gmra.mrb[18].mxu1 %vm426_vm3, %v7992_v6  ;;  %v7974_v38 = vld [vmem:[#allocation3 + $0xa0] sm:$0xff]  ;;  %v5610_v48 = vld [vmem:[#allocation3 + $0x88] sm:$0xff]  ;;  %v14787_v52 = vld [vmem:[#allocation3 + $0x12] sm:$0xff] }
 0x272   : > { %12718 = vmatpush3.msk.msra.mxu1 %vm370_vm0, %v14387_v12  ;;  %12693 = vmatprep.mubr.msk.f32.mxu1 %vm426_vm3, %v7993_v5  ;;  %v14730_v12 = vld [vmem:[%s15407_s3 + $0xc] sm:$0xf]  ;;  %v14784_v34 = vld [vmem:[%s15407_s3 + $0x10] sm:$0xf]  ;;  %v14797_v54 = vld [vmem:[#allocation3 + $0x1a] sm:$0xff] }
 0x273   : > { %12454 = vmatmul.mubr.msk.f32.gmra.mrb[34].mxu0 %vm426_vm3, %v5629_v33  ;;  %12746 = vmatprep.subr.msk.mxu1 %vm370_vm0, %v14715_v46  ;;  %v7978_v53 = vld [vmem:[#allocation3 + $0xc0] sm:$0xff]  ;;  %v7979_v57 = vld [vmem:[#allocation3 + $0xc8] sm:$0xff]  ;;  %v14811_v41 = vld [vmem:[#allocation3 + $0x32] sm:$0xff] }
 0x274   : > { %12458 = vmatprep.mubr.msk.f32.mxu0 %vm426_vm3, %v5593_v8  ;;  %v14801_v36 = vld [vmem:[#allocation3 + $0x22] sm:$0xff]  ;;  %v14807_v61 = vld [vmem:[#allocation3 + $0x2a] sm:$0xff]  ;;  %v7981_v25 = vld [vmem:[#allocation3 + $0xd8] sm:$0xff] }
 0x275   : > { %12694 = vmatmul.mubr.msk.f32.gmra.mrb[20].mxu1 %vm426_vm3, %v7994_v9  ;;  %v7982_v1 = vld [vmem:[#allocation3 + $0xe0] sm:$0xff]  ;;  %v7983_v4 = vld [vmem:[#allocation3 + $0xe8] sm:$0xff]  ;;  %v14831_v33 = vld [vmem:[#allocation3 + $0x52] sm:$0xff] }
 0x276   : > { %12696 = vmatprep.mubr.msk.f32.mxu1 %vm426_vm3, %v7995_v10  ;;  %v14817_v45 = vld [vmem:[#allocation3 + $0x3a] sm:$0xff]  ;;  %v14821_v6 = vld [vmem:[#allocation3 + $0x42] sm:$0xff]  ;;  %v14827_v5 = vld [vmem:[#allocation3 + $0x4a] sm:$0xff] }
 0x277   : > { %12459 = vmatmul.mubr.msk.f32.vlgmr.msra.gmra.mrb[18].mxu0 %vm426_vm3, %v5594_v39  ;;  %v7985_v8 = vld [vmem:[#allocation3 + $0xf8] sm:$0xff]  ;;  %v7986_v9 = vld [vmem:[#allocation3 + $0x100] sm:$0xff] }
 0x278   : > { %12461 = vmatprep.mubr.msk.f32.mxu0 %vm426_vm3, %v5595_v15  ;;  %12486 = vmatpush3.msk.msra.mxu0 %vm370_vm0, %v14595_v24  ;;  %v5598_v24 = vld [vmem:[#allocation3 + $0x28] sm:$0xff]  ;;  %v6067_v10 = vld [vmem:[#allocation3 + $0x5a] sm:$0xff]  ;;  %v7988_v15 = vld [vmem:[#allocation3 + $0x110] sm:$0xff] }
 0x279   : > { %12697 = vmatmul.mubr.msk.f32.gmra.mrb[22].mxu1 %vm426_vm3, %v7996_v16  ;;  %12514 = vmatprep.subr.msk.mxu0 %vm370_vm0, %v14730_v12  ;;  %v6068_v39 = vld [vmem:[#allocation3 + $0x62] sm:$0xff]  ;;  %v6069_v16 = vld [vmem:[#allocation3 + $0x6a] sm:$0xff] }
 0x27a   : > { %12699 = vmatprep.mubr.msk.f32.mxu1 %vm426_vm3, %v7997_v51  ;;  %v6070_v51 = vld [vmem:[#allocation3 + $0x72] sm:$0xff] }
 0x27b   : > { %12462 = vmatmul.mubr.msk.f32.gmra.mrb[20].mxu0 %vm426_vm3, %v5596_v2  ;;  %v7989_v2 = vld [vmem:[#allocation3 + $0x118] sm:$0xff] }
 0x27c   : > { %12464 = vmatprep.mubr.msk.f32.mxu0 %vm426_vm3, %v5597_v17  ;;  %v14844_v17 = vld [vmem:[#allocation3 + $0x92] sm:$0xff] }
 0x27d   : > { %12700 = vmatmul.mubr.msk.f32.gmra.mrb[24].mxu1 %vm426_vm3, %v7998_v18  ;;  %v6071_v18 = vld [vmem:[#allocation3 + $0x7a] sm:$0xff] }
 0x27e   : > { %12702 = vmatprep.mubr.msk.f32.mxu1 %vm426_vm3, %v7999_v23  ;;  %v6072_v23 = vld [vmem:[#allocation3 + $0x82] sm:$0xff] }
 0x27f   : > { %12465 = vmatmul.mubr.msk.f32.gmra.mrb[22].mxu0 %vm426_vm3, %v5598_v24  ;;  %v14849_v24 = vld [vmem:[#allocation3 + $0x9a] sm:$0xff] }
 0x280   : > { %12467 = vmatprep.mubr.msk.f32.mxu0 %vm426_vm3, %v5599_v28  ;;  %v11079_v28 = vld [vmem:[%s15407_s3 + $0x10] sm:$0xf] }
 0x281   : > { %12703 = vmatmul.mubr.msk.f32.gmra.mrb[26].mxu1 %vm426_vm3, %v8000_v55  ;;  %v8436_v55 = vld [vmem:[#allocation3 + $0xa2] sm:$0xff] }
 0x282   : > { %12705 = vmatprep.mubr.msk.f32.mxu1 %vm426_vm3, %v8001_v29  ;;  %v6073_v29 = vld [vmem:[#allocation3 + $0x8a] sm:$0xff] }
 0x283   : > { %12468 = vmatmul.mubr.msk.f32.gmra.mrb[24].mxu0 %vm426_vm3, %v5600_v30  ;;  %v8437_v30 = vld [vmem:[#allocation3 + $0xaa] sm:$0xff] }
 0x284   : > { %12470 = vmatprep.mubr.msk.f32.mxu0 %vm426_vm3, %v5601_v19  ;;  %v8438_v19 = vld [vmem:[#allocation3 + $0xb2] sm:$0xff] }
 0x285   : > { %12706 = vmatmul.mubr.msk.f32.gmra.mrb[28].mxu1 %vm426_vm3, %v8002_v43  ;;  %v10885_v43 = vld [vmem:[%s15407_s3 + $0x14] sm:$0xf] }
 0x286   : > { %12708 = vmatprep.mubr.msk.f32.mxu1 %vm426_vm3, %v8003_v37  ;;  %v8439_v37 = vld [vmem:[#allocation3 + $0xba] sm:$0xff] }
 0x287   : > { %12471 = vmatmul.mubr.msk.f32.gmra.mrb[26].mxu0 %vm426_vm3, %v5602_v27  ;;  %v8440_v27 = vld [vmem:[#allocation3 + $0xc2] sm:$0xff] }
 0x288   : > { %12473 = vmatprep.mubr.msk.f32.mxu0 %vm426_vm3, %v5603_v31  ;;  %v8441_v31 = vld [vmem:[#allocation3 + $0xca] sm:$0xff] }
 0x289   : > { %12709 = vmatmul.mubr.msk.f32.gmra.mrb[30].mxu1 %vm426_vm3, %v8004_v0  ;;  %v8442_v0 = vld [vmem:[#allocation3 + $0xd2] sm:$0xff] }
 0x28a   : > { %12711 = vmatprep.mubr.msk.f32.mxu1 %vm426_vm3, %v8005_v62  ;;  %v8443_v62 = vld [vmem:[#allocation3 + $0xda] sm:$0xff] }
 0x28b   : > { %12474 = vmatmul.mubr.msk.f32.gmra.mrb[28].mxu0 %vm426_vm3, %v5604_v14  ;;  %v8444_v14 = vld [vmem:[#allocation3 + $0xe2] sm:$0xff] }
 0x28c   : > { %12476 = vmatprep.mubr.msk.f32.mxu0 %vm426_vm3, %v5605_v22  ;;  %v8445_v22 = vld [vmem:[#allocation3 + $0xea] sm:$0xff] }
 0x28d   : > { %12712 = vmatmul.mubr.msk.f32.gmra.mrb[32].mxu1 %vm426_vm3, %v8006_v11  ;;  %v8446_v11 = vld [vmem:[#allocation3 + $0xf2] sm:$0xff] }
 0x28e   : > { %12714 = vmatprep.mubr.msk.f32.mxu1 %vm426_vm3, %v8007_v13  ;;  %v8447_v13 = vld [vmem:[#allocation3 + $0xfa] sm:$0xff] }
 0x28f   : > { %12477 = vmatmul.mubr.msk.f32.gmra.mrb[30].mxu0 %vm426_vm3, %v5606_v60  ;;  %v8448_v60 = vld [vmem:[#allocation3 + $0x102] sm:$0xff] }
 0x290   : > { %12479 = vmatprep.mubr.msk.f32.mxu0 %vm426_vm3, %v5607_v32  ;;  %v8449_v32 = vld [vmem:[#allocation3 + $0x10a] sm:$0xff] }
 0x291   : > { %12715 = vmatmul.mubr.msk.f32.gmra.mrb[34].mxu1 %vm426_vm3, %v8008_v35  ;;  %v8450_v35 = vld [vmem:[#allocation3 + $0x112] sm:$0xff] }
 0x292   : > { %12719 = vmatprep.mubr.msk.f32.mxu1 %vm426_vm3, %v7972_v42  ;;  %v8451_v42 = vld [vmem:[#allocation3 + $0x11a] sm:$0xff] }
 0x293   : > { %12480 = vmatmul.mubr.msk.f32.gmra.mrb[32].mxu0 %vm426_vm3, %v5608_v44  ;;  %v14914_v44 = vld [vmem:[%s15407_s3 + $0x14] sm:$0xf] }
 0x294   : > { %12482 = vmatprep.mubr.msk.f32.mxu0 %vm426_vm3, %v5609_v58  ;;  %v6556_v58 = vld [vmem:[#allocation3 + $0x13] sm:$0xff] }
 0x295   : > { %12720 = vmatmul.mubr.msk.f32.vlgmr.msra.gmra.mrb[18].mxu1 %vm426_vm3, %v7973_v40  ;;  %v6557_v40 = vld [vmem:[#allocation3 + $0x1b] sm:$0xff] }
 0x296   : > { %12747 = vmatpush3.msk.msra.mxu1 %vm370_vm0, %v14715_v46  ;;  %12722 = vmatprep.mubr.msk.f32.mxu1 %vm426_vm3, %v7974_v38  ;;  %v7984_v46 = vld [vmem:[#allocation3 + $0xf0] sm:$0xff]  ;;  %v6558_v38 = vld [vmem:[#allocation3 + $0x23] sm:$0xff] }
 0x297   : > { %12483 = vmatmul.mubr.msk.f32.gmra.mrb[34].mxu0 %vm426_vm3, %v5610_v48  ;;  %12775 = vmatprep.subr.msk.mxu1 %vm370_vm0, %v14769_v50  ;;  %v6559_v48 = vld [vmem:[#allocation3 + $0x2b] sm:$0xff] }
 0x298   : > { %12487 = vmatprep.mubr.msk.f32.mxu0 %vm426_vm3, %v6056_v47  ;;  %v6560_v47 = vld [vmem:[#allocation3 + $0x33] sm:$0xff] }
 0x299   : > { %12723 = vmatmul.mubr.msk.f32.gmra.mrb[20].mxu1 %vm426_vm3, %v7975_v49  ;;  %v6561_v49 = vld [vmem:[#allocation3 + $0x3b] sm:$0xff] }
 0x29a   : > { %12725 = vmatprep.mubr.msk.f32.mxu1 %vm426_vm3, %v7976_v56  ;;  %v6562_v56 = vld [vmem:[#allocation3 + $0x43] sm:$0xff] }
 0x29b   : > { %12488 = vmatmul.mubr.msk.f32.vlgmr.msra.gmra.mrb[18].mxu0 %vm426_vm3, %v6057_v3  ;;  %v6563_v3 = vld [vmem:[#allocation3 + $0x4b] sm:$0xff] }
 0x29c   : > { %12490 = vmatprep.mubr.msk.f32.mxu0 %vm426_vm3, %v14787_v52  ;;  %12515 = vmatpush3.msk.msra.mxu0 %vm370_vm0, %v14730_v12  ;;  %v7987_v12 = vld [vmem:[#allocation3 + $0x108] sm:$0xff] }
 0x29d   : > { %12726 = vmatmul.mubr.msk.f32.gmra.mrb[22].mxu1 %vm426_vm3, %v7977_v26  ;;  %12543 = vmatprep.subr.msk.mxu0 %vm370_vm0, %v14784_v34  ;;  %v6566_v26 = vld [vmem:[#allocation3 + $0x63] sm:$0xff] }
 0x29e   : > { %12728 = vmatprep.mubr.msk.f32.mxu1 %vm426_vm3, %v7978_v53  ;;  %v6567_v53 = vld [vmem:[#allocation3 + $0x6b] sm:$0xff] }
 0x29f   : > { %12491 = vmatmul.mubr.msk.f32.gmra.mrb[20].mxu0 %vm426_vm3, %v14797_v54 }
 0x2a0   : > { %12493 = vmatprep.mubr.msk.f32.mxu0 %vm426_vm3, %v14801_v36 }
 0x2a1   : > { %12729 = vmatmul.mubr.msk.f32.gmra.mrb[24].mxu1 %vm426_vm3, %v7979_v57  ;;  %v6569_v57 = vld [vmem:[#allocation3 + $0x7b] sm:$0xff] }
 0x2a2   : > { %12731 = vmatprep.mubr.msk.f32.mxu1 %vm426_vm3, %v7980_v59  ;;  %v6570_v59 = vld [vmem:[#allocation3 + $0x83] sm:$0xff] }
 0x2a3   : > { %12494 = vmatmul.mubr.msk.f32.gmra.mrb[22].mxu0 %vm426_vm3, %v14807_v61 }
 0x2a4   : > { %12496 = vmatprep.mubr.msk.f32.mxu0 %vm426_vm3, %v14811_v41 }
 0x2a5   : > { %12732 = vmatmul.mubr.msk.f32.gmra.mrb[26].mxu1 %vm426_vm3, %v7981_v25  ;;  %v6571_v25 = vld [vmem:[#allocation3 + $0x8b] sm:$0xff] }
 0x2a6   : > { %12734 = vmatprep.mubr.msk.f32.mxu1 %vm426_vm3, %v7982_v1  ;;  %v6572_v1 = vld [vmem:[#allocation3 + $0x93] sm:$0xff] }
 0x2a7   : > { %12497 = vmatmul.mubr.msk.f32.gmra.mrb[24].mxu0 %vm426_vm3, %v14817_v45 }
 0x2a8   : > { %12499 = vmatprep.mubr.msk.f32.mxu0 %vm426_vm3, %v14821_v6 }
 0x2a9   : > { %12735 = vmatmul.mubr.msk.f32.gmra.mrb[28].mxu1 %vm426_vm3, %v7983_v4  ;;  %v8934_v4 = vld [vmem:[#allocation3 + $0xb3] sm:$0xff] }
 0x2aa   : > { %12737 = vmatprep.mubr.msk.f32.mxu1 %vm426_vm3, %v7984_v46  ;;  %v6573_v46 = vld [vmem:[#allocation3 + $0x9b] sm:$0xff] }
 0x2ab   : > { %12500 = vmatmul.mubr.msk.f32.gmra.mrb[26].mxu0 %vm426_vm3, %v14827_v5 }
 0x2ac   : > { %12502 = vmatprep.mubr.msk.f32.mxu0 %vm426_vm3, %v14831_v33 }
 0x2ad   : > { %12738 = vmatmul.mubr.msk.f32.gmra.mrb[30].mxu1 %vm426_vm3, %v7985_v8  ;;  %v8936_v8 = vld [vmem:[#allocation3 + $0xc3] sm:$0xff] }
 0x2ae   : > { %12740 = vmatprep.mubr.msk.f32.mxu1 %vm426_vm3, %v7986_v9  ;;  %v6807_v9 = vld [vmem:[#allocation3 + $0x1c] sm:$0xff] }
 0x2af   : > { %12503 = vmatmul.mubr.msk.f32.gmra.mrb[28].mxu0 %vm426_vm3, %v6067_v10 }
 0x2b0   : > { %12505 = vmatprep.mubr.msk.f32.mxu0 %vm426_vm3, %v6068_v39 }
 0x2b1   : > { %12741 = vmatmul.mubr.msk.f32.gmra.mrb[32].mxu1 %vm426_vm3, %v7987_v12  ;;  %v8938_v12 = vld [vmem:[#allocation3 + $0xd3] sm:$0xff] }
 0x2b2   : > { %12743 = vmatprep.mubr.msk.f32.mxu1 %vm426_vm3, %v7988_v15  ;;  %v14995_v15 = vld [vmem:[#allocation3 + $0x34] sm:$0xff] }
 0x2b3   : > { %12506 = vmatmul.mubr.msk.f32.gmra.mrb[30].mxu0 %vm426_vm3, %v6069_v16 }
 0x2b4   : > { %12508 = vmatprep.mubr.msk.f32.mxu0 %vm426_vm3, %v6070_v51 }
 0x2b5   : > { %12744 = vmatmul.mubr.msk.f32.gmra.mrb[34].mxu1 %vm426_vm3, %v7989_v2  ;;  %v15001_v2 = vld [vmem:[#allocation3 + $0x3c] sm:$0xff] }
 0x2b6   : > { %12748 = vmatprep.mubr.msk.f32.mxu1 %vm426_vm3, %v14844_v17 }
 0x2b7   : > { %12509 = vmatmul.mubr.msk.f32.gmra.mrb[32].mxu0 %vm426_vm3, %v6071_v18 }
 0x2b8   : > { %12511 = vmatprep.mubr.msk.f32.mxu0 %vm426_vm3, %v6072_v23 }
 0x2b9   : > { %12749 = vmatmul.mubr.msk.f32.vlgmr.msra.gmra.mrb[18].mxu1 %vm426_vm3, %v14849_v24 }
 0x2ba   : > { %12776 = vmatpush3.msk.msra.mxu1 %vm370_vm0, %v14769_v50  ;;  %12751 = vmatprep.mubr.msk.f32.mxu1 %vm426_vm3, %v8436_v55  ;;  %v14929_v50 = vld [vmem:[%s15407_s3 + $0x18] sm:$0xf] }
 0x2bb   : > { %12512 = vmatmul.mubr.msk.f32.gmra.mrb[34].mxu0 %vm426_vm3, %v6073_v29  ;;  %12804 = vmatprep.subr.msk.mxu1 %vm370_vm0, %v11079_v28 }
 0x2bc   : > { %12516 = vmatprep.mubr.msk.f32.mxu0 %vm426_vm3, %v14787_v52  ;;  %v6565_v52 = vld [vmem:[#allocation3 + $0x5b] sm:$0xff] }
 0x2bd   : > { %12752 = vmatmul.mubr.msk.f32.gmra.mrb[20].mxu1 %vm426_vm3, %v8437_v30 }
 0x2be   : > { %12754 = vmatprep.mubr.msk.f32.mxu1 %vm426_vm3, %v8438_v19 }
 0x2bf   : > { %12517 = vmatmul.mubr.msk.f32.vlgmr.msra.gmra.mrb[18].mxu0 %vm426_vm3, %v14797_v54  ;;  %v6568_v54 = vld [vmem:[#allocation3 + $0x73] sm:$0xff] }
 0x2c0   : > { %12519 = vmatprep.mubr.msk.f32.mxu0 %vm426_vm3, %v14801_v36  ;;  %12544 = vmatpush3.msk.msra.mxu0 %vm370_vm0, %v14784_v34  ;;  %v6564_v34 = vld [vmem:[#allocation3 + $0x53] sm:$0xff]  ;;  %v8699_v36 = vld [vmem:[#allocation3 + $0x122] sm:$0xff] }
 0x2c1   : > { %12755 = vmatmul.mubr.msk.f32.gmra.mrb[22].mxu1 %vm426_vm3, %v8439_v37  ;;  %12572 = vmatprep.subr.msk.mxu0 %vm370_vm0, %v10885_v43 }
 0x2c2   : > { %12757 = vmatprep.mubr.msk.f32.mxu1 %vm426_vm3, %v8440_v27 }
 0x2c3   : > { %12520 = vmatmul.mubr.msk.f32.gmra.mrb[20].mxu0 %vm426_vm3, %v14807_v61  ;;  %v8700_v61 = vld [vmem:[#allocation3 + $0x12a] sm:$0xff] }
 0x2c4   : > { %12522 = vmatprep.mubr.msk.f32.mxu0 %vm426_vm3, %v14811_v41  ;;  %v8932_v41 = vld [vmem:[#allocation3 + $0xa3] sm:$0xff] }
 0x2c5   : > { %12758 = vmatmul.mubr.msk.f32.gmra.mrb[24].mxu1 %vm426_vm3, %v8441_v31 }
 0x2c6   : > { %12760 = vmatprep.mubr.msk.f32.mxu1 %vm426_vm3, %v8442_v0 }
 0x2c7   : > { %12523 = vmatmul.mubr.msk.f32.gmra.mrb[22].mxu0 %vm426_vm3, %v14817_v45  ;;  %v8933_v45 = vld [vmem:[#allocation3 + $0xab] sm:$0xff] }
 0x2c8   : > { %12525 = vmatprep.mubr.msk.f32.mxu0 %vm426_vm3, %v14821_v6  ;;  %v14967_v6 = vld [vmem:[%s15407_s3 + $0x18] sm:$0xf] }
 0x2c9   : > { %12761 = vmatmul.mubr.msk.f32.gmra.mrb[26].mxu1 %vm426_vm3, %v8443_v62 }
 0x2ca   : > { %12763 = vmatprep.mubr.msk.f32.mxu1 %vm426_vm3, %v8444_v14 }
 0x2cb   : > { %12526 = vmatmul.mubr.msk.f32.gmra.mrb[24].mxu0 %vm426_vm3, %v14827_v5  ;;  %v6806_v5 = vld [vmem:[#allocation3 + $0x14] sm:$0xff] }
 0x2cc   : > { %12528 = vmatprep.mubr.msk.f32.mxu0 %vm426_vm3, %v14831_v33  ;;  %v8935_v33 = vld [vmem:[#allocation3 + $0xbb] sm:$0xff] }
 0x2cd   : > { %12764 = vmatmul.mubr.msk.f32.gmra.mrb[28].mxu1 %vm426_vm3, %v8445_v22 }
 0x2ce   : > { %12766 = vmatprep.mubr.msk.f32.mxu1 %vm426_vm3, %v8446_v11 }
 0x2cf   : > { %12529 = vmatmul.mubr.msk.f32.gmra.mrb[26].mxu0 %vm426_vm3, %v6067_v10  ;;  %v14982_v10 = vld [vmem:[%s15407_s3 + $0x1c] sm:$0xf] }
 0x2d0   : > { %12531 = vmatprep.mubr.msk.f32.mxu0 %vm426_vm3, %v6068_v39  ;;  %v8937_v39 = vld [vmem:[#allocation3 + $0xcb] sm:$0xff] }
 0x2d1   : > { %12767 = vmatmul.mubr.msk.f32.gmra.mrb[30].mxu1 %vm426_vm3, %v8447_v13 }
 0x2d2   : > { %12769 = vmatprep.mubr.msk.f32.mxu1 %vm426_vm3, %v8448_v60 }
 0x2d3   : > { %12532 = vmatmul.mubr.msk.f32.gmra.mrb[28].mxu0 %vm426_vm3, %v6069_v16  ;;  %v8939_v16 = vld [vmem:[#allocation3 + $0xdb] sm:$0xff] }
 0x2d4   : > { %12534 = vmatprep.mubr.msk.f32.mxu0 %vm426_vm3, %v6070_v51  ;;  %v8940_v51 = vld [vmem:[#allocation3 + $0xe3] sm:$0xff] }
 0x2d5   : > { %12770 = vmatmul.mubr.msk.f32.gmra.mrb[32].mxu1 %vm426_vm3, %v8449_v32 }
 0x2d6   : > { %12772 = vmatprep.mubr.msk.f32.mxu1 %vm426_vm3, %v8450_v35 }
 0x2d7   : > { %12535 = vmatmul.mubr.msk.f32.gmra.mrb[30].mxu0 %vm426_vm3, %v6071_v18  ;;  %v8941_v18 = vld [vmem:[#allocation3 + $0xeb] sm:$0xff] }
 0x2d8   : > { %12537 = vmatprep.mubr.msk.f32.mxu0 %vm426_vm3, %v6072_v23  ;;  %v8942_v23 = vld [vmem:[#allocation3 + $0xf3] sm:$0xff] }
 0x2d9   : > { %12773 = vmatmul.mubr.msk.f32.gmra.mrb[34].mxu1 %vm426_vm3, %v8451_v42 }
 0x2da   : > { %12777 = vmatprep.mubr.msk.f32.mxu1 %vm426_vm3, %v8436_v55  ;;  %v8943_v55 = vld [vmem:[#allocation3 + $0xfb] sm:$0xff] }
 0x2db   : > { %12538 = vmatmul.mubr.msk.f32.gmra.mrb[32].mxu0 %vm426_vm3, %v6073_v29  ;;  %v8944_v29 = vld [vmem:[#allocation3 + $0x103] sm:$0xff] }
 0x2dc   : > { %12540 = vmatprep.mubr.msk.f32.mxu0 %vm426_vm3, %v14844_v17  ;;  %v15005_v17 = vld [vmem:[#allocation3 + $0x44] sm:$0xff] }
 0x2dd   : > { %12778 = vmatmul.mubr.msk.f32.vlgmr.msra.gmra.mrb[18].mxu1 %vm426_vm3, %v8437_v30  ;;  %v15021_v30 = vld [vmem:[#allocation3 + $0x5c] sm:$0xff] }
 0x2de   : > { %12805 = vmatpush3.msk.msra.mxu1 %vm370_vm0, %v11079_v28  ;;  %12780 = vmatprep.mubr.msk.f32.mxu1 %vm426_vm3, %v8438_v19  ;;  %v15015_v28 = vld [vmem:[#allocation3 + $0x54] sm:$0xff]  ;;  %v15025_v19 = vld [vmem:[#allocation3 + $0x64] sm:$0xff] }
 0x2df   : > { %12541 = vmatmul.mubr.msk.f32.gmra.mrb[34].mxu0 %vm426_vm3, %v14849_v24  ;;  %12833 = vmatprep.subr.msk.mxu1 %vm370_vm0, %v14914_v44  ;;  %v15011_v24 = vld [vmem:[#allocation3 + $0x4c] sm:$0xff] }
 0x2e0   : > { %12545 = vmatprep.mubr.msk.f32.mxu0 %vm426_vm3, %v6556_v58  ;;  %v6823_v58 = vld [vmem:[#allocation3 + $0x9c] sm:$0xff] }
 0x2e1   : > { %12781 = vmatmul.mubr.msk.f32.gmra.mrb[20].mxu1 %vm426_vm3, %v8439_v37  ;;  %v8946_v37 = vld [vmem:[#allocation3 + $0x113] sm:$0xff] }
 0x2e2   : > { %12783 = vmatprep.mubr.msk.f32.mxu1 %vm426_vm3, %v8440_v27  ;;  %v6817_v27 = vld [vmem:[#allocation3 + $0x6c] sm:$0xff] }
 0x2e3   : > { %12546 = vmatmul.mubr.msk.f32.vlgmr.msra.gmra.mrb[18].mxu0 %vm426_vm3, %v6557_v40  ;;  %v9184_v40 = vld [vmem:[#allocation3 + $0xbc] sm:$0xff] }
 0x2e4   : > { %12548 = vmatprep.mubr.msk.f32.mxu0 %vm426_vm3, %v6558_v38  ;;  %12573 = vmatpush3.msk.msra.mxu0 %vm370_vm0, %v10885_v43  ;;  %v8945_v43 = vld [vmem:[#allocation3 + $0x10b] sm:$0xff]  ;;  %v10945_v38 = vld [vmem:[%s15407_s3 + $0x20] sm:$0xf] }
 0x2e5   : > { %12784 = vmatmul.mubr.msk.f32.gmra.mrb[22].mxu1 %vm426_vm3, %v8441_v31  ;;  %12601 = vmatprep.subr.msk.mxu0 %vm370_vm0, %v14929_v50  ;;  %v6818_v31 = vld [vmem:[#allocation3 + $0x74] sm:$0xff] }
 0x2e6   : > { %12786 = vmatprep.mubr.msk.f32.mxu1 %vm426_vm3, %v8442_v0  ;;  %v8947_v0 = vld [vmem:[#allocation3 + $0x11b] sm:$0xff] }
 0x2e7   : > { %12549 = vmatmul.mubr.msk.f32.gmra.mrb[20].mxu0 %vm426_vm3, %v6559_v48  ;;  %v9186_v48 = vld [vmem:[#allocation3 + $0xcc] sm:$0xff] }
 0x2e8   : > { %12551 = vmatprep.mubr.msk.f32.mxu0 %vm426_vm3, %v6560_v47  ;;  %v9188_v47 = vld [vmem:[#allocation3 + $0xdc] sm:$0xff] }
 0x2e9   : > { %12787 = vmatmul.mubr.msk.f32.gmra.mrb[24].mxu1 %vm426_vm3, %v8443_v62  ;;  %v8948_v62 = vld [vmem:[#allocation3 + $0x123] sm:$0xff] }
 0x2ea   : > { %12789 = vmatprep.mubr.msk.f32.mxu1 %vm426_vm3, %v8444_v14  ;;  %v6819_v14 = vld [vmem:[#allocation3 + $0x7c] sm:$0xff] }
 0x2eb   : > { %12552 = vmatmul.mubr.msk.f32.gmra.mrb[22].mxu0 %vm426_vm3, %v6561_v49  ;;  %v9190_v49 = vld [vmem:[#allocation3 + $0xec] sm:$0xff] }
 0x2ec   : > { %12554 = vmatprep.mubr.msk.f32.mxu0 %vm426_vm3, %v6562_v56  ;;  %v9191_v56 = vld [vmem:[#allocation3 + $0xf4] sm:$0xff] }
 0x2ed   : > { %12790 = vmatmul.mubr.msk.f32.gmra.mrb[26].mxu1 %vm426_vm3, %v8445_v22  ;;  %v6820_v22 = vld [vmem:[#allocation3 + $0x84] sm:$0xff] }
 0x2ee   : > { %12792 = vmatprep.mubr.msk.f32.mxu1 %vm426_vm3, %v8446_v11  ;;  %v8949_v11 = vld [vmem:[#allocation3 + $0x12b] sm:$0xff] }
 0x2ef   : > { %12555 = vmatmul.mubr.msk.f32.gmra.mrb[24].mxu0 %vm426_vm3, %v6563_v3  ;;  %v9192_v3 = vld [vmem:[#allocation3 + $0xfc] sm:$0xff] }
 0x2f0   : > { %12557 = vmatprep.mubr.msk.f32.mxu0 %vm426_vm3, %v6564_v34  ;;  %v9193_v34 = vld [vmem:[#allocation3 + $0x104] sm:$0xff] }
 0x2f1   : > { %12793 = vmatmul.mubr.msk.f32.gmra.mrb[28].mxu1 %vm426_vm3, %v8447_v13  ;;  %v15038_v13 = vld [vmem:[#allocation3 + $0xa4] sm:$0xff] }
 0x2f2   : > { %12795 = vmatprep.mubr.msk.f32.mxu1 %vm426_vm3, %v8448_v60  ;;  %v6821_v60 = vld [vmem:[#allocation3 + $0x8c] sm:$0xff] }
 0x2f3   : > { %12558 = vmatmul.mubr.msk.f32.gmra.mrb[26].mxu0 %vm426_vm3, %v6565_v52  ;;  %v9194_v52 = vld [vmem:[#allocation3 + $0x10c] sm:$0xff] }
 0x2f4   : > { %12560 = vmatprep.mubr.msk.f32.mxu0 %vm426_vm3, %v6566_v26  ;;  %v9195_v26 = vld [vmem:[#allocation3 + $0x114] sm:$0xff] }
 0x2f5   : > { %12796 = vmatmul.mubr.msk.f32.gmra.mrb[30].mxu1 %vm426_vm3, %v8449_v32  ;;  %v6822_v32 = vld [vmem:[#allocation3 + $0x94] sm:$0xff] }
 0x2f6   : > { %12798 = vmatprep.mubr.msk.f32.mxu1 %vm426_vm3, %v8450_v35  ;;  %v15043_v35 = vld [vmem:[#allocation3 + $0xac] sm:$0xff] }
 0x2f7   : > { %12561 = vmatmul.mubr.msk.f32.gmra.mrb[28].mxu0 %vm426_vm3, %v6567_v53  ;;  %v9196_v53 = vld [vmem:[#allocation3 + $0x11c] sm:$0xff] }
 0x2f8   : > { %12563 = vmatprep.mubr.msk.f32.mxu0 %vm426_vm3, %v6568_v54  ;;  %v9197_v54 = vld [vmem:[#allocation3 + $0x124] sm:$0xff] }
 0x2f9   : > { %12799 = vmatmul.mubr.msk.f32.gmra.mrb[32].mxu1 %vm426_vm3, %v8451_v42  ;;  %v11139_v42 = vld [vmem:[%s15407_s3 + $0x1c] sm:$0xf] }
 0x2fa   : > { %12801 = vmatprep.mubr.msk.f32.mxu1 %vm426_vm3, %v8699_v36  ;;  %v9198_v36 = vld [vmem:[#allocation3 + $0x12c] sm:$0xff] }
 0x2fb   : > { %12564 = vmatmul.mubr.msk.f32.gmra.mrb[30].mxu0 %vm426_vm3, %v6569_v57  ;;  %v15108_v57 = vld [vmem:[%s15407_s3 + $0x20] sm:$0xf] }
 0x2fc   : > { %12566 = vmatprep.mubr.msk.f32.mxu0 %vm426_vm3, %v6570_v59  ;;  %v7306_v59 = vld [vmem:[#allocation3 + $0x25] sm:$0xff] }
 0x2fd   : > { %12802 = vmatmul.mubr.msk.f32.gmra.mrb[34].mxu1 %vm426_vm3, %v8700_v61  ;;  %v7307_v61 = vld [vmem:[#allocation3 + $0x2d] sm:$0xff] }
 0x2fe   : > { %12806 = vmatprep.mubr.msk.f32.mxu1 %vm426_vm3, %v8932_v41  ;;  %v7308_v41 = vld [vmem:[#allocation3 + $0x35] sm:$0xff] }
 0x2ff   : > { %12567 = vmatmul.mubr.msk.f32.gmra.mrb[32].mxu0 %vm426_vm3, %v6571_v25  ;;  %v7309_v25 = vld [vmem:[#allocation3 + $0x3d] sm:$0xff] }
 0x300   : > { %12569 = vmatprep.mubr.msk.f32.mxu0 %vm426_vm3, %v6572_v1  ;;  %v7310_v1 = vld [vmem:[#allocation3 + $0x45] sm:$0xff] }
 0x301   : > { %12807 = vmatmul.mubr.msk.f32.vlgmr.msra.gmra.mrb[18].mxu1 %vm426_vm3, %v8933_v45  ;;  %v7311_v45 = vld [vmem:[#allocation3 + $0x4d] sm:$0xff] }
 0x302   : > { %12834 = vmatpush3.msk.msra.mxu1 %vm370_vm0, %v14914_v44  ;;  %12809 = vmatprep.mubr.msk.f32.mxu1 %vm426_vm3, %v8934_v4  ;;  %v9183_v44 = vld [vmem:[#allocation3 + $0xb4] sm:$0xff]  ;;  %v7313_v4 = vld [vmem:[#allocation3 + $0x5d] sm:$0xff] }
 0x303   : > { %12570 = vmatmul.mubr.msk.f32.gmra.mrb[34].mxu0 %vm426_vm3, %v6573_v46  ;;  %12862 = vmatprep.subr.msk.mxu1 %vm370_vm0, %v14967_v6  ;;  %v7314_v46 = vld [vmem:[#allocation3 + $0x65] sm:$0xff] }
 0x304   : > { %12574 = vmatprep.mubr.msk.f32.mxu0 %vm426_vm3, %v6806_v5  ;;  %v7315_v5 = vld [vmem:[#allocation3 + $0x6d] sm:$0xff] }
 0x305   : > { %12810 = vmatmul.mubr.msk.f32.gmra.mrb[20].mxu1 %vm426_vm3, %v8935_v33  ;;  %v7316_v33 = vld [vmem:[#allocation3 + $0x75] sm:$0xff] }
 0x306   : > { %12812 = vmatprep.mubr.msk.f32.mxu1 %vm426_vm3, %v8936_v8  ;;  %v7317_v8 = vld [vmem:[#allocation3 + $0x7d] sm:$0xff] }
 0x307   : > { %12575 = vmatmul.mubr.msk.f32.vlgmr.msra.gmra.mrb[18].mxu0 %vm426_vm3, %v6807_v9  ;;  %v7318_v9 = vld [vmem:[#allocation3 + $0x85] sm:$0xff] }
 0x308   : > { %12577 = vmatprep.mubr.msk.f32.mxu0 %vm426_vm3, %v14526_v7  ;;  %12602 = vmatpush3.msk.msra.mxu0 %vm370_vm0, %v14929_v50  ;;  %v9185_v50 = vld [vmem:[#allocation3 + $0xc4] sm:$0xff] }
 0x309   : > { %12813 = vmatmul.mubr.msk.f32.gmra.mrb[22].mxu1 %vm426_vm3, %v8937_v39  ;;  %12630 = vmatprep.subr.msk.mxu0 %vm370_vm0, %v14982_v10  ;;  %v7319_v39 = vld [vmem:[#allocation3 + $0x8d] sm:$0xff] }
 0x30a   : > { %12815 = vmatprep.mubr.msk.f32.mxu1 %vm426_vm3, %v8938_v12  ;;  %v7320_v12 = vld [vmem:[#allocation3 + $0x95] sm:$0xff] }
 0x30b   : > { %12578 = vmatmul.mubr.msk.f32.gmra.mrb[20].mxu0 %vm426_vm3, %v14549_v21 }
 0x30c   : > { %12580 = vmatprep.mubr.msk.f32.mxu0 %vm426_vm3, %v14995_v15 }
 0x30d   : > { %12816 = vmatmul.mubr.msk.f32.gmra.mrb[24].mxu1 %vm426_vm3, %v8939_v16  ;;  %v9679_v16 = vld [vmem:[#allocation3 + $0xb5] sm:$0xff] }
 0x30e   : > { %12818 = vmatprep.mubr.msk.f32.mxu1 %vm426_vm3, %v8940_v51  ;;  %v7321_v51 = vld [vmem:[#allocation3 + $0x9d] sm:$0xff] }
 0x30f   : > { %12581 = vmatmul.mubr.msk.f32.gmra.mrb[22].mxu0 %vm426_vm3, %v15001_v2 }
 0x310   : > { %12583 = vmatprep.mubr.msk.f32.mxu0 %vm426_vm3, %v15005_v17 }
 0x311   : > { %12819 = vmatmul.mubr.msk.f32.gmra.mrb[26].mxu1 %vm426_vm3, %v8941_v18  ;;  %v9681_v18 = vld [vmem:[#allocation3 + $0xc5] sm:$0xff] }
 0x312   : > { %12821 = vmatprep.mubr.msk.f32.mxu1 %vm426_vm3, %v8942_v23  ;;  %v7323_v23 = vld [vmem:[#allocation3 + $0xad] sm:$0xff] }
 0x313   : > { %12584 = vmatmul.mubr.msk.f32.gmra.mrb[24].mxu0 %vm426_vm3, %v15011_v24 }
 0x314   : > { %12586 = vmatprep.mubr.msk.f32.mxu0 %vm426_vm3, %v15015_v28 }
 0x315   : > { %12822 = vmatmul.mubr.msk.f32.gmra.mrb[28].mxu1 %vm426_vm3, %v8943_v55  ;;  %v9683_v55 = vld [vmem:[#allocation3 + $0xd5] sm:$0xff] }
 0x316   : > { %12824 = vmatprep.mubr.msk.f32.mxu1 %vm426_vm3, %v8944_v29  ;;  %v7557_v29 = vld [vmem:[#allocation3 + $0x2e] sm:$0xff] }
 0x317   : > { %12587 = vmatmul.mubr.msk.f32.gmra.mrb[26].mxu0 %vm426_vm3, %v15021_v30 }
 0x318   : > { %12589 = vmatprep.mubr.msk.f32.mxu0 %vm426_vm3, %v15025_v19 }
 0x319   : > { %12825 = vmatmul.mubr.msk.f32.gmra.mrb[30].mxu1 %vm426_vm3, %v8945_v43  ;;  %v9685_v43 = vld [vmem:[#allocation3 + $0xe5] sm:$0xff] }
 0x31a   : > { %12827 = vmatprep.mubr.msk.f32.mxu1 %vm426_vm3, %v8946_v37  ;;  %v7559_v37 = vld [vmem:[#allocation3 + $0x3e] sm:$0xff] }
 0x31b   : > { %12590 = vmatmul.mubr.msk.f32.gmra.mrb[28].mxu0 %vm426_vm3, %v6817_v27 }
 0x31c   : > { %12592 = vmatprep.mubr.msk.f32.mxu0 %vm426_vm3, %v6818_v31 }
 0x31d   : > { %12828 = vmatmul.mubr.msk.f32.gmra.mrb[32].mxu1 %vm426_vm3, %v8947_v0  ;;  %v9687_v0 = vld [vmem:[#allocation3 + $0xf5] sm:$0xff] }
 0x31e   : > { %12830 = vmatprep.mubr.msk.f32.mxu1 %vm426_vm3, %v8948_v62  ;;  %v7561_v62 = vld [vmem:[#allocation3 + $0x4e] sm:$0xff] }
 0x31f   : > { %12593 = vmatmul.mubr.msk.f32.gmra.mrb[30].mxu0 %vm426_vm3, %v6819_v14 }
 0x320   : > { %12595 = vmatprep.mubr.msk.f32.mxu0 %vm426_vm3, %v6820_v22 }
 0x321   : > { %12831 = vmatmul.mubr.msk.f32.gmra.mrb[34].mxu1 %vm426_vm3, %v8949_v11  ;;  %v9689_v11 = vld [vmem:[#allocation3 + $0x105] sm:$0xff] }
 0x322   : > { %12835 = vmatprep.mubr.msk.f32.mxu1 %vm426_vm3, %v15038_v13 }
 0x323   : > { %12596 = vmatmul.mubr.msk.f32.gmra.mrb[32].mxu0 %vm426_vm3, %v6821_v60 }
 0x324   : > { %12598 = vmatprep.mubr.msk.f32.mxu0 %vm426_vm3, %v6822_v32 }
 0x325   : > { %12836 = vmatmul.mubr.msk.f32.vlgmr.msra.gmra.mrb[18].mxu1 %vm426_vm3, %v15043_v35 }
 0x326   : > { %12863 = vmatpush3.msk.msra.mxu1 %vm370_vm0, %v14967_v6  ;;  %12838 = vmatprep.mubr.msk.f32.mxu1 %vm426_vm3, %v9183_v44  ;;  %v7312_v6 = vld [vmem:[#allocation3 + $0x55] sm:$0xff] }
 0x327   : > { %12599 = vmatmul.mubr.msk.f32.gmra.mrb[34].mxu0 %vm426_vm3, %v6823_v58  ;;  %12891 = vmatprep.subr.msk.mxu1 %vm370_vm0, %v11139_v42 }
 0x328   : > { %12603 = vmatprep.mubr.msk.f32.mxu0 %vm426_vm3, %v14526_v7  ;;  %v9187_v7 = vld [vmem:[#allocation3 + $0xd4] sm:$0xff] }
 0x329   : > { %12839 = vmatmul.mubr.msk.f32.gmra.mrb[20].mxu1 %vm426_vm3, %v9184_v40 }
 0x32a   : > { %12841 = vmatprep.mubr.msk.f32.mxu1 %vm426_vm3, %v9185_v50 }
 0x32b   : > { %12604 = vmatmul.mubr.msk.f32.vlgmr.msra.gmra.mrb[18].mxu0 %vm426_vm3, %v14549_v21  ;;  %v9189_v21 = vld [vmem:[#allocation3 + $0xe4] sm:$0xff] }
 0x32c   : > { %12606 = vmatprep.mubr.msk.f32.mxu0 %vm426_vm3, %v14995_v15  ;;  %12631 = vmatpush3.msk.msra.mxu0 %vm370_vm0, %v14982_v10  ;;  %v9446_v10 = vld [vmem:[#allocation3 + $0x134] sm:$0xff]  ;;  %v9447_v15 = vld [vmem:[#allocation3 + $0x13c] sm:$0xff] }
 0x32d   : > { %12842 = vmatmul.mubr.msk.f32.gmra.mrb[22].mxu1 %vm426_vm3, %v9186_v48  ;;  %12659 = vmatprep.subr.msk.mxu0 %vm370_vm0, %v10945_v38 }
 0x32e   : > { %12844 = vmatprep.mubr.msk.f32.mxu1 %vm426_vm3, %v9187_v7 }
 0x32f   : > { %12607 = vmatmul.mubr.msk.f32.gmra.mrb[20].mxu0 %vm426_vm3, %v15001_v2  ;;  %v7322_v2 = vld [vmem:[#allocation3 + $0xa5] sm:$0xff] }
 0x330   : > { %12609 = vmatprep.mubr.msk.f32.mxu0 %vm426_vm3, %v15005_v17  ;;  %v9680_v17 = vld [vmem:[#allocation3 + $0xbd] sm:$0xff] }
 0x331   : > { %12845 = vmatmul.mubr.msk.f32.gmra.mrb[24].mxu1 %vm426_vm3, %v9188_v47 }
 0x332   : > { %12847 = vmatprep.mubr.msk.f32.mxu1 %vm426_vm3, %v9189_v21 }
 0x333   : > { %12610 = vmatmul.mubr.msk.f32.gmra.mrb[22].mxu0 %vm426_vm3, %v15011_v24  ;;  %v7556_v24 = vld [vmem:[#allocation3 + $0x26] sm:$0xff] }
 0x334   : > { %12612 = vmatprep.mubr.msk.f32.mxu0 %vm426_vm3, %v15015_v28  ;;  %v9682_v28 = vld [vmem:[#allocation3 + $0xcd] sm:$0xff] }
 0x335   : > { %12848 = vmatmul.mubr.msk.f32.gmra.mrb[26].mxu1 %vm426_vm3, %v9190_v49 }
 0x336   : > { %12850 = vmatprep.mubr.msk.f32.mxu1 %vm426_vm3, %v9191_v56 }
 0x337   : > { %12613 = vmatmul.mubr.msk.f32.gmra.mrb[24].mxu0 %vm426_vm3, %v15021_v30  ;;  %v7558_v30 = vld [vmem:[#allocation3 + $0x36] sm:$0xff] }
 0x338   : > { %12615 = vmatprep.mubr.msk.f32.mxu0 %vm426_vm3, %v15025_v19  ;;  %v9684_v19 = vld [vmem:[#allocation3 + $0xdd] sm:$0xff] }
 0x339   : > { %12851 = vmatmul.mubr.msk.f32.gmra.mrb[28].mxu1 %vm426_vm3, %v9192_v3 }
 0x33a   : > { %12853 = vmatprep.mubr.msk.f32.mxu1 %vm426_vm3, %v9193_v34 }
 0x33b   : > { %12616 = vmatmul.mubr.msk.f32.gmra.mrb[26].mxu0 %vm426_vm3, %v6817_v27  ;;  %v7560_v27 = vld [vmem:[#allocation3 + $0x46] sm:$0xff] }
 0x33c   : > { %12618 = vmatprep.mubr.msk.f32.mxu0 %vm426_vm3, %v6818_v31  ;;  %v9686_v31 = vld [vmem:[#allocation3 + $0xed] sm:$0xff] }
 0x33d   : > { %12854 = vmatmul.mubr.msk.f32.gmra.mrb[30].mxu1 %vm426_vm3, %v9194_v52 }
 0x33e   : > { %12856 = vmatprep.mubr.msk.f32.mxu1 %vm426_vm3, %v9195_v26 }
 0x33f   : > { %12619 = vmatmul.mubr.msk.f32.gmra.mrb[28].mxu0 %vm426_vm3, %v6819_v14  ;;  %v7562_v14 = vld [vmem:[#allocation3 + $0x56] sm:$0xff] }
 0x340   : > { %12621 = vmatprep.mubr.msk.f32.mxu0 %vm426_vm3, %v6820_v22  ;;  %v9688_v22 = vld [vmem:[#allocation3 + $0xfd] sm:$0xff] }
 0x341   : > { %12857 = vmatmul.mubr.msk.f32.gmra.mrb[32].mxu1 %vm426_vm3, %v9196_v53 }
 0x342   : > { %12859 = vmatprep.mubr.msk.f32.mxu1 %vm426_vm3, %v9197_v54 }
 0x343   : > { %12622 = vmatmul.mubr.msk.f32.gmra.mrb[30].mxu0 %vm426_vm3, %v6821_v60  ;;  %v7564_v60 = vld [vmem:[#allocation3 + $0x66] sm:$0xff] }
 0x344   : > { %12624 = vmatprep.mubr.msk.f32.mxu0 %vm426_vm3, %v6822_v32  ;;  %v9690_v32 = vld [vmem:[#allocation3 + $0x10d] sm:$0xff] }
 0x345   : > { %12860 = vmatmul.mubr.msk.f32.gmra.mrb[34].mxu1 %vm426_vm3, %v9198_v36 }
 0x346   : > { %12864 = vmatprep.mubr.msk.f32.mxu1 %vm426_vm3, %v9183_v44  ;;  %v7566_v44 = vld [vmem:[#allocation3 + $0x76] sm:$0xff] }
 0x347   : > { %12625 = vmatmul.mubr.msk.f32.gmra.mrb[32].mxu0 %vm426_vm3, %v6823_v58  ;;  %v9692_v58 = vld [vmem:[#allocation3 + $0x11d] sm:$0xff] }
 0x348   : > { %12627 = vmatprep.mubr.msk.f32.mxu0 %vm426_vm3, %v15038_v13  ;;  %v7563_v13 = vld [vmem:[#allocation3 + $0x5e] sm:$0xff] }
 0x349   : > { %12865 = vmatmul.mubr.msk.f32.vlgmr.msra.gmra.mrb[18].mxu1 %vm426_vm3, %v9184_v40  ;;  %v9693_v40 = vld [vmem:[#allocation3 + $0x125] sm:$0xff] }
 0x34a   : > { %12892 = vmatpush3.msk.msra.mxu1 %vm370_vm0, %v11139_v42  ;;  %12867 = vmatprep.mubr.msk.f32.mxu1 %vm426_vm3, %v9185_v50  ;;  %v7565_v42 = vld [vmem:[#allocation3 + $0x6e] sm:$0xff]  ;;  %v7567_v50 = vld [vmem:[#allocation3 + $0x7e] sm:$0xff] }
 0x34b   : > { %12628 = vmatmul.mubr.msk.f32.gmra.mrb[34].mxu0 %vm426_vm3, %v15043_v35  ;;  %12920 = vmatprep.subr.msk.mxu1 %vm370_vm0, %v15108_v57  ;;  %v9691_v35 = vld [vmem:[#allocation3 + $0x115] sm:$0xff] }
 0x34c   : > { %12632 = vmatprep.mubr.msk.f32.mxu0 %vm426_vm3, %v7306_v59  ;;  %v9934_v59 = vld [vmem:[#allocation3 + $0xe6] sm:$0xff] }
 0x34d   : > { %12868 = vmatmul.mubr.msk.f32.gmra.mrb[20].mxu1 %vm426_vm3, %v9186_v48  ;;  %v9694_v48 = vld [vmem:[#allocation3 + $0x12d] sm:$0xff] }
 0x34e   : > { %12870 = vmatprep.mubr.msk.f32.mxu1 %vm426_vm3, %v9187_v7  ;;  %v9695_v7 = vld [vmem:[#allocation3 + $0x135] sm:$0xff] }
 0x34f   : > { %12633 = vmatmul.mubr.msk.f32.vlgmr.msra.gmra.mrb[18].mxu0 %vm426_vm3, %v7307_v61  ;;  %v9935_v61 = vld [vmem:[#allocation3 + $0xee] sm:$0xff] }
 0x350   : > { %12635 = vmatprep.mubr.msk.f32.mxu0 %vm426_vm3, %v7308_v41  ;;  %12660 = vmatpush3.msk.msra.mxu0 %vm370_vm0, %v10945_v38  ;;  %v7568_v38 = vld [vmem:[#allocation3 + $0x86] sm:$0xff]  ;;  %v9936_v41 = vld [vmem:[#allocation3 + $0xf6] sm:$0xff] }
 0x351   : > { %12871 = vmatmul.mubr.msk.f32.gmra.mrb[22].mxu1 %vm426_vm3, %v9188_v47  ;;  %v7569_v47 = vld [vmem:[#allocation3 + $0x8e] sm:$0xff] }
 0x352   : > { %12873 = vmatprep.mubr.msk.f32.mxu1 %vm426_vm3, %v9189_v21  ;;  %v7570_v21 = vld [vmem:[#allocation3 + $0x96] sm:$0xff] }
 0x353   : > { %12636 = vmatmul.mubr.msk.f32.gmra.mrb[20].mxu0 %vm426_vm3, %v7309_v25  ;;  %v9937_v25 = vld [vmem:[#allocation3 + $0xfe] sm:$0xff] }
 0x354   : > { %12638 = vmatprep.mubr.msk.f32.mxu0 %vm426_vm3, %v7310_v1  ;;  %v9938_v1 = vld [vmem:[#allocation3 + $0x106] sm:$0xff] }
 0x355   : > { %12874 = vmatmul.mubr.msk.f32.gmra.mrb[24].mxu1 %vm426_vm3, %v9190_v49  ;;  %v9696_v49 = vld [vmem:[#allocation3 + $0x13d] sm:$0xff] }
 0x356   : > { %12876 = vmatprep.mubr.msk.f32.mxu1 %vm426_vm3, %v9191_v56  ;;  %v9928_v56 = vld [vmem:[#allocation3 + $0xb6] sm:$0xff] }
 0x357   : > { %12639 = vmatmul.mubr.msk.f32.gmra.mrb[22].mxu0 %vm426_vm3, %v7311_v45  ;;  %v9941_v45 = vld [vmem:[#allocation3 + $0x11e] sm:$0xff] }
 0x358   : > { %12641 = vmatprep.mubr.msk.f32.mxu0 %vm426_vm3, %v7312_v6  ;;  %v9942_v6 = vld [vmem:[#allocation3 + $0x126] sm:$0xff] }
 0x359   : > { %12877 = vmatmul.mubr.msk.f32.gmra.mrb[26].mxu1 %vm426_vm3, %v9192_v3  ;;  %v7571_v3 = vld [vmem:[#allocation3 + $0x9e] sm:$0xff] }
 0x35a   : > { %12879 = vmatprep.mubr.msk.f32.mxu1 %vm426_vm3, %v9193_v34  ;;  %v7572_v34 = vld [vmem:[#allocation3 + $0xa6] sm:$0xff] }
 0x35b   : > { %12642 = vmatmul.mubr.msk.f32.gmra.mrb[24].mxu0 %vm426_vm3, %v7313_v4  ;;  %v9943_v4 = vld [vmem:[#allocation3 + $0x12e] sm:$0xff] }
 0x35c   : > { %12644 = vmatprep.mubr.msk.f32.mxu0 %vm426_vm3, %v7314_v46  ;;  %v9944_v46 = vld [vmem:[#allocation3 + $0x136] sm:$0xff] }
 0x35d   : > { %12880 = vmatmul.mubr.msk.f32.gmra.mrb[28].mxu1 %vm426_vm3, %v9194_v52  ;;  %v9929_v52 = vld [vmem:[#allocation3 + $0xbe] sm:$0xff] }
 0x35e   : > { %12882 = vmatprep.mubr.msk.f32.mxu1 %vm426_vm3, %v9195_v26  ;;  %v9930_v26 = vld [vmem:[#allocation3 + $0xc6] sm:$0xff] }
 0x35f   : > { %12645 = vmatmul.mubr.msk.f32.gmra.mrb[26].mxu0 %vm426_vm3, %v7315_v5  ;;  %v10967_v5 = vld [vmem:[%s13613_s6 + $0x18] sm:$0xff] }
 0x360   : > { %12647 = vmatprep.mubr.msk.f32.mxu0 %vm426_vm3, %v7316_v33  ;;  %v15214_v33 = vld [vmem:[%s15408_s4] ss:$0 sm:$0xff] }
 0x361   : > { %12883 = vmatmul.mubr.msk.f32.gmra.mrb[30].mxu1 %vm426_vm3, %v9196_v53  ;;  %v7573_v53 = vld [vmem:[#allocation3 + $0xae] sm:$0xff] }
 0x362   : > { %12885 = vmatprep.mubr.msk.f32.mxu1 %vm426_vm3, %v9197_v54  ;;  %v9931_v54 = vld [vmem:[#allocation3 + $0xce] sm:$0xff] }
 0x363   : > { %12648 = vmatmul.mubr.msk.f32.gmra.mrb[28].mxu0 %vm426_vm3, %v7317_v8 }
 0x364   : > { %12650 = vmatprep.mubr.msk.f32.mxu0 %vm426_vm3, %v7318_v9  ;;  %v7815_v9 = vld [vmem:[%s13613_s6 + $0x8] sm:$0xff] }
 0x365   : > { %12886 = vmatmul.mubr.msk.f32.gmra.mrb[32].mxu1 %vm426_vm3, %v9198_v36  ;;  %v9932_v36 = vld [vmem:[#allocation3 + $0xd6] sm:$0xff] }
 0x366   : > { %12888 = vmatprep.mubr.msk.f32.mxu1 %vm426_vm3, %v9446_v10 }
 0x367   : > { %12651 = vmatmul.mubr.msk.f32.gmra.mrb[30].mxu0 %vm426_vm3, %v7319_v39  ;;  %v7830_v39 = vrot.slane %v10967_v5, 6  ;;  %v10990_v5 = vld [vmem:[%s13613_s6 + $0x60] sm:$0xff] }
 0x368   : > { %12653 = vmatprep.mubr.msk.f32.mxu0 %vm426_vm3, %v7320_v12 }
 0x369   : > { %12889 = vmatmul.mubr.msk.f32.gmra.mrb[34].mxu1 %vm426_vm3, %v9447_v15 }
 0x36a   : > { %12893 = vmatprep.mubr.msk.f32.mxu1 %vm426_vm3, %v9679_v16  ;;  %v7814_v16 = vld [vmem:[%s13613_s6] sm:$0xff] }
 0x36b   : > { %12654 = vmatmul.mubr.msk.f32.gmra.mrb[32].mxu0 %vm426_vm3, %v7321_v51  ;;  %v10971_v51 = vld [vmem:[%s13613_s6 + $0x20] sm:$0xff] }
 0x36c   : > { %12656 = vmatprep.mubr.msk.f32.mxu0 %vm426_vm3, %v7322_v2  ;;  %v10972_v2 = vld [vmem:[%s13613_s6 + $0x28] sm:$0xff] }
 0x36d   : > { %12894 = vmatmul.mubr.msk.f32.vlgmr.msra.gmra.mrb[18].mxu1 %vm426_vm3, %v9680_v17 }
 0x36e   : > { %12921 = vmatpush3.msk.msra.mxu1 %vm370_vm0, %v15108_v57  ;;  %12896 = vmatprep.mubr.msk.f32.mxu1 %vm426_vm3, %v9681_v18  ;;  %v9933_v57 = vld [vmem:[#allocation3 + $0xde] sm:$0xff] }
 0x36f   : > { %12657 = vmatmul.mubr.msk.f32.gmra.mrb[34].mxu0 %vm426_vm3, %v7323_v23 }
 0x370   : > { %12661 = vmatprep.mubr.msk.f32.mxu0 %vm426_vm3, %v7556_v24 }
 0x371   : > { %12897 = vmatmul.mubr.msk.f32.gmra.mrb[20].mxu1 %vm426_vm3, %v9682_v28 }
 0x372   : > { %12899 = vmatprep.mubr.msk.f32.mxu1 %vm426_vm3, %v9683_v55  ;;  %v7852_v55 = vrot.slane %v10971_v51, 4  ;;  %v10991_v51 = vld [vmem:[%s13613_s6 + $0x68] sm:$0xff] }
 0x373   : > { %12662 = vmatmul.mubr.msk.f32.vlgmr.msra.gmra.mrb[18].mxu0 %vm426_vm3, %v7557_v29  ;;  %v7853_v29 = vrot.slane %v10972_v2, 4 }
 0x374   : > { %12664 = vmatprep.mubr.msk.f32.mxu0 %vm426_vm3, %v7558_v30 }
 0x375   : > { %12900 = vmatmul.mubr.msk.f32.gmra.mrb[22].mxu1 %vm426_vm3, %v9684_v19 }
 0x376   : > { %12902 = vmatprep.mubr.msk.f32.mxu1 %vm426_vm3, %v9685_v43 }
 0x377   : > { %12665 = vmatmul.mubr.msk.f32.gmra.mrb[20].mxu0 %vm426_vm3, %v7559_v37  ;;  %v10976_v37 = vld [vmem:[%s13613_s6 + $0x30] sm:$0xff] }
 0x378   : > { %12667 = vmatprep.mubr.msk.f32.mxu0 %vm426_vm3, %v7560_v27  ;;  %v10977_v27 = vld [vmem:[%s13613_s6 + $0x38] sm:$0xff] }
 0x379   : > { %12903 = vmatmul.mubr.msk.f32.gmra.mrb[24].mxu1 %vm426_vm3, %v9686_v31 }
 0x37a   : > { %12905 = vmatprep.mubr.msk.f32.mxu1 %vm426_vm3, %v9687_v0 }
 0x37b   : > { %12668 = vmatmul.mubr.msk.f32.gmra.mrb[22].mxu0 %vm426_vm3, %v7561_v62 }
 0x37c   : > { %12670 = vmatprep.mubr.msk.f32.mxu0 %vm426_vm3, %v7562_v14 }
 0x37d   : > { %12906 = vmatmul.mubr.msk.f32.gmra.mrb[26].mxu1 %vm426_vm3, %v9688_v22 }
 0x37e   : > { %12908 = vmatprep.mubr.msk.f32.mxu1 %vm426_vm3, %v9689_v11  ;;  %v7854_v11 = vsel %vm370_vm0, %v7852_v55, %v7853_v29 }
 0x37f   : > { %12671 = vmatmul.mubr.msk.f32.gmra.mrb[24].mxu0 %vm426_vm3, %v7563_v13  ;;  %v7876_v13 = vrot.slane %v10976_v37, 2 }
 0x380   : > { %12673 = vmatprep.mubr.msk.f32.mxu0 %vm426_vm3, %v7564_v60  ;;  %v7877_v60 = vrot.slane %v10977_v27, 2 }
 0x381   : > { %12909 = vmatmul.mubr.msk.f32.gmra.mrb[28].mxu1 %vm426_vm3, %v9690_v32 }
 0x382   : > { %12911 = vmatprep.mubr.msk.f32.mxu1 %vm426_vm3, %v9691_v35 }
 0x383   : > { %12674 = vmatmul.mubr.msk.f32.gmra.mrb[26].mxu0 %vm426_vm3, %v7565_v42 }
 0x384   : > { %12676 = vmatprep.mubr.msk.f32.mxu0 %vm426_vm3, %v7566_v44 }
 0x385   : > { %12912 = vmatmul.mubr.msk.f32.gmra.mrb[30].mxu1 %vm426_vm3, %v9692_v58 }
 0x386   : > { %12914 = vmatprep.mubr.msk.f32.mxu1 %vm426_vm3, %v9693_v40 }
 0x387   : > { %12677 = vmatmul.mubr.msk.f32.gmra.mrb[28].mxu0 %vm426_vm3, %v7567_v50 }
 0x388   : > { %12679 = vmatprep.mubr.msk.f32.mxu0 %vm426_vm3, %v7568_v38 }
 0x389   : > { %12915 = vmatmul.mubr.msk.f32.gmra.mrb[32].mxu1 %vm426_vm3, %v9694_v48 }
 0x38a   : > { %12917 = vmatprep.mubr.msk.f32.mxu1 %vm426_vm3, %v9695_v7  ;;  %v7878_v7 = vsel %vm381_vm2, %v7876_v13, %v7877_v60 }
 0x38b   : > { %12680 = vmatmul.mubr.msk.f32.gmra.mrb[30].mxu0 %vm426_vm3, %v7569_v47 }
 0x38c   : > { %12682 = vmatprep.mubr.msk.f32.mxu0 %vm426_vm3, %v7570_v21 }
 0x38d   : > { %12918 = vmatmul.mubr.msk.f32.gmra.mrb[34].mxu1 %vm426_vm3, %v9696_v49 }
 0x38e   : > { %12922 = vmatprep.mubr.msk.f32.mxu1 %vm426_vm3, %v9928_v56 }
 0x38f   : > { %12683 = vmatmul.mubr.msk.f32.gmra.mrb[32].mxu0 %vm426_vm3, %v7571_v3 }
 0x390   : > { %12685 = vmatprep.mubr.msk.f32.mxu0 %vm426_vm3, %v7572_v34 }
 0x391   : > { %12923 = vmatmul.mubr.msk.f32.vlgmr.msra.gmra.mrb[18].mxu1 %vm426_vm3, %v9929_v52 }
 0x392   : > { %12925 = vmatprep.mubr.msk.f32.mxu1 %vm426_vm3, %v9930_v26 }
 0x393   : > { %12686 = vmatmul.mubr.msk.f32.gmra.mrb[34].mxu0 %vm426_vm3, %v7573_v53 }
 0x395   : > { %12926 = vmatmul.mubr.msk.f32.gmra.mrb[20].mxu1 %vm426_vm3, %v9931_v54 }
 0x396   : > { %12928 = vmatprep.mubr.msk.f32.mxu1 %vm426_vm3, %v9932_v36  ;;  %v10981_v36 = vld [vmem:[%s13613_s6 + $0x40] sm:$0xff] }
 0x399   : > { %12929 = vmatmul.mubr.msk.f32.gmra.mrb[22].mxu1 %vm426_vm3, %v9933_v57  ;;  %v10985_v57 = vld [vmem:[%s13613_s6 + $0x50] sm:$0xff] }
 0x39a   : > { %12931 = vmatprep.mubr.msk.f32.mxu1 %vm426_vm3, %v9934_v59 }
 0x39d   : > { %12932 = vmatmul.mubr.msk.f32.gmra.mrb[24].mxu1 %vm426_vm3, %v9935_v61 }
 0x39e   : > { %12934 = vmatprep.mubr.msk.f32.mxu1 %vm426_vm3, %v9936_v41 }
 0x3a1   : > { %12935 = vmatmul.mubr.msk.f32.gmra.mrb[26].mxu1 %vm426_vm3, %v9937_v25 }
 0x3a2   : > { %12937 = vmatprep.mubr.msk.f32.mxu1 %vm426_vm3, %v9938_v1 }
 0x3a5   : > { %12938 = vmatmul.mubr.msk.f32.gmra.mrb[28].mxu1 %vm426_vm3, %v14676_v20  ;;  %v9945_v20 = vld [vmem:[#allocation3 + $0x13e] sm:$0xff] }
 0x3a6   : > { %12940 = vmatprep.mubr.msk.f32.mxu1 %vm426_vm3, %v14704_v63  ;;  %v10966_v63 = vld [vmem:[%s13613_s6 + $0x10] sm:$0xff] }
 0x3a7   : > { %v7829_v10 = vrot.slane %v10966_v63, 6 }
 0x3a9   : > { %12941 = vmatmul.mubr.msk.f32.gmra.mrb[30].mxu1 %vm426_vm3, %v9941_v45  ;;  %v7831_v28 = vsel %vm359_vm4, %v7829_v10, %v7830_v39 }
 0x3aa   : > { %12943 = vmatprep.mubr.msk.f32.mxu1 %vm426_vm3, %v9942_v6  ;;  %v10986_v6 = vld [vmem:[%s13613_s6 + $0x58] sm:$0xff] }
 0x3ad   : > { %12944 = vmatmul.mubr.msk.f32.gmra.mrb[32].mxu1 %vm426_vm3, %v9943_v4 }
 0x3ae   : > { %12946 = vmatprep.mubr.msk.f32.mxu1 %vm426_vm3, %v9944_v46  ;;  %v7912_v46 = vrot.slane %v10985_v57, 6 }
 0x3b1   : > { %12947 = vmatmul.mubr.msk.f32.gmra.mrb[34].mxu1 %vm426_vm3, %v9945_v20 }
 0x446   : > { %v12663_v8 = vpop.f32.mrb[18].mxu0 }
 0x447   : > { %v7813_v12 = vadd.f32 %v12663_v8, %v15214_v33  ;;  %v7699_v15 = vpop.f32.mrb[19].mxu0 }
 0x448   : > { %v7812_v17 = vadd.f32 %v15214_v33, %v7699_v15 }
 0x449   : > { %v7817_v18 = vadd.f32 %v7815_v9, %v7813_v12  ;;  %v7913_v12 = vrot.slane %v10986_v6, 6 }
 0x44a   : > { %v7816_v23 = vadd.f32 %v7814_v16, %v7812_v17  ;;  %v12666_v24 = vpop.f32.mrb[20].mxu0  ;;  %v7934_v17 = vrot.slane %v10990_v5, 4 }
 0x44b   : > { %v7819_v30 = vmax.f32 %v7817_v18, 0.0  ;;  %v7823_v19 = vadd.f32 %v12666_v24, %v15214_v33  ;;  %v7709_v43 = vpop.f32.mrb[21].mxu0  ;;  %v10995_v24 = vld [vmem:[%s13613_s6 + $0x70] sm:$0xff] }
 0x44c   : > { %v7818_v31 = vmax.f32 %v7816_v23, 0.0  ;;  %v7822_v0 = vadd.f32 %v15214_v33, %v7709_v43  ;;  %v10996_v43 = vld [vmem:[%s13613_s6 + $0x78] sm:$0xff] }
 0x44d   : > { %7821 = vst.msk [vmem:[%s15227_s14 + $0x8] sm:$0xff] %vm426_vm3, %v7819_v30  ;;  %v7836_v62 = vadd.f32 %v7831_v28, %v7823_v19  ;;  %v7914_v30 = vsel %vm359_vm4, %v7912_v46, %v7913_v12  ;;  %v7935_v19 = vrot.slane %v10991_v51, 4 }
 0x44e   : > { %7820 = vst.msk [vmem:[%s15227_s14] sm:$0xff] %vm426_vm3, %v7818_v31  ;;  %v7835_v14 = vadd.f32 %v7829_v10, %v7822_v0  ;;  %v12669_v22 = vpop.f32.mrb[22].mxu0  ;;  %v15282_v31 = vld [vmem:[%s13613_s6 + $0x90] sm:$0xff]  ;;  %v15285_v0 = vld [vmem:[%s13613_s6 + $0x98] sm:$0xff] }
 0x44f   : > { %v7839_v32 = vmax.f32 %v7836_v62, 0.0  ;;  %v7846_v35 = vadd.f32 %v12669_v22, %v15214_v33  ;;  %v7719_v42 = vpop.f32.mrb[23].mxu0  ;;  %v7956_v22 = vrot.slane %v10995_v24, 2 }
 0x450   : > { %v7838_v44 = vmax.f32 %v7835_v14, 0.0  ;;  %v7824_v58 = vadd.f32 %v15214_v33, %v7719_v42 }
 0x451   : > { %10969 = vst.msk [vmem:[%s15227_s14 + $0x16] sm:$0xff] %vm426_vm3, %v7839_v32  ;;  %v7859_v40 = vadd.f32 %v7854_v11, %v7846_v35  ;;  %v15290_v11 = vld [vmem:[%s13613_s6 + $0xa0] sm:$0xff]  ;;  %v7957_v32 = vrot.slane %v10996_v43, 2 }
 0x452   : > { %10968 = vst.msk [vmem:[%s15227_s14 + $0xe] sm:$0xfc] %vm7842_vm9, %v7838_v44  ;;  %v7837_v50 = vadd.f32 %v7830_v39, %v7824_v58  ;;  %v7858_v38 = vadd.f32 %v7852_v55, %v7824_v58  ;;  %v12672_v48 = vpop.f32.mrb[24].mxu0  ;;  %v10982_v39 = vld [vmem:[%s13613_s6 + $0x48] sm:$0xff] }
 0x453   : > { %v7862_v47 = vmax.f32 %v7859_v40, 0.0  ;;  %v7870_v21 = vadd.f32 %v12672_v48, %v15214_v33  ;;  %v7729_v49 = vpop.f32.mrb[25].mxu0  ;;  %v15293_v44 = vld [vmem:[%s13613_s6 + $0xa8] sm:$0xff] }
 0x454   : > { %v7840_v56 = vmax.f32 %v7837_v50, 0.0  ;;  %v7861_v3 = vmax.f32 %v7858_v38, 0.0  ;;  %v7847_v34 = vadd.f32 %v15214_v33, %v7729_v49  ;;  %v7936_v50 = vsel %vm370_vm0, %v7934_v17, %v7935_v19  ;;  %v11180_v48 = vld [vmem:[%s13613_s6 + $0x88] sm:$0xff] }
 0x455   : > { %10974 = vst.msk [vmem:[%s15227_s14 + $0x24] sm:$0xff] %vm426_vm3, %v7862_v47  ;;  %v7883_v52 = vadd.f32 %v7878_v7, %v7870_v21  ;;  %v10195_v7 = vrot.slane %v15282_v31, 6  ;;  %v10196_v47 = vrot.slane %v15285_v0, 6 }
 0x456   : > { %10970 = vst.msk [vmem:[%s15227_s14 + $0x1e] sm:$0x3] %vm659_vm5, %v7840_v56  ;;  %v7860_v26 = vadd.f32 %v7853_v29, %v7847_v34  ;;  %v7882_v53 = vadd.f32 %v7876_v13, %v7847_v34  ;;  %v12675_v54 = vpop.f32.mrb[26].mxu0  ;;  %v11179_v34 = vld [vmem:[%s13613_s6 + $0x80] sm:$0xff] }
 0x457   : > { %10973 = vst.msk [vmem:[%s15227_s14 + $0x1c] sm:$0xf0] %vm7865_vm10, %v7861_v3  ;;  %v7886_v59 = vmax.f32 %v7883_v52, 0.0  ;;  %v7894_v61 = vadd.f32 %v12675_v54, %v15214_v33  ;;  %v7739_v41 = vpop.f32.mrb[27].mxu0  ;;  %v10217_v52 = vrot.slane %v15290_v11, 4 }
 0x458   : > { %v7863_v25 = vmax.f32 %v7860_v26, 0.0  ;;  %v7885_v1 = vmax.f32 %v7882_v53, 0.0  ;;  %v7871_v45 = vadd.f32 %v15214_v33, %v7739_v41 }
 0x459   : > { %10979 = vst.msk [vmem:[%s15227_s14 + $0x32] sm:$0xff] %vm426_vm3, %v7886_v59  ;;  %v7898_v4 = vadd.f32 %v10981_v36, %v7894_v61  ;;  %v10218_v36 = vrot.slane %v15293_v44, 4  ;;  %v7958_v61 = vsel %vm381_vm2, %v7956_v22, %v7957_v32 }
 0x45a   : > { %10975 = vst.msk [vmem:[%s15227_s14 + $0x2c] sm:$0xf] %vm7868_vm11, %v7863_v25  ;;  %v7884_v20 = vadd.f32 %v7877_v60, %v7871_v45  ;;  %v12678_v63 = vpop.f32.mrb[28].mxu0 }
 0x45b   : > { %10978 = vst.msk [vmem:[%s15227_s14 + $0x2a] sm:$0xc0] %vm7889_vm12, %v7885_v1  ;;  %v7900_v8 = vmax.f32 %v7898_v4, 0.0  ;;  %v7905_v9 = vadd.f32 %v12678_v63, %v15214_v33  ;;  %v7749_v10 = vpop.f32.mrb[29].mxu0 }
 0x45c   : > { %v7887_v15 = vmax.f32 %v7884_v20, 0.0  ;;  %v7895_v16 = vadd.f32 %v15214_v33, %v7749_v10  ;;  %v10197_v20 = vsel %vm359_vm4, %v10195_v7, %v10196_v47 }
 0x45d   : > { %10983 = vst.msk [vmem:[%s15227_s14 + $0x40] sm:$0xff] %vm426_vm3, %v7900_v8  ;;  %v7918_v2 = vadd.f32 %v7912_v46, %v7905_v9 }
 0x45e   : > { %10980 = vst.msk [vmem:[%s15227_s14 + $0x3a] sm:$0x3f] %vm7892_vm13, %v7887_v15  ;;  %v7899_v18 = vadd.f32 %v10982_v39, %v7895_v16  ;;  %v12681_v23 = vpop.f32.mrb[30].mxu0  ;;  %v11193_v39 = vld [vmem:[%s13613_s6 + $0xb0] sm:$0xff] }
 0x45f   : > { %v7921_v28 = vmax.f32 %v7918_v2, 0.0  ;;  %v7907_v55 = vadd.f32 %v12681_v23, %v15214_v33  ;;  %v7759_v29 = vpop.f32.mrb[31].mxu0 }
 0x460   : > { %v7901_v37 = vmax.f32 %v7899_v18, 0.0  ;;  %v7906_v27 = vadd.f32 %v15214_v33, %v7759_v29  ;;  %v10219_v18 = vsel %vm370_vm0, %v10217_v52, %v10218_v36 }
 0x461   : > { %10987 = vst.msk [vmem:[%s15227_s14 + $0x4e] sm:$0xfc] %vm7842_vm9, %v7921_v28  ;;  %v7920_v62 = vadd.f32 %v7913_v12, %v7907_v55  ;;  %v7940_v14 = vadd.f32 %v7934_v17, %v7907_v55  ;;  %v11194_v12 = vld [vmem:[%s13613_s6 + $0xb8] sm:$0xff]  ;;  %v10239_v55 = vrot.slane %v11193_v39, 2 }
 0x462   : > { %10984 = vst.msk [vmem:[%s15227_s14 + $0x48] sm:$0xff] %vm426_vm3, %v7901_v37  ;;  %v7919_v13 = vadd.f32 %v7914_v30, %v7906_v27  ;;  %v12684_v60 = vpop.f32.mrb[32].mxu0  ;;  %v10240_v29 = vrot.slane %v11194_v12, 2 }
 0x463   : > { %v7923_v35 = vmax.f32 %v7920_v62, 0.0  ;;  %v7943_v42 = vmax.f32 %v7940_v14, 0.0  ;;  %v7929_v58 = vadd.f32 %v12684_v60, %v15214_v33  ;;  %v7769_v40 = vpop.f32.mrb[33].mxu0 }
 0x464   : > { %v12924_v38 = vpop.f32.mrb[18].mxu1  ;;  %v7922_v21 = vmax.f32 %v7919_v13, 0.0  ;;  %v7928_v49 = vadd.f32 %v15214_v33, %v7769_v40  ;;  %v10241_v11 = vsel %vm381_vm2, %v10239_v55, %v10240_v29 }
 0x465   : > { %v10178_v56 = vadd.f32 %v12924_v38, %v15214_v33  ;;  %v10070_v3 = vpop.f32.mrb[19].mxu1  ;;  %10989 = vst.msk [vmem:[%s15227_s14 + $0x5e] sm:$0x3] %vm659_vm5, %v7923_v35  ;;  %v7942_v26 = vadd.f32 %v7935_v19, %v7929_v58  ;;  %v7962_v53 = vadd.f32 %v7956_v22, %v7929_v58 }
 0x466   : > { %10992 = vst.msk [vmem:[%s15227_s14 + $0x5c] sm:$0xf0] %vm7865_vm10, %v7943_v42  ;;  %v10177_v54 = vadd.f32 %v15214_v33, %v10070_v3  ;;  %v7941_v57 = vadd.f32 %v7936_v50, %v7928_v49  ;;  %v12687_v59 = vpop.f32.mrb[34].mxu0 }
 0x467   : > { %10988 = vst.msk [vmem:[%s15227_s14 + $0x56] sm:$0xff] %vm426_vm3, %v7922_v21  ;;  %v10182_v41 = vadd.f32 %v11180_v48, %v10178_v56  ;;  %v7945_v25 = vmax.f32 %v7942_v26, 0.0  ;;  %v7965_v1 = vmax.f32 %v7962_v53, 0.0  ;;  %v7951_v45 = vadd.f32 %v12687_v59, %v15214_v33  ;;  %v7779_v6 = vpop.f32.mrb[35].mxu0  ;;  %v11198_v48 = vld [vmem:[%s13613_s6 + $0xc0] sm:$0xff] }
 0x468   : > { %v10181_v4 = vadd.f32 %v11179_v34, %v10177_v54  ;;  %v12927_v46 = vpop.f32.mrb[20].mxu1  ;;  %v7944_v63 = vmax.f32 %v7941_v57, 0.0  ;;  %v7950_v5 = vadd.f32 %v15214_v33, %v7779_v6  ;;  %v11207_v57 = vld [vmem:[%s13613_s6 + $0xe0] sm:$0xff] }
 0x469   : > { %v10184_v8 = vmax.f32 %v10182_v41, 0.0  ;;  %v10189_v9 = vadd.f32 %v12927_v46, %v15214_v33  ;;  %v10080_v10 = vpop.f32.mrb[21].mxu1  ;;  %10994 = vst.msk [vmem:[%s15227_s14 + $0x6c] sm:$0xf] %vm7868_vm11, %v7945_v25  ;;  %v7964_v15 = vadd.f32 %v7957_v32, %v7951_v45  ;;  %v11199_v25 = vld [vmem:[%s13613_s6 + $0xc8] sm:$0xff] }
 0x46a   : > { %10997 = vst.msk [vmem:[%s15227_s14 + $0x6a] sm:$0xc0] %vm7889_vm12, %v7965_v1  ;;  %v10183_v16 = vmax.f32 %v10181_v4, 0.0  ;;  %v10188_v51 = vadd.f32 %v15214_v33, %v10080_v10  ;;  %v7963_v2 = vadd.f32 %v7958_v61, %v7950_v5  ;;  %v11208_v45 = vld [vmem:[%s13613_s6 + $0xe8] sm:$0xff] }
 0x46b   : > { %10993 = vst.msk [vmem:[%s15227_s14 + $0x64] sm:$0xff] %vm426_vm3, %v7944_v63  ;;  %11182 = vst.msk [vmem:[%s15227_s14 + $0x88] sm:$0xff] %vm426_vm3, %v10184_v8  ;;  %v10202_v17 = vadd.f32 %v10197_v20, %v10189_v9  ;;  %v7967_v23 = vmax.f32 %v7964_v15, 0.0  ;;  %v10295_v20 = vrot.slane %v11207_v57, 4  ;;  %v10296_v8 = vrot.slane %v11208_v45, 4  ;;  %v11212_v9 = vld [vmem:[%s13613_s6 + $0xf0] sm:$0xff] }
 0x46c   : > { %11181 = vst.msk [vmem:[%s15227_s14 + $0x80] sm:$0xff] %vm426_vm3, %v10183_v16  ;;  %v10201_v24 = vadd.f32 %v10195_v7, %v10188_v51  ;;  %v12930_v28 = vpop.f32.mrb[22].mxu1  ;;  %v7966_v30 = vmax.f32 %v7963_v2, 0.0  ;;  %v11202_v7 = vld [vmem:[%s13613_s6 + $0xd0] sm:$0xff]  ;;  %v11213_v2 = vld [vmem:[%s13613_s6 + $0xf8] sm:$0xff] }
 0x46d   : > { %v10205_v19 = vmax.f32 %v10202_v17, 0.0  ;;  %v10211_v43 = vadd.f32 %v12930_v28, %v15214_v33  ;;  %v10090_v37 = vpop.f32.mrb[23].mxu1  ;;  %10999 = vst.msk [vmem:[%s15227_s14 + $0x7a] sm:$0x3f] %vm7892_vm13, %v7967_v23  ;;  %v10273_v53 = vrot.slane %v11202_v7, 6  ;;  %v10317_v23 = vrot.slane %v11212_v9, 2 }
 0x46e   : > { %v10204_v27 = vmax.f32 %v10201_v24, 0.0  ;;  %v10190_v31 = vadd.f32 %v15214_v33, %v10090_v37  ;;  %10998 = vst.msk [vmem:[%s15227_s14 + $0x72] sm:$0xff] %vm426_vm3, %v7966_v30  ;;  %v10318_v37 = vrot.slane %v11213_v2, 2 }
 0x46f   : > { %11186 = vst.msk [vmem:[%s15227_s14 + $0x96] sm:$0xff] %vm426_vm3, %v10205_v19  ;;  %v10224_v0 = vadd.f32 %v10219_v18, %v10211_v43 }
 0x470   : > { %11185 = vst.msk [vmem:[%s15227_s14 + $0x8e] sm:$0xfc] %vm7842_vm9, %v10204_v27  ;;  %v10203_v62 = vadd.f32 %v10196_v47, %v10190_v31  ;;  %v10223_v14 = vadd.f32 %v10217_v52, %v10190_v31  ;;  %v12933_v22 = vpop.f32.mrb[24].mxu1  ;;  %v11203_v52 = vld [vmem:[%s13613_s6 + $0xd8] sm:$0xff] }
 0x471   : > { %v10227_v13 = vmax.f32 %v10224_v0, 0.0  ;;  %v10233_v60 = vadd.f32 %v12933_v22, %v15214_v33  ;;  %v10100_v32 = vpop.f32.mrb[25].mxu1  ;;  %v10274_v1 = vrot.slane %v11203_v52, 6 }
 0x472   : > { %v10206_v35 = vmax.f32 %v10203_v62, 0.0  ;;  %v10226_v42 = vmax.f32 %v10223_v14, 0.0  ;;  %v10212_v44 = vadd.f32 %v15214_v33, %v10100_v32 }
 0x473   : > { %11191 = vst.msk [vmem:[%s15227_s14 + $0xa4] sm:$0xff] %vm426_vm3, %v10227_v13  ;;  %v10246_v58 = vadd.f32 %v10241_v11, %v10233_v60  ;;  %v10275_v15 = vsel %vm359_vm4, %v10273_v53, %v10274_v1 }
 0x474   : > { %11187 = vst.msk [vmem:[%s15227_s14 + $0x9e] sm:$0x3] %vm659_vm5, %v10206_v35  ;;  %v10225_v40 = vadd.f32 %v10218_v36, %v10212_v44  ;;  %v10245_v50 = vadd.f32 %v10239_v55, %v10212_v44  ;;  %v12936_v38 = vpop.f32.mrb[26].mxu1  ;;  %v10297_v55 = vsel %vm370_vm0, %v10295_v20, %v10296_v8  ;;  %v10319_v35 = vsel %vm381_vm2, %v10317_v23, %v10318_v37 }
 0x475   : > { %11190 = vst.msk [vmem:[%s15227_s14 + $0x9c] sm:$0xf0] %vm7865_vm10, %v10226_v42  ;;  %v10249_v47 = vmax.f32 %v10246_v58, 0.0  ;;  %v10255_v21 = vadd.f32 %v12936_v38, %v15214_v33  ;;  %v10110_v49 = vpop.f32.mrb[27].mxu1 }
 0x476   : > { %v10228_v56 = vmax.f32 %v10225_v40, 0.0  ;;  %v10248_v3 = vmax.f32 %v10245_v50, 0.0  ;;  %v10234_v34 = vadd.f32 %v15214_v33, %v10110_v49 }
 0x477   : > { %11196 = vst.msk [vmem:[%s15227_s14 + $0xb2] sm:$0xff] %vm426_vm3, %v10249_v47  ;;  %v10259_v26 = vadd.f32 %v11198_v48, %v10255_v21 }
 0x478   : > { %11192 = vst.msk [vmem:[%s15227_s14 + $0xac] sm:$0xf] %vm7868_vm11, %v10228_v56  ;;  %v10247_v54 = vadd.f32 %v10240_v29, %v10234_v34  ;;  %v12939_v36 = vpop.f32.mrb[28].mxu1 }
 0x479   : > { %11195 = vst.msk [vmem:[%s15227_s14 + $0xaa] sm:$0xc0] %vm7889_vm12, %v10248_v3  ;;  %v10261_v59 = vmax.f32 %v10259_v26, 0.0  ;;  %v10266_v61 = vadd.f32 %v12939_v36, %v15214_v33  ;;  %v10120_v41 = vpop.f32.mrb[29].mxu1 }
 0x47a   : > { %v10250_v6 = vmax.f32 %v10247_v54, 0.0  ;;  %v10256_v4 = vadd.f32 %v15214_v33, %v10120_v41 }
 0x47b   : > { %11200 = vst.msk [vmem:[%s15227_s14 + $0xc0] sm:$0xff] %vm426_vm3, %v10261_v59  ;;  %v10279_v46 = vadd.f32 %v10273_v53, %v10266_v61 }
 0x47c   : > { %11197 = vst.msk [vmem:[%s15227_s14 + $0xba] sm:$0x3f] %vm7892_vm13, %v10250_v6  ;;  %v10260_v63 = vadd.f32 %v11199_v25, %v10256_v4  ;;  %v12942_v5 = vpop.f32.mrb[30].mxu1 }
 0x47d   : > { %v10282_v10 = vmax.f32 %v10279_v46, 0.0  ;;  %v10268_v39 = vadd.f32 %v12942_v5, %v15214_v33  ;;  %v10130_v12 = vpop.f32.mrb[31].mxu1 }
 0x47e   : > { %v10262_v16 = vmax.f32 %v10260_v63, 0.0  ;;  %v10267_v51 = vadd.f32 %v15214_v33, %v10130_v12 }
 0x47f   : > { %11204 = vst.msk [vmem:[%s15227_s14 + $0xce] sm:$0xfc] %vm7842_vm9, %v10282_v10  ;;  %v10281_v17 = vadd.f32 %v10274_v1, %v10268_v39  ;;  %v10301_v18 = vadd.f32 %v10295_v20, %v10268_v39 }
 0x480   : > { %11201 = vst.msk [vmem:[%s15227_s14 + $0xc8] sm:$0xff] %vm426_vm3, %v10262_v16  ;;  %v10280_v24 = vadd.f32 %v10275_v15, %v10267_v51  ;;  %v12945_v28 = vpop.f32.mrb[32].mxu1 }
 0x481   : > { %v10284_v29 = vmax.f32 %v10281_v17, 0.0  ;;  %v10304_v30 = vmax.f32 %v10301_v18, 0.0  ;;  %v10290_v19 = vadd.f32 %v12945_v28, %v15214_v33  ;;  %v10140_v43 = vpop.f32.mrb[33].mxu1 }
 0x482   : > { %v10283_v27 = vmax.f32 %v10280_v24, 0.0  ;;  %v10289_v31 = vadd.f32 %v15214_v33, %v10140_v43 }
 0x483   : > { %11206 = vst.msk [vmem:[%s15227_s14 + $0xde] sm:$0x3] %vm659_vm5, %v10284_v29  ;;  %v10303_v0 = vadd.f32 %v10296_v8, %v10290_v19  ;;  %v10323_v62 = vadd.f32 %v10317_v23, %v10290_v19 }
 0x484   : > { %11209 = vst.msk [vmem:[%s15227_s14 + $0xdc] sm:$0xf0] %vm7865_vm10, %v10304_v30  ;;  %v10302_v14 = vadd.f32 %v10297_v55, %v10289_v31  ;;  %v12948_v22 = vpop.f32.mrb[34].mxu1 }
 0x485   : > { %11205 = vst.msk [vmem:[%s15227_s14 + $0xd6] sm:$0xff] %vm426_vm3, %v10283_v27  ;;  %v10306_v11 = vmax.f32 %v10303_v0, 0.0  ;;  %v10326_v13 = vmax.f32 %v10323_v62, 0.0  ;;  %v10312_v60 = vadd.f32 %v12948_v22, %v15214_v33  ;;  %v10150_v32 = vpop.f32.mrb[35].mxu1 }
 0x486   : > { %v10305_v42 = vmax.f32 %v10302_v14, 0.0  ;;  %v10311_v44 = vadd.f32 %v15214_v33, %v10150_v32 }
 0x487   : > { %11211 = vst.msk [vmem:[%s15227_s14 + $0xec] sm:$0xf] %vm7868_vm11, %v10306_v11  ;;  %v10325_v58 = vadd.f32 %v10318_v37, %v10312_v60 }
 0x488   : > { %11214 = vst.msk [vmem:[%s15227_s14 + $0xea] sm:$0xc0] %vm7889_vm12, %v10326_v13  ;;  %v10324_v40 = vadd.f32 %v10319_v35, %v10311_v44 }
 0x489   : > { %11210 = vst.msk [vmem:[%s15227_s14 + $0xe4] sm:$0xff] %vm426_vm3, %v10305_v42  ;;  %v10328_v50 = vmax.f32 %v10325_v58, 0.0 }
 0x48a   : > { %v10327_v38 = vmax.f32 %v10324_v40, 0.0 }
 0x48b   : > { %11216 = vst.msk [vmem:[%s15227_s14 + $0xfa] sm:$0x3f] %vm7892_vm13, %v10328_v50 }
 0x48c   : > { %11215 = vst.msk [vmem:[%s15227_s14 + $0xf2] sm:$0xff] %vm426_vm3, %v10327_v38 }
 0x48d PF: > { %s15_s18 = sadd.s32 1, %s13540_s18  }
 0x48e   : > { %p12_p4 = scmp.ge.s32.totalorder %s15_s18, 4  }
 0x490   :  { %14 = sbr.rel (!%p12_p4) target bundleno = 1 (0x1), region = 116 }

</bundles_post_ra>
